<compile_context>
chip_gen: v7x
topology: tpu7x:2x2x1
jax: 0.10.0
libtpu: 0.0.40
codegen_flags: <defaults>
</compile_context>

<pallas_src>
import jax
import jax.numpy as jnp
import numpy as np
from jax import lax
from jax.experimental import pallas as pl
from jax.experimental.pallas import tpu as pltpu


# ------------------------------ helpers --------------------------------------

def _rows_per_strip(h, w):
    """Largest divisor of `h` keeping a strip's flat row count rps*(w+2) <= 128,
    so acc + one tap + one dot result stay well inside the 64-vreg file."""
    for rps in (8, 4, 2, 1):
        if h % rps == 0 and rps * (w + 2) <= 128:
            return rps
    return 1  # TODO(synk): very wide images would additionally need W tiling.


# ------------------------------ fused kernel ---------------------------------

def _encoder2_fused_kernel(x_ref, w2_ref, b2_ref, w3_ref, b3_ref,
                           w4_ref, b4_ref, o_ref,
                           buf2, buf3, act3, buf4):
    # x_ref : (1, H, W, 3)      input image (conv1 already folded into w2/b2)
    # w2_ref: (3, 3, 3, 64)     b2_ref: (1, 64)
    # w3_ref: (3, 3, 64, 64)    b3_ref: (1, 64)
    # w4_ref: (3, 3, 64, 128)   b4_ref: (1, 128)
    # o_ref : (1, (H/2)*(W/2+2), 128)   lane-dense flat output (junk cols kept)
    # buf2/buf3/buf4 : flat reflection-padded conv inputs (+1 over-read row)
    # act3  : flat conv3 output (pre-pool), padded width
    _, H, W, _ = x_ref.shape
    WP = W + 2
    Hh, Wh = H // 2, W // 2
    WPh = Wh + 2
    rps = _rows_per_strip(H, W)
    nstrips = H // rps
    strip_m = rps * WP

    def fix_pads(buf, h, w):
        """Write the 1-px reflection pads of a flat padded buffer whose interior
        rows are already stored; zero the over-read row.  Order matters: l/r
        columns first, then full top/bottom rows (gives correct corners)."""
        wp = w + 2
        for r in range(1, h + 1):                                  # left/right
            buf[pl.ds(r * wp, 1), :] = buf[pl.ds(r * wp + 2, 1), :]
            buf[pl.ds(r * wp + w + 1, 1), :] = buf[pl.ds(r * wp + w - 1, 1), :]
        buf[pl.ds(0, wp), :] = buf[pl.ds(2 * wp, wp), :]           # top row
        buf[pl.ds((h + 1) * wp, wp), :] = buf[pl.ds((h - 1) * wp, wp), :]
        buf[pl.ds((h + 2) * wp, wp), :] = jnp.zeros((wp, buf.shape[1]),
                                                    jnp.float32)   # over-read row

    def conv3x3_strip(buf, w_r, b_r, base, m, wp):
        """'Valid' 3x3 conv over `m` flat rows starting at flat row `base` of a
        padded buffer, computed at padded width (last 2 cols per image row are
        junk).  All 9 taps are contiguous leading-dim offset loads from VMEM;
        acc is initialised from the first tap.  Returns bias+ReLU'd (m, Cout)."""
        acc = None
        for kh in range(3):
            for kw in range(3):
                tap = buf[pl.ds(base + kh * wp + kw, m), :]
                part = jnp.dot(tap, w_r[kh, kw],
                               preferred_element_type=jnp.float32)
                acc = part if acc is None else acc + part
        return jnp.maximum(acc + b_r[...], 0.0)

    # ---- stage 0: build conv2's padded input from x (H small row stores) ----
    for r in range(H):
        buf2[pl.ds((r + 1) * WP + 1, W), :] = x_ref[0, r]
    fix_pads(buf2, H, W)

    # ---- stage 1: conv2 (= folded conv1+conv2) + ReLU, strip by strip -------
    # Each finished strip is stored straight into buf3's interior: the junk
    # columns land on buf3's pad slots and are overwritten by fix_pads below.
    def conv2_body(s, carry):
        base = s * strip_m
        if strip_m % 8 == 0:
            base = pl.multiple_of(base, 8)
        a = conv3x3_strip(buf2, w2_ref, b2_ref, base, strip_m, WP)
        buf3[pl.ds(WP + 1 + base, strip_m), :] = a
        return carry

    lax.fori_loop(0, nstrips, conv2_body, 0)
    fix_pads(buf3, H, W)

    # ---- stage 2: conv3 + ReLU, strip by strip, into act3 -------------------
    def conv3_body(s, carry):
        base = s * strip_m
        if strip_m % 8 == 0:
            base = pl.multiple_of(base, 8)
        a = conv3x3_strip(buf3, w3_ref, b3_ref, base, strip_m, WP)
        act3[pl.ds(base, strip_m), :] = a
        return carry

    lax.fori_loop(0, nstrips, conv3_body, 0)

    # ---- stage 3: 2x2 / stride-2 max-pool, row-pair by row-pair -------------
    # Pooled rows go straight into the interior of conv4's padded buffer.
    # TODO(synk): MaxPool2d(return_indices=True) also yields pool_idx, but the
    # module's forward() never returns it, so indices are not computed.
    for pi in range(Hh):
        r0 = act3[pl.ds((2 * pi) * WP, W), :]          # image row 2*pi, valid cols
        r1 = act3[pl.ds((2 * pi + 1) * WP, W), :]
        vm = jnp.maximum(r0, r1).reshape(Wh, 2, -1)     # pair adjacent columns
        hm = jnp.maximum(vm[:, 0, :], vm[:, 1, :])      # (Wh, 64)
        buf4[pl.ds((pi + 1) * WPh + 1, Wh), :] = hm
    fix_pads(buf4, Hh, Wh)

    # ---- stage 4: conv4 + ReLU (small: single strip), lane-dense store ------
    o_ref[0] = conv3x3_strip(buf4, w4_ref, b4_ref, 0, Hh * WPh, WPh)


# ------------------------------- wrapper --------------------------------------

def encoder2_forward(x_nchw, p):
    x = jnp.transpose(x_nchw, (0, 2, 3, 1)).astype(jnp.float32)    # NCHW -> NHWC
    N, H, W, Cin = x.shape
    assert H % 2 == 0 and W % 2 == 0 and H >= 4 and W >= 4, (H, W)
    Hh, Wh = H // 2, W // 2
    WP, WPh = W + 2, Wh + 2

    # Fold conv1 (1x1 linear) into conv2: reflection padding commutes with a
    # 1x1 conv, so  conv2(pad(conv1(x))) == conv2'(pad(x))  with
    #   w2'[kh,kw,i,o] = sum_c w1[i,c] * w2[kh,kw,c,o]
    #   b2'            = b2 + sum_{kh,kw,c} b1[c] * w2[kh,kw,c,o]
    hi = jax.lax.Precision.HIGHEST
    w2f = jnp.einsum("ic,hwco->hwio", p["w1"], p["w2"], precision=hi)
    b2f = p["b2"] + jnp.einsum("xc,hwco->xo", p["b1"], p["w2"], precision=hi)

    rows23 = (H + 3) * WP        # padded conv2/conv3 inputs (+1 over-read row)
    rows4 = (Hh + 3) * WPh

    out_flat = pl.pallas_call(
        _encoder2_fused_kernel,
        out_shape=jax.ShapeDtypeStruct((N, Hh * WPh, 128), jnp.float32),
        grid=(N,),
        in_specs=[
            pl.BlockSpec((1, H, W, Cin), lambda n: (n, 0, 0, 0)),
            pl.BlockSpec((3, 3, Cin, 64), lambda n: (0, 0, 0, 0)),   # resident
            pl.BlockSpec((1, 64), lambda n: (0, 0)),
            pl.BlockSpec((3, 3, 64, 64), lambda n: (0, 0, 0, 0)),    # resident
            pl.BlockSpec((1, 64), lambda n: (0, 0)),
            pl.BlockSpec((3, 3, 64, 128), lambda n: (0, 0, 0, 0)),   # resident
            pl.BlockSpec((1, 128), lambda n: (0, 0)),
        ],
        out_specs=pl.BlockSpec((1, Hh * WPh, 128), lambda n: (n, 0, 0)),
        scratch_shapes=[
            pltpu.VMEM((rows23, Cin), jnp.float32),  # buf2: padded conv2 input
            pltpu.VMEM((rows23, 64), jnp.float32),   # buf3: padded conv3 input
            pltpu.VMEM((H * WP, 64), jnp.float32),   # act3: conv3 out (pre-pool)
            pltpu.VMEM((rows4, 64), jnp.float32),    # buf4: padded conv4 input
        ],
        compiler_params=pltpu.CompilerParams(
            dimension_semantics=("parallel",),       # batch across v7x's 2 TCs
            vmem_limit_bytes=32 * 1024 * 1024,       # working set is ~3 MiB here
        ),
    )(x, w2f, b2f, p["w3"], p["b3"], p["w4"], p["b4"])

    # drop the 2 junk columns per pooled row, then NHWC -> NCHW
    out = out_flat.reshape(N, Hh, WPh, 128)[:, :, :Wh, :]
    return jnp.transpose(out, (0, 3, 1, 2))


# ------------------------------ parameters ------------------------------------

def init_params(key):
    ks = jax.random.split(key, 8)

    def nrm(k, shape, scale):
        return scale * jax.random.normal(k, shape, jnp.float32)

    return {
        # conv1: 1x1, 3->3   (stored as (Cin, Cout))
        "w1": nrm(ks[0], (3, 3), 0.5),
        "b1": nrm(ks[1], (1, 3), 0.1),
        # conv2: 3x3, 3->64  (HWIO layout)
        "w2": nrm(ks[2], (3, 3, 3, 64), 0.2),
        "b2": nrm(ks[3], (1, 64), 0.1),
        # conv3: 3x3, 64->64
        "w3": nrm(ks[4], (3, 3, 64, 64), 0.05),
        "b3": nrm(ks[5], (1, 64), 0.1),
        # conv4: 3x3, 64->128
        "w4": nrm(ks[6], (3, 3, 64, 128), 0.05),
        "b4": nrm(ks[7], (1, 128), 0.1),
    }


# --------------------------- pure-JAX reference -------------------------------

def _reflect_pad1(x):  # NHWC, pad=1 on H and W (nn.ReflectionPad2d((1,1,1,1)))
    return jnp.pad(x, ((0, 0), (1, 1), (1, 1), (0, 0)), mode="reflect")


def _ref_forward(x_nchw, p):
    # Un-fused reference implementing the original module graph (conv1 kept
    # separate) so both the kernel and the conv1->conv2 folding are validated.
    x = jnp.transpose(x_nchw, (0, 2, 3, 1)).astype(jnp.float32)

    def conv(x, w, b):
        y = lax.conv_general_dilated(
            x, w, (1, 1), "VALID",
            dimension_numbers=("NHWC", "HWIO", "NHWC"))
        return y + b.reshape(1, 1, 1, -1)

    out = conv(x, p["w1"].reshape(1, 1, 3, 3), p["b1"])
    out = _reflect_pad1(out)
    out = jax.nn.relu(conv(out, p["w2"], p["b2"]))
    out = _reflect_pad1(out)
    pool = jax.nn.relu(conv(out, p["w3"], p["b3"]))
    out = lax.reduce_window(pool, -jnp.inf, lax.max,
                            (1, 2, 2, 1), (1, 2, 2, 1), "VALID")
    out = _reflect_pad1(out)
    out = jax.nn.relu(conv(out, p["w4"], p["b4"]))
    return jnp.transpose(out, (0, 3, 1, 2))


# --------------------------------- main ----------------------------------------

if __name__ == "__main__":
    key = jax.random.PRNGKey(0)
    k_x, k_p = jax.random.split(key)
    x = jax.random.normal(k_x, (2, 3, 16, 16), jnp.float32)   # NCHW like PyTorch
    params = init_params(k_p)

    fwd = jax.jit(encoder2_forward)
    y = jax.block_until_ready(fwd(x, params))
    assert y.shape == (2, 128, 8, 8), y.shape

    y_ref = jax.block_until_ready(_ref_forward(x, params))
    np.testing.assert_allclose(np.asarray(y), np.asarray(y_ref),
                               rtol=1e-3, atol=1e-3)
    print("KERNEL_OK")
</pallas_src>

<mosaic_0001>
module attributes {stable_mosaic.version = 11 : i64} {
  func.func @_encoder2_fused_kernel(%arg0: i32, %arg1: memref<1x16x16x3xf32, #tpu.memory_space<vmem>>, %arg2: memref<3x3x3x64xf32, #tpu.memory_space<vmem>>, %arg3: memref<1x64xf32, #tpu.memory_space<vmem>>, %arg4: memref<3x3x64x64xf32, #tpu.memory_space<vmem>>, %arg5: memref<1x64xf32, #tpu.memory_space<vmem>>, %arg6: memref<3x3x64x128xf32, #tpu.memory_space<vmem>>, %arg7: memref<1x128xf32, #tpu.memory_space<vmem>>, %arg8: memref<1x80x128xf32, #tpu.memory_space<vmem>>, %arg9: memref<342x3xf32, #tpu.memory_space<vmem>>, %arg10: memref<342x64xf32, #tpu.memory_space<vmem>>, %arg11: memref<288x64xf32, #tpu.memory_space<vmem>>, %arg12: memref<110x64xf32, #tpu.memory_space<vmem>>) attributes {dimension_semantics = [#tpu.dimension_semantics<parallel>], iteration_bounds = array<i64: 2>, scalar_prefetch = 0 : i64, scratch_operands = 4 : i64, tpu.core_type = #tpu.core_type<tc>, window_params = [{transform_indices = @transform_0, window_bounds = array<i64: 1, 16, 16, 3>}, {pipeline_mode = #tpu.pipeline_mode<synchronous>, transform_indices = @transform_1, window_bounds = array<i64: 3, 3, 3, 64>}, {pipeline_mode = #tpu.pipeline_mode<synchronous>, transform_indices = @transform_2, window_bounds = array<i64: 1, 64>}, {pipeline_mode = #tpu.pipeline_mode<synchronous>, transform_indices = @transform_3, window_bounds = array<i64: 3, 3, 64, 64>}, {pipeline_mode = #tpu.pipeline_mode<synchronous>, transform_indices = @transform_4, window_bounds = array<i64: 1, 64>}, {pipeline_mode = #tpu.pipeline_mode<synchronous>, transform_indices = @transform_5, window_bounds = array<i64: 3, 3, 64, 128>}, {pipeline_mode = #tpu.pipeline_mode<synchronous>, transform_indices = @transform_6, window_bounds = array<i64: 1, 128>}, {transform_indices = @transform_7, window_bounds = array<i64: 1, 80, 128>}]} {
    %c0 = arith.constant 0 : index
    %c0_0 = arith.constant 0 : index
    %c0_1 = arith.constant 0 : index
    %c0_2 = arith.constant 0 : index
    %0 = vector.load %arg1[%c0, %c0_0, %c0_1, %c0_2] : memref<1x16x16x3xf32, #tpu.memory_space<vmem>>, vector<1x1x16x3xf32>
    %1 = vector.shape_cast %0 : vector<1x1x16x3xf32> to vector<16x3xf32>
    %c19 = arith.constant 19 : index
    %c0_3 = arith.constant 0 : index
    %2 = vector.load %arg9[%c19, %c0_3] : memref<342x3xf32, #tpu.memory_space<vmem>>, vector<16x3xf32>
    tpu.vector_store %arg9[%c19, %c0_3], %1 {strides = array<i32>} : memref<342x3xf32, #tpu.memory_space<vmem>>, vector<16x3xf32>,
    %c0_4 = arith.constant 0 : index
    %c1 = arith.constant 1 : index
    %c0_5 = arith.constant 0 : index
    %c0_6 = arith.constant 0 : index
    %3 = vector.load %arg1[%c0_4, %c1, %c0_5, %c0_6] : memref<1x16x16x3xf32, #tpu.memory_space<vmem>>, vector<1x1x16x3xf32>
    %4 = vector.shape_cast %3 : vector<1x1x16x3xf32> to vector<16x3xf32>
    %c37 = arith.constant 37 : index
    %c0_7 = arith.constant 0 : index
    %5 = vector.load %arg9[%c37, %c0_7] : memref<342x3xf32, #tpu.memory_space<vmem>>, vector<16x3xf32>
    tpu.vector_store %arg9[%c37, %c0_7], %4 {strides = array<i32>} : memref<342x3xf32, #tpu.memory_space<vmem>>, vector<16x3xf32>,
    %c0_8 = arith.constant 0 : index
    %c2 = arith.constant 2 : index
    %c0_9 = arith.constant 0 : index
    %c0_10 = arith.constant 0 : index
    %6 = vector.load %arg1[%c0_8, %c2, %c0_9, %c0_10] : memref<1x16x16x3xf32, #tpu.memory_space<vmem>>, vector<1x1x16x3xf32>
    %7 = vector.shape_cast %6 : vector<1x1x16x3xf32> to vector<16x3xf32>
    %c55 = arith.constant 55 : index
    %c0_11 = arith.constant 0 : index
    %8 = vector.load %arg9[%c55, %c0_11] : memref<342x3xf32, #tpu.memory_space<vmem>>, vector<16x3xf32>
    tpu.vector_store %arg9[%c55, %c0_11], %7 {strides = array<i32>} : memref<342x3xf32, #tpu.memory_space<vmem>>, vector<16x3xf32>,
    %c0_12 = arith.constant 0 : index
    %c3 = arith.constant 3 : index
    %c0_13 = arith.constant 0 : index
    %c0_14 = arith.constant 0 : index
    %9 = vector.load %arg1[%c0_12, %c3, %c0_13, %c0_14] : memref<1x16x16x3xf32, #tpu.memory_space<vmem>>, vector<1x1x16x3xf32>
    %10 = vector.shape_cast %9 : vector<1x1x16x3xf32> to vector<16x3xf32>
    %c73 = arith.constant 73 : index
    %c0_15 = arith.constant 0 : index
    %11 = vector.load %arg9[%c73, %c0_15] : memref<342x3xf32, #tpu.memory_space<vmem>>, vector<16x3xf32>
    tpu.vector_store %arg9[%c73, %c0_15], %10 {strides = array<i32>} : memref<342x3xf32, #tpu.memory_space<vmem>>, vector<16x3xf32>,
    %c0_16 = arith.constant 0 : index
    %c4 = arith.constant 4 : index
    %c0_17 = arith.constant 0 : index
    %c0_18 = arith.constant 0 : index
    %12 = vector.load %arg1[%c0_16, %c4, %c0_17, %c0_18] : memref<1x16x16x3xf32, #tpu.memory_space<vmem>>, vector<1x1x16x3xf32>
    %13 = vector.shape_cast %12 : vector<1x1x16x3xf32> to vector<16x3xf32>
    %c91 = arith.constant 91 : index
    %c0_19 = arith.constant 0 : index
    %14 = vector.load %arg9[%c91, %c0_19] : memref<342x3xf32, #tpu.memory_space<vmem>>, vector<16x3xf32>
    tpu.vector_store %arg9[%c91, %c0_19], %13 {strides = array<i32>} : memref<342x3xf32, #tpu.memory_space<vmem>>, vector<16x3xf32>,
    %c0_20 = arith.constant 0 : index
    %c5 = arith.constant 5 : index
    %c0_21 = arith.constant 0 : index
    %c0_22 = arith.constant 0 : index
    %15 = vector.load %arg1[%c0_20, %c5, %c0_21, %c0_22] : memref<1x16x16x3xf32, #tpu.memory_space<vmem>>, vector<1x1x16x3xf32>
    %16 = vector.shape_cast %15 : vector<1x1x16x3xf32> to vector<16x3xf32>
    %c109 = arith.constant 109 : index
    %c0_23 = arith.constant 0 : index
    %17 = vector.load %arg9[%c109, %c0_23] : memref<342x3xf32, #tpu.memory_space<vmem>>, vector<16x3xf32>
    tpu.vector_store %arg9[%c109, %c0_23], %16 {strides = array<i32>} : memref<342x3xf32, #tpu.memory_space<vmem>>, vector<16x3xf32>,
    %c0_24 = arith.constant 0 : index
    %c6 = arith.constant 6 : index
    %c0_25 = arith.constant 0 : index
    %c0_26 = arith.constant 0 : index
    %18 = vector.load %arg1[%c0_24, %c6, %c0_25, %c0_26] : memref<1x16x16x3xf32, #tpu.memory_space<vmem>>, vector<1x1x16x3xf32>
    %19 = vector.shape_cast %18 : vector<1x1x16x3xf32> to vector<16x3xf32>
    %c127 = arith.constant 127 : index
    %c0_27 = arith.constant 0 : index
    %20 = vector.load %arg9[%c127, %c0_27] : memref<342x3xf32, #tpu.memory_space<vmem>>, vector<16x3xf32>
    tpu.vector_store %arg9[%c127, %c0_27], %19 {strides = array<i32>} : memref<342x3xf32, #tpu.memory_space<vmem>>, vector<16x3xf32>,
    %c0_28 = arith.constant 0 : index
    %c7 = arith.constant 7 : index
    %c0_29 = arith.constant 0 : index
    %c0_30 = arith.constant 0 : index
    %21 = vector.load %arg1[%c0_28, %c7, %c0_29, %c0_30] : memref<1x16x16x3xf32, #tpu.memory_space<vmem>>, vector<1x1x16x3xf32>
    %22 = vector.shape_cast %21 : vector<1x1x16x3xf32> to vector<16x3xf32>
    %c145 = arith.constant 145 : index
    %c0_31 = arith.constant 0 : index
    %23 = vector.load %arg9[%c145, %c0_31] : memref<342x3xf32, #tpu.memory_space<vmem>>, vector<16x3xf32>
    tpu.vector_store %arg9[%c145, %c0_31], %22 {strides = array<i32>} : memref<342x3xf32, #tpu.memory_space<vmem>>, vector<16x3xf32>,
    %c0_32 = arith.constant 0 : index
    %c8 = arith.constant 8 : index
    %c0_33 = arith.constant 0 : index
    %c0_34 = arith.constant 0 : index
    %24 = vector.load %arg1[%c0_32, %c8, %c0_33, %c0_34] : memref<1x16x16x3xf32, #tpu.memory_space<vmem>>, vector<1x1x16x3xf32>
    %25 = vector.shape_cast %24 : vector<1x1x16x3xf32> to vector<16x3xf32>
    %c163 = arith.constant 163 : index
    %c0_35 = arith.constant 0 : index
    %26 = vector.load %arg9[%c163, %c0_35] : memref<342x3xf32, #tpu.memory_space<vmem>>, vector<16x3xf32>
    tpu.vector_store %arg9[%c163, %c0_35], %25 {strides = array<i32>} : memref<342x3xf32, #tpu.memory_space<vmem>>, vector<16x3xf32>,
    %c0_36 = arith.constant 0 : index
    %c9 = arith.constant 9 : index
    %c0_37 = arith.constant 0 : index
    %c0_38 = arith.constant 0 : index
    %27 = vector.load %arg1[%c0_36, %c9, %c0_37, %c0_38] : memref<1x16x16x3xf32, #tpu.memory_space<vmem>>, vector<1x1x16x3xf32>
    %28 = vector.shape_cast %27 : vector<1x1x16x3xf32> to vector<16x3xf32>
    %c181 = arith.constant 181 : index
    %c0_39 = arith.constant 0 : index
    %29 = vector.load %arg9[%c181, %c0_39] : memref<342x3xf32, #tpu.memory_space<vmem>>, vector<16x3xf32>
    tpu.vector_store %arg9[%c181, %c0_39], %28 {strides = array<i32>} : memref<342x3xf32, #tpu.memory_space<vmem>>, vector<16x3xf32>,
    %c0_40 = arith.constant 0 : index
    %c10 = arith.constant 10 : index
    %c0_41 = arith.constant 0 : index
    %c0_42 = arith.constant 0 : index
    %30 = vector.load %arg1[%c0_40, %c10, %c0_41, %c0_42] : memref<1x16x16x3xf32, #tpu.memory_space<vmem>>, vector<1x1x16x3xf32>
    %31 = vector.shape_cast %30 : vector<1x1x16x3xf32> to vector<16x3xf32>
    %c199 = arith.constant 199 : index
    %c0_43 = arith.constant 0 : index
    %32 = vector.load %arg9[%c199, %c0_43] : memref<342x3xf32, #tpu.memory_space<vmem>>, vector<16x3xf32>
    tpu.vector_store %arg9[%c199, %c0_43], %31 {strides = array<i32>} : memref<342x3xf32, #tpu.memory_space<vmem>>, vector<16x3xf32>,
    %c0_44 = arith.constant 0 : index
    %c11 = arith.constant 11 : index
    %c0_45 = arith.constant 0 : index
    %c0_46 = arith.constant 0 : index
    %33 = vector.load %arg1[%c0_44, %c11, %c0_45, %c0_46] : memref<1x16x16x3xf32, #tpu.memory_space<vmem>>, vector<1x1x16x3xf32>
    %34 = vector.shape_cast %33 : vector<1x1x16x3xf32> to vector<16x3xf32>
    %c217 = arith.constant 217 : index
    %c0_47 = arith.constant 0 : index
    %35 = vector.load %arg9[%c217, %c0_47] : memref<342x3xf32, #tpu.memory_space<vmem>>, vector<16x3xf32>
    tpu.vector_store %arg9[%c217, %c0_47], %34 {strides = array<i32>} : memref<342x3xf32, #tpu.memory_space<vmem>>, vector<16x3xf32>,
    %c0_48 = arith.constant 0 : index
    %c12 = arith.constant 12 : index
    %c0_49 = arith.constant 0 : index
    %c0_50 = arith.constant 0 : index
    %36 = vector.load %arg1[%c0_48, %c12, %c0_49, %c0_50] : memref<1x16x16x3xf32, #tpu.memory_space<vmem>>, vector<1x1x16x3xf32>
    %37 = vector.shape_cast %36 : vector<1x1x16x3xf32> to vector<16x3xf32>
    %c235 = arith.constant 235 : index
    %c0_51 = arith.constant 0 : index
    %38 = vector.load %arg9[%c235, %c0_51] : memref<342x3xf32, #tpu.memory_space<vmem>>, vector<16x3xf32>
    tpu.vector_store %arg9[%c235, %c0_51], %37 {strides = array<i32>} : memref<342x3xf32, #tpu.memory_space<vmem>>, vector<16x3xf32>,
    %c0_52 = arith.constant 0 : index
    %c13 = arith.constant 13 : index
    %c0_53 = arith.constant 0 : index
    %c0_54 = arith.constant 0 : index
    %39 = vector.load %arg1[%c0_52, %c13, %c0_53, %c0_54] : memref<1x16x16x3xf32, #tpu.memory_space<vmem>>, vector<1x1x16x3xf32>
    %40 = vector.shape_cast %39 : vector<1x1x16x3xf32> to vector<16x3xf32>
    %c253 = arith.constant 253 : index
    %c0_55 = arith.constant 0 : index
    %41 = vector.load %arg9[%c253, %c0_55] : memref<342x3xf32, #tpu.memory_space<vmem>>, vector<16x3xf32>
    tpu.vector_store %arg9[%c253, %c0_55], %40 {strides = array<i32>} : memref<342x3xf32, #tpu.memory_space<vmem>>, vector<16x3xf32>,
    %c0_56 = arith.constant 0 : index
    %c14 = arith.constant 14 : index
    %c0_57 = arith.constant 0 : index
    %c0_58 = arith.constant 0 : index
    %42 = vector.load %arg1[%c0_56, %c14, %c0_57, %c0_58] : memref<1x16x16x3xf32, #tpu.memory_space<vmem>>, vector<1x1x16x3xf32>
    %43 = vector.shape_cast %42 : vector<1x1x16x3xf32> to vector<16x3xf32>
    %c271 = arith.constant 271 : index
    %c0_59 = arith.constant 0 : index
    %44 = vector.load %arg9[%c271, %c0_59] : memref<342x3xf32, #tpu.memory_space<vmem>>, vector<16x3xf32>
    tpu.vector_store %arg9[%c271, %c0_59], %43 {strides = array<i32>} : memref<342x3xf32, #tpu.memory_space<vmem>>, vector<16x3xf32>,
    %c0_60 = arith.constant 0 : index
    %c15 = arith.constant 15 : index
    %c0_61 = arith.constant 0 : index
    %c0_62 = arith.constant 0 : index
    %45 = vector.load %arg1[%c0_60, %c15, %c0_61, %c0_62] : memref<1x16x16x3xf32, #tpu.memory_space<vmem>>, vector<1x1x16x3xf32>
    %46 = vector.shape_cast %45 : vector<1x1x16x3xf32> to vector<16x3xf32>
    %c289 = arith.constant 289 : index
    %c0_63 = arith.constant 0 : index
    %47 = vector.load %arg9[%c289, %c0_63] : memref<342x3xf32, #tpu.memory_space<vmem>>, vector<16x3xf32>
    tpu.vector_store %arg9[%c289, %c0_63], %46 {strides = array<i32>} : memref<342x3xf32, #tpu.memory_space<vmem>>, vector<16x3xf32>,
    %c20 = arith.constant 20 : index
    %c0_64 = arith.constant 0 : index
    %48 = vector.load %arg9[%c20, %c0_64] : memref<342x3xf32, #tpu.memory_space<vmem>>, vector<1x3xf32>
    %c18 = arith.constant 18 : index
    %c0_65 = arith.constant 0 : index
    %49 = vector.load %arg9[%c18, %c0_65] : memref<342x3xf32, #tpu.memory_space<vmem>>, vector<1x3xf32>
    tpu.vector_store %arg9[%c18, %c0_65], %48 {strides = array<i32>} : memref<342x3xf32, #tpu.memory_space<vmem>>, vector<1x3xf32>,
    %c33 = arith.constant 33 : index
    %c0_66 = arith.constant 0 : index
    %50 = vector.load %arg9[%c33, %c0_66] : memref<342x3xf32, #tpu.memory_space<vmem>>, vector<1x3xf32>
    %c35 = arith.constant 35 : index
    %c0_67 = arith.constant 0 : index
    %51 = vector.load %arg9[%c35, %c0_67] : memref<342x3xf32, #tpu.memory_space<vmem>>, vector<1x3xf32>
    tpu.vector_store %arg9[%c35, %c0_67], %50 {strides = array<i32>} : memref<342x3xf32, #tpu.memory_space<vmem>>, vector<1x3xf32>,
    %c38 = arith.constant 38 : index
    %c0_68 = arith.constant 0 : index
    %52 = vector.load %arg9[%c38, %c0_68] : memref<342x3xf32, #tpu.memory_space<vmem>>, vector<1x3xf32>
    %c36 = arith.constant 36 : index
    %c0_69 = arith.constant 0 : index
    %53 = vector.load %arg9[%c36, %c0_69] : memref<342x3xf32, #tpu.memory_space<vmem>>, vector<1x3xf32>
    tpu.vector_store %arg9[%c36, %c0_69], %52 {strides = array<i32>} : memref<342x3xf32, #tpu.memory_space<vmem>>, vector<1x3xf32>,
    %c51 = arith.constant 51 : index
    %c0_70 = arith.constant 0 : index
    %54 = vector.load %arg9[%c51, %c0_70] : memref<342x3xf32, #tpu.memory_space<vmem>>, vector<1x3xf32>
    %c53 = arith.constant 53 : index
    %c0_71 = arith.constant 0 : index
    %55 = vector.load %arg9[%c53, %c0_71] : memref<342x3xf32, #tpu.memory_space<vmem>>, vector<1x3xf32>
    tpu.vector_store %arg9[%c53, %c0_71], %54 {strides = array<i32>} : memref<342x3xf32, #tpu.memory_space<vmem>>, vector<1x3xf32>,
    %c56 = arith.constant 56 : index
    %c0_72 = arith.constant 0 : index
    %56 = vector.load %arg9[%c56, %c0_72] : memref<342x3xf32, #tpu.memory_space<vmem>>, vector<1x3xf32>
    %c54 = arith.constant 54 : index
    %c0_73 = arith.constant 0 : index
    %57 = vector.load %arg9[%c54, %c0_73] : memref<342x3xf32, #tpu.memory_space<vmem>>, vector<1x3xf32>
    tpu.vector_store %arg9[%c54, %c0_73], %56 {strides = array<i32>} : memref<342x3xf32, #tpu.memory_space<vmem>>, vector<1x3xf32>,
    %c69 = arith.constant 69 : index
    %c0_74 = arith.constant 0 : index
    %58 = vector.load %arg9[%c69, %c0_74] : memref<342x3xf32, #tpu.memory_space<vmem>>, vector<1x3xf32>
    %c71 = arith.constant 71 : index
    %c0_75 = arith.constant 0 : index
    %59 = vector.load %arg9[%c71, %c0_75] : memref<342x3xf32, #tpu.memory_space<vmem>>, vector<1x3xf32>
    tpu.vector_store %arg9[%c71, %c0_75], %58 {strides = array<i32>} : memref<342x3xf32, #tpu.memory_space<vmem>>, vector<1x3xf32>,
    %c74 = arith.constant 74 : index
    %c0_76 = arith.constant 0 : index
    %60 = vector.load %arg9[%c74, %c0_76] : memref<342x3xf32, #tpu.memory_space<vmem>>, vector<1x3xf32>
    %c72 = arith.constant 72 : index
    %c0_77 = arith.constant 0 : index
    %61 = vector.load %arg9[%c72, %c0_77] : memref<342x3xf32, #tpu.memory_space<vmem>>, vector<1x3xf32>
    tpu.vector_store %arg9[%c72, %c0_77], %60 {strides = array<i32>} : memref<342x3xf32, #tpu.memory_space<vmem>>, vector<1x3xf32>,
    %c87 = arith.constant 87 : index
    %c0_78 = arith.constant 0 : index
    %62 = vector.load %arg9[%c87, %c0_78] : memref<342x3xf32, #tpu.memory_space<vmem>>, vector<1x3xf32>
    %c89 = arith.constant 89 : index
    %c0_79 = arith.constant 0 : index
    %63 = vector.load %arg9[%c89, %c0_79] : memref<342x3xf32, #tpu.memory_space<vmem>>, vector<1x3xf32>
    tpu.vector_store %arg9[%c89, %c0_79], %62 {strides = array<i32>} : memref<342x3xf32, #tpu.memory_space<vmem>>, vector<1x3xf32>,
    %c92 = arith.constant 92 : index
    %c0_80 = arith.constant 0 : index
    %64 = vector.load %arg9[%c92, %c0_80] : memref<342x3xf32, #tpu.memory_space<vmem>>, vector<1x3xf32>
    %c90 = arith.constant 90 : index
    %c0_81 = arith.constant 0 : index
    %65 = vector.load %arg9[%c90, %c0_81] : memref<342x3xf32, #tpu.memory_space<vmem>>, vector<1x3xf32>
    tpu.vector_store %arg9[%c90, %c0_81], %64 {strides = array<i32>} : memref<342x3xf32, #tpu.memory_space<vmem>>, vector<1x3xf32>,
    %c105 = arith.constant 105 : index
    %c0_82 = arith.constant 0 : index
    %66 = vector.load %arg9[%c105, %c0_82] : memref<342x3xf32, #tpu.memory_space<vmem>>, vector<1x3xf32>
    %c107 = arith.constant 107 : index
    %c0_83 = arith.constant 0 : index
    %67 = vector.load %arg9[%c107, %c0_83] : memref<342x3xf32, #tpu.memory_space<vmem>>, vector<1x3xf32>
    tpu.vector_store %arg9[%c107, %c0_83], %66 {strides = array<i32>} : memref<342x3xf32, #tpu.memory_space<vmem>>, vector<1x3xf32>,
    %c110 = arith.constant 110 : index
    %c0_84 = arith.constant 0 : index
    %68 = vector.load %arg9[%c110, %c0_84] : memref<342x3xf32, #tpu.memory_space<vmem>>, vector<1x3xf32>
    %c108 = arith.constant 108 : index
    %c0_85 = arith.constant 0 : index
    %69 = vector.load %arg9[%c108, %c0_85] : memref<342x3xf32, #tpu.memory_space<vmem>>, vector<1x3xf32>
    tpu.vector_store %arg9[%c108, %c0_85], %68 {strides = array<i32>} : memref<342x3xf32, #tpu.memory_space<vmem>>, vector<1x3xf32>,
    %c123 = arith.constant 123 : index
    %c0_86 = arith.constant 0 : index
    %70 = vector.load %arg9[%c123, %c0_86] : memref<342x3xf32, #tpu.memory_space<vmem>>, vector<1x3xf32>
    %c125 = arith.constant 125 : index
    %c0_87 = arith.constant 0 : index
    %71 = vector.load %arg9[%c125, %c0_87] : memref<342x3xf32, #tpu.memory_space<vmem>>, vector<1x3xf32>
    tpu.vector_store %arg9[%c125, %c0_87], %70 {strides = array<i32>} : memref<342x3xf32, #tpu.memory_space<vmem>>, vector<1x3xf32>,
    %c128 = arith.constant 128 : index
    %c0_88 = arith.constant 0 : index
    %72 = vector.load %arg9[%c128, %c0_88] : memref<342x3xf32, #tpu.memory_space<vmem>>, vector<1x3xf32>
    %c126 = arith.constant 126 : index
    %c0_89 = arith.constant 0 : index
    %73 = vector.load %arg9[%c126, %c0_89] : memref<342x3xf32, #tpu.memory_space<vmem>>, vector<1x3xf32>
    tpu.vector_store %arg9[%c126, %c0_89], %72 {strides = array<i32>} : memref<342x3xf32, #tpu.memory_space<vmem>>, vector<1x3xf32>,
    %c141 = arith.constant 141 : index
    %c0_90 = arith.constant 0 : index
    %74 = vector.load %arg9[%c141, %c0_90] : memref<342x3xf32, #tpu.memory_space<vmem>>, vector<1x3xf32>
    %c143 = arith.constant 143 : index
    %c0_91 = arith.constant 0 : index
    %75 = vector.load %arg9[%c143, %c0_91] : memref<342x3xf32, #tpu.memory_space<vmem>>, vector<1x3xf32>
    tpu.vector_store %arg9[%c143, %c0_91], %74 {strides = array<i32>} : memref<342x3xf32, #tpu.memory_space<vmem>>, vector<1x3xf32>,
    %c146 = arith.constant 146 : index
    %c0_92 = arith.constant 0 : index
    %76 = vector.load %arg9[%c146, %c0_92] : memref<342x3xf32, #tpu.memory_space<vmem>>, vector<1x3xf32>
    %c144 = arith.constant 144 : index
    %c0_93 = arith.constant 0 : index
    %77 = vector.load %arg9[%c144, %c0_93] : memref<342x3xf32, #tpu.memory_space<vmem>>, vector<1x3xf32>
    tpu.vector_store %arg9[%c144, %c0_93], %76 {strides = array<i32>} : memref<342x3xf32, #tpu.memory_space<vmem>>, vector<1x3xf32>,
    %c159 = arith.constant 159 : index
    %c0_94 = arith.constant 0 : index
    %78 = vector.load %arg9[%c159, %c0_94] : memref<342x3xf32, #tpu.memory_space<vmem>>, vector<1x3xf32>
    %c161 = arith.constant 161 : index
    %c0_95 = arith.constant 0 : index
    %79 = vector.load %arg9[%c161, %c0_95] : memref<342x3xf32, #tpu.memory_space<vmem>>, vector<1x3xf32>
    tpu.vector_store %arg9[%c161, %c0_95], %78 {strides = array<i32>} : memref<342x3xf32, #tpu.memory_space<vmem>>, vector<1x3xf32>,
    %c164 = arith.constant 164 : index
    %c0_96 = arith.constant 0 : index
    %80 = vector.load %arg9[%c164, %c0_96] : memref<342x3xf32, #tpu.memory_space<vmem>>, vector<1x3xf32>
    %c162 = arith.constant 162 : index
    %c0_97 = arith.constant 0 : index
    %81 = vector.load %arg9[%c162, %c0_97] : memref<342x3xf32, #tpu.memory_space<vmem>>, vector<1x3xf32>
    tpu.vector_store %arg9[%c162, %c0_97], %80 {strides = array<i32>} : memref<342x3xf32, #tpu.memory_space<vmem>>, vector<1x3xf32>,
    %c177 = arith.constant 177 : index
    %c0_98 = arith.constant 0 : index
    %82 = vector.load %arg9[%c177, %c0_98] : memref<342x3xf32, #tpu.memory_space<vmem>>, vector<1x3xf32>
    %c179 = arith.constant 179 : index
    %c0_99 = arith.constant 0 : index
    %83 = vector.load %arg9[%c179, %c0_99] : memref<342x3xf32, #tpu.memory_space<vmem>>, vector<1x3xf32>
    tpu.vector_store %arg9[%c179, %c0_99], %82 {strides = array<i32>} : memref<342x3xf32, #tpu.memory_space<vmem>>, vector<1x3xf32>,
    %c182 = arith.constant 182 : index
    %c0_100 = arith.constant 0 : index
    %84 = vector.load %arg9[%c182, %c0_100] : memref<342x3xf32, #tpu.memory_space<vmem>>, vector<1x3xf32>
    %c180 = arith.constant 180 : index
    %c0_101 = arith.constant 0 : index
    %85 = vector.load %arg9[%c180, %c0_101] : memref<342x3xf32, #tpu.memory_space<vmem>>, vector<1x3xf32>
    tpu.vector_store %arg9[%c180, %c0_101], %84 {strides = array<i32>} : memref<342x3xf32, #tpu.memory_space<vmem>>, vector<1x3xf32>,
    %c195 = arith.constant 195 : index
    %c0_102 = arith.constant 0 : index
    %86 = vector.load %arg9[%c195, %c0_102] : memref<342x3xf32, #tpu.memory_space<vmem>>, vector<1x3xf32>
    %c197 = arith.constant 197 : index
    %c0_103 = arith.constant 0 : index
    %87 = vector.load %arg9[%c197, %c0_103] : memref<342x3xf32, #tpu.memory_space<vmem>>, vector<1x3xf32>
    tpu.vector_store %arg9[%c197, %c0_103], %86 {strides = array<i32>} : memref<342x3xf32, #tpu.memory_space<vmem>>, vector<1x3xf32>,
    %c200 = arith.constant 200 : index
    %c0_104 = arith.constant 0 : index
    %88 = vector.load %arg9[%c200, %c0_104] : memref<342x3xf32, #tpu.memory_space<vmem>>, vector<1x3xf32>
    %c198 = arith.constant 198 : index
    %c0_105 = arith.constant 0 : index
    %89 = vector.load %arg9[%c198, %c0_105] : memref<342x3xf32, #tpu.memory_space<vmem>>, vector<1x3xf32>
    tpu.vector_store %arg9[%c198, %c0_105], %88 {strides = array<i32>} : memref<342x3xf32, #tpu.memory_space<vmem>>, vector<1x3xf32>,
    %c213 = arith.constant 213 : index
    %c0_106 = arith.constant 0 : index
    %90 = vector.load %arg9[%c213, %c0_106] : memref<342x3xf32, #tpu.memory_space<vmem>>, vector<1x3xf32>
    %c215 = arith.constant 215 : index
    %c0_107 = arith.constant 0 : index
    %91 = vector.load %arg9[%c215, %c0_107] : memref<342x3xf32, #tpu.memory_space<vmem>>, vector<1x3xf32>
    tpu.vector_store %arg9[%c215, %c0_107], %90 {strides = array<i32>} : memref<342x3xf32, #tpu.memory_space<vmem>>, vector<1x3xf32>,
    %c218 = arith.constant 218 : index
    %c0_108 = arith.constant 0 : index
    %92 = vector.load %arg9[%c218, %c0_108] : memref<342x3xf32, #tpu.memory_space<vmem>>, vector<1x3xf32>
    %c216 = arith.constant 216 : index
    %c0_109 = arith.constant 0 : index
    %93 = vector.load %arg9[%c216, %c0_109] : memref<342x3xf32, #tpu.memory_space<vmem>>, vector<1x3xf32>
    tpu.vector_store %arg9[%c216, %c0_109], %92 {strides = array<i32>} : memref<342x3xf32, #tpu.memory_space<vmem>>, vector<1x3xf32>,
    %c231 = arith.constant 231 : index
    %c0_110 = arith.constant 0 : index
    %94 = vector.load %arg9[%c231, %c0_110] : memref<342x3xf32, #tpu.memory_space<vmem>>, vector<1x3xf32>
    %c233 = arith.constant 233 : index
    %c0_111 = arith.constant 0 : index
    %95 = vector.load %arg9[%c233, %c0_111] : memref<342x3xf32, #tpu.memory_space<vmem>>, vector<1x3xf32>
    tpu.vector_store %arg9[%c233, %c0_111], %94 {strides = array<i32>} : memref<342x3xf32, #tpu.memory_space<vmem>>, vector<1x3xf32>,
    %c236 = arith.constant 236 : index
    %c0_112 = arith.constant 0 : index
    %96 = vector.load %arg9[%c236, %c0_112] : memref<342x3xf32, #tpu.memory_space<vmem>>, vector<1x3xf32>
    %c234 = arith.constant 234 : index
    %c0_113 = arith.constant 0 : index
    %97 = vector.load %arg9[%c234, %c0_113] : memref<342x3xf32, #tpu.memory_space<vmem>>, vector<1x3xf32>
    tpu.vector_store %arg9[%c234, %c0_113], %96 {strides = array<i32>} : memref<342x3xf32, #tpu.memory_space<vmem>>, vector<1x3xf32>,
    %c249 = arith.constant 249 : index
    %c0_114 = arith.constant 0 : index
    %98 = vector.load %arg9[%c249, %c0_114] : memref<342x3xf32, #tpu.memory_space<vmem>>, vector<1x3xf32>
    %c251 = arith.constant 251 : index
    %c0_115 = arith.constant 0 : index
    %99 = vector.load %arg9[%c251, %c0_115] : memref<342x3xf32, #tpu.memory_space<vmem>>, vector<1x3xf32>
    tpu.vector_store %arg9[%c251, %c0_115], %98 {strides = array<i32>} : memref<342x3xf32, #tpu.memory_space<vmem>>, vector<1x3xf32>,
    %c254 = arith.constant 254 : index
    %c0_116 = arith.constant 0 : index
    %100 = vector.load %arg9[%c254, %c0_116] : memref<342x3xf32, #tpu.memory_space<vmem>>, vector<1x3xf32>
    %c252 = arith.constant 252 : index
    %c0_117 = arith.constant 0 : index
    %101 = vector.load %arg9[%c252, %c0_117] : memref<342x3xf32, #tpu.memory_space<vmem>>, vector<1x3xf32>
    tpu.vector_store %arg9[%c252, %c0_117], %100 {strides = array<i32>} : memref<342x3xf32, #tpu.memory_space<vmem>>, vector<1x3xf32>,
    %c267 = arith.constant 267 : index
    %c0_118 = arith.constant 0 : index
    %102 = vector.load %arg9[%c267, %c0_118] : memref<342x3xf32, #tpu.memory_space<vmem>>, vector<1x3xf32>
    %c269 = arith.constant 269 : index
    %c0_119 = arith.constant 0 : index
    %103 = vector.load %arg9[%c269, %c0_119] : memref<342x3xf32, #tpu.memory_space<vmem>>, vector<1x3xf32>
    tpu.vector_store %arg9[%c269, %c0_119], %102 {strides = array<i32>} : memref<342x3xf32, #tpu.memory_space<vmem>>, vector<1x3xf32>,
    %c272 = arith.constant 272 : index
    %c0_120 = arith.constant 0 : index
    %104 = vector.load %arg9[%c272, %c0_120] : memref<342x3xf32, #tpu.memory_space<vmem>>, vector<1x3xf32>
    %c270 = arith.constant 270 : index
    %c0_121 = arith.constant 0 : index
    %105 = vector.load %arg9[%c270, %c0_121] : memref<342x3xf32, #tpu.memory_space<vmem>>, vector<1x3xf32>
    tpu.vector_store %arg9[%c270, %c0_121], %104 {strides = array<i32>} : memref<342x3xf32, #tpu.memory_space<vmem>>, vector<1x3xf32>,
    %c285 = arith.constant 285 : index
    %c0_122 = arith.constant 0 : index
    %106 = vector.load %arg9[%c285, %c0_122] : memref<342x3xf32, #tpu.memory_space<vmem>>, vector<1x3xf32>
    %c287 = arith.constant 287 : index
    %c0_123 = arith.constant 0 : index
    %107 = vector.load %arg9[%c287, %c0_123] : memref<342x3xf32, #tpu.memory_space<vmem>>, vector<1x3xf32>
    tpu.vector_store %arg9[%c287, %c0_123], %106 {strides = array<i32>} : memref<342x3xf32, #tpu.memory_space<vmem>>, vector<1x3xf32>,
    %c290 = arith.constant 290 : index
    %c0_124 = arith.constant 0 : index
    %108 = vector.load %arg9[%c290, %c0_124] : memref<342x3xf32, #tpu.memory_space<vmem>>, vector<1x3xf32>
    %c288 = arith.constant 288 : index
    %c0_125 = arith.constant 0 : index
    %109 = vector.load %arg9[%c288, %c0_125] : memref<342x3xf32, #tpu.memory_space<vmem>>, vector<1x3xf32>
    tpu.vector_store %arg9[%c288, %c0_125], %108 {strides = array<i32>} : memref<342x3xf32, #tpu.memory_space<vmem>>, vector<1x3xf32>,
    %c303 = arith.constant 303 : index
    %c0_126 = arith.constant 0 : index
    %110 = vector.load %arg9[%c303, %c0_126] : memref<342x3xf32, #tpu.memory_space<vmem>>, vector<1x3xf32>
    %c305 = arith.constant 305 : index
    %c0_127 = arith.constant 0 : index
    %111 = vector.load %arg9[%c305, %c0_127] : memref<342x3xf32, #tpu.memory_space<vmem>>, vector<1x3xf32>
    tpu.vector_store %arg9[%c305, %c0_127], %110 {strides = array<i32>} : memref<342x3xf32, #tpu.memory_space<vmem>>, vector<1x3xf32>,
    %c36_128 = arith.constant 36 : index
    %c0_129 = arith.constant 0 : index
    %112 = vector.load %arg9[%c36_128, %c0_129] : memref<342x3xf32, #tpu.memory_space<vmem>>, vector<18x3xf32>
    %c0_130 = arith.constant 0 : index
    %c0_131 = arith.constant 0 : index
    %113 = vector.load %arg9[%c0_130, %c0_131] : memref<342x3xf32, #tpu.memory_space<vmem>>, vector<18x3xf32>
    tpu.vector_store %arg9[%c0_130, %c0_131], %112 {strides = array<i32>} : memref<342x3xf32, #tpu.memory_space<vmem>>, vector<18x3xf32>,
    %c270_132 = arith.constant 270 : index
    %c0_133 = arith.constant 0 : index
    %114 = vector.load %arg9[%c270_132, %c0_133] : memref<342x3xf32, #tpu.memory_space<vmem>>, vector<18x3xf32>
    %c306 = arith.constant 306 : index
    %c0_134 = arith.constant 0 : index
    %115 = vector.load %arg9[%c306, %c0_134] : memref<342x3xf32, #tpu.memory_space<vmem>>, vector<18x3xf32>
    tpu.vector_store %arg9[%c306, %c0_134], %114 {strides = array<i32>} : memref<342x3xf32, #tpu.memory_space<vmem>>, vector<18x3xf32>,
    %cst = arith.constant 0.000000e+00 : f32
    %116 = vector.broadcast %cst : f32 to vector<18x3xf32>
    %c324 = arith.constant 324 : index
    %c0_135 = arith.constant 0 : index
    %117 = vector.load %arg9[%c324, %c0_135] : memref<342x3xf32, #tpu.memory_space<vmem>>, vector<18x3xf32>
    tpu.vector_store %arg9[%c324, %c0_135], %116 {strides = array<i32>} : memref<342x3xf32, #tpu.memory_space<vmem>>, vector<18x3xf32>,
    %c0_i32 = arith.constant 0 : i32
    %c4_i32 = arith.constant 4 : i32
    %118 = arith.addi %c0_i32, %c4_i32 : i32
    %c1_i32 = arith.constant 1 : i32
    scf.for %arg13 = %c0_i32 to %118 step %c1_i32  : i32 {
      %c72_i32 = arith.constant 72 : i32
      %360 = arith.muli %arg13, %c72_i32 : i32
      %361 = tpu.assume_multiple %360, 8 : i32
      %c0_i32_443 = arith.constant 0 : i32
      %362 = arith.addi %361, %c0_i32_443 : i32
      %c0_i32_444 = arith.constant 0 : i32
      %363 = arith.addi %362, %c0_i32_444 : i32
      %364 = arith.index_cast %363 : i32 to index
      %c0_445 = arith.constant 0 : index
      %365 = vector.load %arg9[%364, %c0_445] : memref<342x3xf32, #tpu.memory_space<vmem>>, vector<72x3xf32>
      %c0_446 = arith.constant 0 : index
      %c0_447 = arith.constant 0 : index
      %c0_448 = arith.constant 0 : index
      %c0_449 = arith.constant 0 : index
      %366 = vector.load %arg2[%c0_446, %c0_447, %c0_448, %c0_449] : memref<3x3x3x64xf32, #tpu.memory_space<vmem>>, vector<1x1x3x64xf32>
      %367 = vector.shape_cast %366 : vector<1x1x3x64xf32> to vector<3x64xf32>
      %cst_450 = arith.constant dense<0.000000e+00> : vector<72x64xf32>
      %368 = tpu.matmul %365, %367, %cst_450 {dimension_numbers = #tpu.dot_dimension_numbers<[1], [0], [0], [1], [0, 0, 1, 1], [], []>} : vector<72x3xf32>, vector<3x64xf32>, vector<72x64xf32> -> vector<72x64xf32>
      %c0_i32_451 = arith.constant 0 : i32
      %369 = arith.addi %361, %c0_i32_451 : i32
      %c1_i32_452 = arith.constant 1 : i32
      %370 = arith.addi %369, %c1_i32_452 : i32
      %371 = arith.index_cast %370 : i32 to index
      %c0_453 = arith.constant 0 : index
      %372 = vector.load %arg9[%371, %c0_453] : memref<342x3xf32, #tpu.memory_space<vmem>>, vector<72x3xf32>
      %c0_454 = arith.constant 0 : index
      %c1_455 = arith.constant 1 : index
      %c0_456 = arith.constant 0 : index
      %c0_457 = arith.constant 0 : index
      %373 = vector.load %arg2[%c0_454, %c1_455, %c0_456, %c0_457] : memref<3x3x3x64xf32, #tpu.memory_space<vmem>>, vector<1x1x3x64xf32>
      %374 = vector.shape_cast %373 : vector<1x1x3x64xf32> to vector<3x64xf32>
      %cst_458 = arith.constant dense<0.000000e+00> : vector<72x64xf32>
      %375 = tpu.matmul %372, %374, %cst_458 {dimension_numbers = #tpu.dot_dimension_numbers<[1], [0], [0], [1], [0, 0, 1, 1], [], []>} : vector<72x3xf32>, vector<3x64xf32>, vector<72x64xf32> -> vector<72x64xf32>
      %376 = arith.addf %368, %375 : vector<72x64xf32>
      %c0_i32_459 = arith.constant 0 : i32
      %377 = arith.addi %361, %c0_i32_459 : i32
      %c2_i32 = arith.constant 2 : i32
      %378 = arith.addi %377, %c2_i32 : i32
      %379 = arith.index_cast %378 : i32 to index
      %c0_460 = arith.constant 0 : index
      %380 = vector.load %arg9[%379, %c0_460] : memref<342x3xf32, #tpu.memory_space<vmem>>, vector<72x3xf32>
      %c0_461 = arith.constant 0 : index
      %c2_462 = arith.constant 2 : index
      %c0_463 = arith.constant 0 : index
      %c0_464 = arith.constant 0 : index
      %381 = vector.load %arg2[%c0_461, %c2_462, %c0_463, %c0_464] : memref<3x3x3x64xf32, #tpu.memory_space<vmem>>, vector<1x1x3x64xf32>
      %382 = vector.shape_cast %381 : vector<1x1x3x64xf32> to vector<3x64xf32>
      %cst_465 = arith.constant dense<0.000000e+00> : vector<72x64xf32>
      %383 = tpu.matmul %380, %382, %cst_465 {dimension_numbers = #tpu.dot_dimension_numbers<[1], [0], [0], [1], [0, 0, 1, 1], [], []>} : vector<72x3xf32>, vector<3x64xf32>, vector<72x64xf32> -> vector<72x64xf32>
      %384 = arith.addf %376, %383 : vector<72x64xf32>
      %c18_i32 = arith.constant 18 : i32
      %385 = arith.addi %361, %c18_i32 : i32
      %c0_i32_466 = arith.constant 0 : i32
      %386 = arith.addi %385, %c0_i32_466 : i32
      %387 = arith.index_cast %386 : i32 to index
      %c0_467 = arith.constant 0 : index
      %388 = vector.load %arg9[%387, %c0_467] : memref<342x3xf32, #tpu.memory_space<vmem>>, vector<72x3xf32>
      %c1_468 = arith.constant 1 : index
      %c0_469 = arith.constant 0 : index
      %c0_470 = arith.constant 0 : index
      %c0_471 = arith.constant 0 : index
      %389 = vector.load %arg2[%c1_468, %c0_469, %c0_470, %c0_471] : memref<3x3x3x64xf32, #tpu.memory_space<vmem>>, vector<1x1x3x64xf32>
      %390 = vector.shape_cast %389 : vector<1x1x3x64xf32> to vector<3x64xf32>
      %cst_472 = arith.constant dense<0.000000e+00> : vector<72x64xf32>
      %391 = tpu.matmul %388, %390, %cst_472 {dimension_numbers = #tpu.dot_dimension_numbers<[1], [0], [0], [1], [0, 0, 1, 1], [], []>} : vector<72x3xf32>, vector<3x64xf32>, vector<72x64xf32> -> vector<72x64xf32>
      %392 = arith.addf %384, %391 : vector<72x64xf32>
      %c18_i32_473 = arith.constant 18 : i32
      %393 = arith.addi %361, %c18_i32_473 : i32
      %c1_i32_474 = arith.constant 1 : i32
      %394 = arith.addi %393, %c1_i32_474 : i32
      %395 = arith.index_cast %394 : i32 to index
      %c0_475 = arith.constant 0 : index
      %396 = vector.load %arg9[%395, %c0_475] : memref<342x3xf32, #tpu.memory_space<vmem>>, vector<72x3xf32>
      %c1_476 = arith.constant 1 : index
      %c1_477 = arith.constant 1 : index
      %c0_478 = arith.constant 0 : index
      %c0_479 = arith.constant 0 : index
      %397 = vector.load %arg2[%c1_476, %c1_477, %c0_478, %c0_479] : memref<3x3x3x64xf32, #tpu.memory_space<vmem>>, vector<1x1x3x64xf32>
      %398 = vector.shape_cast %397 : vector<1x1x3x64xf32> to vector<3x64xf32>
      %cst_480 = arith.constant dense<0.000000e+00> : vector<72x64xf32>
      %399 = tpu.matmul %396, %398, %cst_480 {dimension_numbers = #tpu.dot_dimension_numbers<[1], [0], [0], [1], [0, 0, 1, 1], [], []>} : vector<72x3xf32>, vector<3x64xf32>, vector<72x64xf32> -> vector<72x64xf32>
      %400 = arith.addf %392, %399 : vector<72x64xf32>
      %c18_i32_481 = arith.constant 18 : i32
      %401 = arith.addi %361, %c18_i32_481 : i32
      %c2_i32_482 = arith.constant 2 : i32
      %402 = arith.addi %401, %c2_i32_482 : i32
      %403 = arith.index_cast %402 : i32 to index
      %c0_483 = arith.constant 0 : index
      %404 = vector.load %arg9[%403, %c0_483] : memref<342x3xf32, #tpu.memory_space<vmem>>, vector<72x3xf32>
      %c1_484 = arith.constant 1 : index
      %c2_485 = arith.constant 2 : index
      %c0_486 = arith.constant 0 : index
      %c0_487 = arith.constant 0 : index
      %405 = vector.load %arg2[%c1_484, %c2_485, %c0_486, %c0_487] : memref<3x3x3x64xf32, #tpu.memory_space<vmem>>, vector<1x1x3x64xf32>
      %406 = vector.shape_cast %405 : vector<1x1x3x64xf32> to vector<3x64xf32>
      %cst_488 = arith.constant dense<0.000000e+00> : vector<72x64xf32>
      %407 = tpu.matmul %404, %406, %cst_488 {dimension_numbers = #tpu.dot_dimension_numbers<[1], [0], [0], [1], [0, 0, 1, 1], [], []>} : vector<72x3xf32>, vector<3x64xf32>, vector<72x64xf32> -> vector<72x64xf32>
      %408 = arith.addf %400, %407 : vector<72x64xf32>
      %c36_i32 = arith.constant 36 : i32
      %409 = arith.addi %361, %c36_i32 : i32
      %c0_i32_489 = arith.constant 0 : i32
      %410 = arith.addi %409, %c0_i32_489 : i32
      %411 = arith.index_cast %410 : i32 to index
      %c0_490 = arith.constant 0 : index
      %412 = vector.load %arg9[%411, %c0_490] : memref<342x3xf32, #tpu.memory_space<vmem>>, vector<72x3xf32>
      %c2_491 = arith.constant 2 : index
      %c0_492 = arith.constant 0 : index
      %c0_493 = arith.constant 0 : index
      %c0_494 = arith.constant 0 : index
      %413 = vector.load %arg2[%c2_491, %c0_492, %c0_493, %c0_494] : memref<3x3x3x64xf32, #tpu.memory_space<vmem>>, vector<1x1x3x64xf32>
      %414 = vector.shape_cast %413 : vector<1x1x3x64xf32> to vector<3x64xf32>
      %cst_495 = arith.constant dense<0.000000e+00> : vector<72x64xf32>
      %415 = tpu.matmul %412, %414, %cst_495 {dimension_numbers = #tpu.dot_dimension_numbers<[1], [0], [0], [1], [0, 0, 1, 1], [], []>} : vector<72x3xf32>, vector<3x64xf32>, vector<72x64xf32> -> vector<72x64xf32>
      %416 = arith.addf %408, %415 : vector<72x64xf32>
      %c36_i32_496 = arith.constant 36 : i32
      %417 = arith.addi %361, %c36_i32_496 : i32
      %c1_i32_497 = arith.constant 1 : i32
      %418 = arith.addi %417, %c1_i32_497 : i32
      %419 = arith.index_cast %418 : i32 to index
      %c0_498 = arith.constant 0 : index
      %420 = vector.load %arg9[%419, %c0_498] : memref<342x3xf32, #tpu.memory_space<vmem>>, vector<72x3xf32>
      %c2_499 = arith.constant 2 : index
      %c1_500 = arith.constant 1 : index
      %c0_501 = arith.constant 0 : index
      %c0_502 = arith.constant 0 : index
      %421 = vector.load %arg2[%c2_499, %c1_500, %c0_501, %c0_502] : memref<3x3x3x64xf32, #tpu.memory_space<vmem>>, vector<1x1x3x64xf32>
      %422 = vector.shape_cast %421 : vector<1x1x3x64xf32> to vector<3x64xf32>
      %cst_503 = arith.constant dense<0.000000e+00> : vector<72x64xf32>
      %423 = tpu.matmul %420, %422, %cst_503 {dimension_numbers = #tpu.dot_dimension_numbers<[1], [0], [0], [1], [0, 0, 1, 1], [], []>} : vector<72x3xf32>, vector<3x64xf32>, vector<72x64xf32> -> vector<72x64xf32>
      %424 = arith.addf %416, %423 : vector<72x64xf32>
      %c36_i32_504 = arith.constant 36 : i32
      %425 = arith.addi %361, %c36_i32_504 : i32
      %c2_i32_505 = arith.constant 2 : i32
      %426 = arith.addi %425, %c2_i32_505 : i32
      %427 = arith.index_cast %426 : i32 to index
      %c0_506 = arith.constant 0 : index
      %428 = vector.load %arg9[%427, %c0_506] : memref<342x3xf32, #tpu.memory_space<vmem>>, vector<72x3xf32>
      %c2_507 = arith.constant 2 : index
      %c2_508 = arith.constant 2 : index
      %c0_509 = arith.constant 0 : index
      %c0_510 = arith.constant 0 : index
      %429 = vector.load %arg2[%c2_507, %c2_508, %c0_509, %c0_510] : memref<3x3x3x64xf32, #tpu.memory_space<vmem>>, vector<1x1x3x64xf32>
      %430 = vector.shape_cast %429 : vector<1x1x3x64xf32> to vector<3x64xf32>
      %cst_511 = arith.constant dense<0.000000e+00> : vector<72x64xf32>
      %431 = tpu.matmul %428, %430, %cst_511 {dimension_numbers = #tpu.dot_dimension_numbers<[1], [0], [0], [1], [0, 0, 1, 1], [], []>} : vector<72x3xf32>, vector<3x64xf32>, vector<72x64xf32> -> vector<72x64xf32>
      %432 = arith.addf %424, %431 : vector<72x64xf32>
      %c0_512 = arith.constant 0 : index
      %c0_513 = arith.constant 0 : index
      %433 = vector.load %arg3[%c0_512, %c0_513] : memref<1x64xf32, #tpu.memory_space<vmem>>, vector<1x64xf32>
      %434 = vector.broadcast %433 : vector<1x64xf32> to vector<72x64xf32>
      %435 = arith.addf %432, %434 : vector<72x64xf32>
      %cst_514 = arith.constant 0.000000e+00 : f32
      %436 = vector.broadcast %cst_514 : f32 to vector<72x64xf32>
      %437 = arith.maximumf %435, %436 : vector<72x64xf32>
      %c19_i32 = arith.constant 19 : i32
      %438 = arith.addi %c19_i32, %361 : i32
      %439 = arith.index_cast %438 : i32 to index
      %c0_515 = arith.constant 0 : index
      %440 = vector.load %arg10[%439, %c0_515] : memref<342x64xf32, #tpu.memory_space<vmem>>, vector<72x64xf32>
      tpu.vector_store %arg10[%439, %c0_515], %437 {strides = array<i32>} : memref<342x64xf32, #tpu.memory_space<vmem>>, vector<72x64xf32>,
    }
    %c4_i32_136 = arith.constant 4 : i32
    %c20_137 = arith.constant 20 : index
    %c0_138 = arith.constant 0 : index
    %119 = vector.load %arg10[%c20_137, %c0_138] : memref<342x64xf32, #tpu.memory_space<vmem>>, vector<1x64xf32>
    %c18_139 = arith.constant 18 : index
    %c0_140 = arith.constant 0 : index
    %120 = vector.load %arg10[%c18_139, %c0_140] : memref<342x64xf32, #tpu.memory_space<vmem>>, vector<1x64xf32>
    tpu.vector_store %arg10[%c18_139, %c0_140], %119 {strides = array<i32>} : memref<342x64xf32, #tpu.memory_space<vmem>>, vector<1x64xf32>,
    %c33_141 = arith.constant 33 : index
    %c0_142 = arith.constant 0 : index
    %121 = vector.load %arg10[%c33_141, %c0_142] : memref<342x64xf32, #tpu.memory_space<vmem>>, vector<1x64xf32>
    %c35_143 = arith.constant 35 : index
    %c0_144 = arith.constant 0 : index
    %122 = vector.load %arg10[%c35_143, %c0_144] : memref<342x64xf32, #tpu.memory_space<vmem>>, vector<1x64xf32>
    tpu.vector_store %arg10[%c35_143, %c0_144], %121 {strides = array<i32>} : memref<342x64xf32, #tpu.memory_space<vmem>>, vector<1x64xf32>,
    %c38_145 = arith.constant 38 : index
    %c0_146 = arith.constant 0 : index
    %123 = vector.load %arg10[%c38_145, %c0_146] : memref<342x64xf32, #tpu.memory_space<vmem>>, vector<1x64xf32>
    %c36_147 = arith.constant 36 : index
    %c0_148 = arith.constant 0 : index
    %124 = vector.load %arg10[%c36_147, %c0_148] : memref<342x64xf32, #tpu.memory_space<vmem>>, vector<1x64xf32>
    tpu.vector_store %arg10[%c36_147, %c0_148], %123 {strides = array<i32>} : memref<342x64xf32, #tpu.memory_space<vmem>>, vector<1x64xf32>,
    %c51_149 = arith.constant 51 : index
    %c0_150 = arith.constant 0 : index
    %125 = vector.load %arg10[%c51_149, %c0_150] : memref<342x64xf32, #tpu.memory_space<vmem>>, vector<1x64xf32>
    %c53_151 = arith.constant 53 : index
    %c0_152 = arith.constant 0 : index
    %126 = vector.load %arg10[%c53_151, %c0_152] : memref<342x64xf32, #tpu.memory_space<vmem>>, vector<1x64xf32>
    tpu.vector_store %arg10[%c53_151, %c0_152], %125 {strides = array<i32>} : memref<342x64xf32, #tpu.memory_space<vmem>>, vector<1x64xf32>,
    %c56_153 = arith.constant 56 : index
    %c0_154 = arith.constant 0 : index
    %127 = vector.load %arg10[%c56_153, %c0_154] : memref<342x64xf32, #tpu.memory_space<vmem>>, vector<1x64xf32>
    %c54_155 = arith.constant 54 : index
    %c0_156 = arith.constant 0 : index
    %128 = vector.load %arg10[%c54_155, %c0_156] : memref<342x64xf32, #tpu.memory_space<vmem>>, vector<1x64xf32>
    tpu.vector_store %arg10[%c54_155, %c0_156], %127 {strides = array<i32>} : memref<342x64xf32, #tpu.memory_space<vmem>>, vector<1x64xf32>,
    %c69_157 = arith.constant 69 : index
    %c0_158 = arith.constant 0 : index
    %129 = vector.load %arg10[%c69_157, %c0_158] : memref<342x64xf32, #tpu.memory_space<vmem>>, vector<1x64xf32>
    %c71_159 = arith.constant 71 : index
    %c0_160 = arith.constant 0 : index
    %130 = vector.load %arg10[%c71_159, %c0_160] : memref<342x64xf32, #tpu.memory_space<vmem>>, vector<1x64xf32>
    tpu.vector_store %arg10[%c71_159, %c0_160], %129 {strides = array<i32>} : memref<342x64xf32, #tpu.memory_space<vmem>>, vector<1x64xf32>,
    %c74_161 = arith.constant 74 : index
    %c0_162 = arith.constant 0 : index
    %131 = vector.load %arg10[%c74_161, %c0_162] : memref<342x64xf32, #tpu.memory_space<vmem>>, vector<1x64xf32>
    %c72_163 = arith.constant 72 : index
    %c0_164 = arith.constant 0 : index
    %132 = vector.load %arg10[%c72_163, %c0_164] : memref<342x64xf32, #tpu.memory_space<vmem>>, vector<1x64xf32>
    tpu.vector_store %arg10[%c72_163, %c0_164], %131 {strides = array<i32>} : memref<342x64xf32, #tpu.memory_space<vmem>>, vector<1x64xf32>,
    %c87_165 = arith.constant 87 : index
    %c0_166 = arith.constant 0 : index
    %133 = vector.load %arg10[%c87_165, %c0_166] : memref<342x64xf32, #tpu.memory_space<vmem>>, vector<1x64xf32>
    %c89_167 = arith.constant 89 : index
    %c0_168 = arith.constant 0 : index
    %134 = vector.load %arg10[%c89_167, %c0_168] : memref<342x64xf32, #tpu.memory_space<vmem>>, vector<1x64xf32>
    tpu.vector_store %arg10[%c89_167, %c0_168], %133 {strides = array<i32>} : memref<342x64xf32, #tpu.memory_space<vmem>>, vector<1x64xf32>,
    %c92_169 = arith.constant 92 : index
    %c0_170 = arith.constant 0 : index
    %135 = vector.load %arg10[%c92_169, %c0_170] : memref<342x64xf32, #tpu.memory_space<vmem>>, vector<1x64xf32>
    %c90_171 = arith.constant 90 : index
    %c0_172 = arith.constant 0 : index
    %136 = vector.load %arg10[%c90_171, %c0_172] : memref<342x64xf32, #tpu.memory_space<vmem>>, vector<1x64xf32>
    tpu.vector_store %arg10[%c90_171, %c0_172], %135 {strides = array<i32>} : memref<342x64xf32, #tpu.memory_space<vmem>>, vector<1x64xf32>,
    %c105_173 = arith.constant 105 : index
    %c0_174 = arith.constant 0 : index
    %137 = vector.load %arg10[%c105_173, %c0_174] : memref<342x64xf32, #tpu.memory_space<vmem>>, vector<1x64xf32>
    %c107_175 = arith.constant 107 : index
    %c0_176 = arith.constant 0 : index
    %138 = vector.load %arg10[%c107_175, %c0_176] : memref<342x64xf32, #tpu.memory_space<vmem>>, vector<1x64xf32>
    tpu.vector_store %arg10[%c107_175, %c0_176], %137 {strides = array<i32>} : memref<342x64xf32, #tpu.memory_space<vmem>>, vector<1x64xf32>,
    %c110_177 = arith.constant 110 : index
    %c0_178 = arith.constant 0 : index
    %139 = vector.load %arg10[%c110_177, %c0_178] : memref<342x64xf32, #tpu.memory_space<vmem>>, vector<1x64xf32>
    %c108_179 = arith.constant 108 : index
    %c0_180 = arith.constant 0 : index
    %140 = vector.load %arg10[%c108_179, %c0_180] : memref<342x64xf32, #tpu.memory_space<vmem>>, vector<1x64xf32>
    tpu.vector_store %arg10[%c108_179, %c0_180], %139 {strides = array<i32>} : memref<342x64xf32, #tpu.memory_space<vmem>>, vector<1x64xf32>,
    %c123_181 = arith.constant 123 : index
    %c0_182 = arith.constant 0 : index
    %141 = vector.load %arg10[%c123_181, %c0_182] : memref<342x64xf32, #tpu.memory_space<vmem>>, vector<1x64xf32>
    %c125_183 = arith.constant 125 : index
    %c0_184 = arith.constant 0 : index
    %142 = vector.load %arg10[%c125_183, %c0_184] : memref<342x64xf32, #tpu.memory_space<vmem>>, vector<1x64xf32>
    tpu.vector_store %arg10[%c125_183, %c0_184], %141 {strides = array<i32>} : memref<342x64xf32, #tpu.memory_space<vmem>>, vector<1x64xf32>,
    %c128_185 = arith.constant 128 : index
    %c0_186 = arith.constant 0 : index
    %143 = vector.load %arg10[%c128_185, %c0_186] : memref<342x64xf32, #tpu.memory_space<vmem>>, vector<1x64xf32>
    %c126_187 = arith.constant 126 : index
    %c0_188 = arith.constant 0 : index
    %144 = vector.load %arg10[%c126_187, %c0_188] : memref<342x64xf32, #tpu.memory_space<vmem>>, vector<1x64xf32>
    tpu.vector_store %arg10[%c126_187, %c0_188], %143 {strides = array<i32>} : memref<342x64xf32, #tpu.memory_space<vmem>>, vector<1x64xf32>,
    %c141_189 = arith.constant 141 : index
    %c0_190 = arith.constant 0 : index
    %145 = vector.load %arg10[%c141_189, %c0_190] : memref<342x64xf32, #tpu.memory_space<vmem>>, vector<1x64xf32>
    %c143_191 = arith.constant 143 : index
    %c0_192 = arith.constant 0 : index
    %146 = vector.load %arg10[%c143_191, %c0_192] : memref<342x64xf32, #tpu.memory_space<vmem>>, vector<1x64xf32>
    tpu.vector_store %arg10[%c143_191, %c0_192], %145 {strides = array<i32>} : memref<342x64xf32, #tpu.memory_space<vmem>>, vector<1x64xf32>,
    %c146_193 = arith.constant 146 : index
    %c0_194 = arith.constant 0 : index
    %147 = vector.load %arg10[%c146_193, %c0_194] : memref<342x64xf32, #tpu.memory_space<vmem>>, vector<1x64xf32>
    %c144_195 = arith.constant 144 : index
    %c0_196 = arith.constant 0 : index
    %148 = vector.load %arg10[%c144_195, %c0_196] : memref<342x64xf32, #tpu.memory_space<vmem>>, vector<1x64xf32>
    tpu.vector_store %arg10[%c144_195, %c0_196], %147 {strides = array<i32>} : memref<342x64xf32, #tpu.memory_space<vmem>>, vector<1x64xf32>,
    %c159_197 = arith.constant 159 : index
    %c0_198 = arith.constant 0 : index
    %149 = vector.load %arg10[%c159_197, %c0_198] : memref<342x64xf32, #tpu.memory_space<vmem>>, vector<1x64xf32>
    %c161_199 = arith.constant 161 : index
    %c0_200 = arith.constant 0 : index
    %150 = vector.load %arg10[%c161_199, %c0_200] : memref<342x64xf32, #tpu.memory_space<vmem>>, vector<1x64xf32>
    tpu.vector_store %arg10[%c161_199, %c0_200], %149 {strides = array<i32>} : memref<342x64xf32, #tpu.memory_space<vmem>>, vector<1x64xf32>,
    %c164_201 = arith.constant 164 : index
    %c0_202 = arith.constant 0 : index
    %151 = vector.load %arg10[%c164_201, %c0_202] : memref<342x64xf32, #tpu.memory_space<vmem>>, vector<1x64xf32>
    %c162_203 = arith.constant 162 : index
    %c0_204 = arith.constant 0 : index
    %152 = vector.load %arg10[%c162_203, %c0_204] : memref<342x64xf32, #tpu.memory_space<vmem>>, vector<1x64xf32>
    tpu.vector_store %arg10[%c162_203, %c0_204], %151 {strides = array<i32>} : memref<342x64xf32, #tpu.memory_space<vmem>>, vector<1x64xf32>,
    %c177_205 = arith.constant 177 : index
    %c0_206 = arith.constant 0 : index
    %153 = vector.load %arg10[%c177_205, %c0_206] : memref<342x64xf32, #tpu.memory_space<vmem>>, vector<1x64xf32>
    %c179_207 = arith.constant 179 : index
    %c0_208 = arith.constant 0 : index
    %154 = vector.load %arg10[%c179_207, %c0_208] : memref<342x64xf32, #tpu.memory_space<vmem>>, vector<1x64xf32>
    tpu.vector_store %arg10[%c179_207, %c0_208], %153 {strides = array<i32>} : memref<342x64xf32, #tpu.memory_space<vmem>>, vector<1x64xf32>,
    %c182_209 = arith.constant 182 : index
    %c0_210 = arith.constant 0 : index
    %155 = vector.load %arg10[%c182_209, %c0_210] : memref<342x64xf32, #tpu.memory_space<vmem>>, vector<1x64xf32>
    %c180_211 = arith.constant 180 : index
    %c0_212 = arith.constant 0 : index
    %156 = vector.load %arg10[%c180_211, %c0_212] : memref<342x64xf32, #tpu.memory_space<vmem>>, vector<1x64xf32>
    tpu.vector_store %arg10[%c180_211, %c0_212], %155 {strides = array<i32>} : memref<342x64xf32, #tpu.memory_space<vmem>>, vector<1x64xf32>,
    %c195_213 = arith.constant 195 : index
    %c0_214 = arith.constant 0 : index
    %157 = vector.load %arg10[%c195_213, %c0_214] : memref<342x64xf32, #tpu.memory_space<vmem>>, vector<1x64xf32>
    %c197_215 = arith.constant 197 : index
    %c0_216 = arith.constant 0 : index
    %158 = vector.load %arg10[%c197_215, %c0_216] : memref<342x64xf32, #tpu.memory_space<vmem>>, vector<1x64xf32>
    tpu.vector_store %arg10[%c197_215, %c0_216], %157 {strides = array<i32>} : memref<342x64xf32, #tpu.memory_space<vmem>>, vector<1x64xf32>,
    %c200_217 = arith.constant 200 : index
    %c0_218 = arith.constant 0 : index
    %159 = vector.load %arg10[%c200_217, %c0_218] : memref<342x64xf32, #tpu.memory_space<vmem>>, vector<1x64xf32>
    %c198_219 = arith.constant 198 : index
    %c0_220 = arith.constant 0 : index
    %160 = vector.load %arg10[%c198_219, %c0_220] : memref<342x64xf32, #tpu.memory_space<vmem>>, vector<1x64xf32>
    tpu.vector_store %arg10[%c198_219, %c0_220], %159 {strides = array<i32>} : memref<342x64xf32, #tpu.memory_space<vmem>>, vector<1x64xf32>,
    %c213_221 = arith.constant 213 : index
    %c0_222 = arith.constant 0 : index
    %161 = vector.load %arg10[%c213_221, %c0_222] : memref<342x64xf32, #tpu.memory_space<vmem>>, vector<1x64xf32>
    %c215_223 = arith.constant 215 : index
    %c0_224 = arith.constant 0 : index
    %162 = vector.load %arg10[%c215_223, %c0_224] : memref<342x64xf32, #tpu.memory_space<vmem>>, vector<1x64xf32>
    tpu.vector_store %arg10[%c215_223, %c0_224], %161 {strides = array<i32>} : memref<342x64xf32, #tpu.memory_space<vmem>>, vector<1x64xf32>,
    %c218_225 = arith.constant 218 : index
    %c0_226 = arith.constant 0 : index
    %163 = vector.load %arg10[%c218_225, %c0_226] : memref<342x64xf32, #tpu.memory_space<vmem>>, vector<1x64xf32>
    %c216_227 = arith.constant 216 : index
    %c0_228 = arith.constant 0 : index
    %164 = vector.load %arg10[%c216_227, %c0_228] : memref<342x64xf32, #tpu.memory_space<vmem>>, vector<1x64xf32>
    tpu.vector_store %arg10[%c216_227, %c0_228], %163 {strides = array<i32>} : memref<342x64xf32, #tpu.memory_space<vmem>>, vector<1x64xf32>,
    %c231_229 = arith.constant 231 : index
    %c0_230 = arith.constant 0 : index
    %165 = vector.load %arg10[%c231_229, %c0_230] : memref<342x64xf32, #tpu.memory_space<vmem>>, vector<1x64xf32>
    %c233_231 = arith.constant 233 : index
    %c0_232 = arith.constant 0 : index
    %166 = vector.load %arg10[%c233_231, %c0_232] : memref<342x64xf32, #tpu.memory_space<vmem>>, vector<1x64xf32>
    tpu.vector_store %arg10[%c233_231, %c0_232], %165 {strides = array<i32>} : memref<342x64xf32, #tpu.memory_space<vmem>>, vector<1x64xf32>,
    %c236_233 = arith.constant 236 : index
    %c0_234 = arith.constant 0 : index
    %167 = vector.load %arg10[%c236_233, %c0_234] : memref<342x64xf32, #tpu.memory_space<vmem>>, vector<1x64xf32>
    %c234_235 = arith.constant 234 : index
    %c0_236 = arith.constant 0 : index
    %168 = vector.load %arg10[%c234_235, %c0_236] : memref<342x64xf32, #tpu.memory_space<vmem>>, vector<1x64xf32>
    tpu.vector_store %arg10[%c234_235, %c0_236], %167 {strides = array<i32>} : memref<342x64xf32, #tpu.memory_space<vmem>>, vector<1x64xf32>,
    %c249_237 = arith.constant 249 : index
    %c0_238 = arith.constant 0 : index
    %169 = vector.load %arg10[%c249_237, %c0_238] : memref<342x64xf32, #tpu.memory_space<vmem>>, vector<1x64xf32>
    %c251_239 = arith.constant 251 : index
    %c0_240 = arith.constant 0 : index
    %170 = vector.load %arg10[%c251_239, %c0_240] : memref<342x64xf32, #tpu.memory_space<vmem>>, vector<1x64xf32>
    tpu.vector_store %arg10[%c251_239, %c0_240], %169 {strides = array<i32>} : memref<342x64xf32, #tpu.memory_space<vmem>>, vector<1x64xf32>,
    %c254_241 = arith.constant 254 : index
    %c0_242 = arith.constant 0 : index
    %171 = vector.load %arg10[%c254_241, %c0_242] : memref<342x64xf32, #tpu.memory_space<vmem>>, vector<1x64xf32>
    %c252_243 = arith.constant 252 : index
    %c0_244 = arith.constant 0 : index
    %172 = vector.load %arg10[%c252_243, %c0_244] : memref<342x64xf32, #tpu.memory_space<vmem>>, vector<1x64xf32>
    tpu.vector_store %arg10[%c252_243, %c0_244], %171 {strides = array<i32>} : memref<342x64xf32, #tpu.memory_space<vmem>>, vector<1x64xf32>,
    %c267_245 = arith.constant 267 : index
    %c0_246 = arith.constant 0 : index
    %173 = vector.load %arg10[%c267_245, %c0_246] : memref<342x64xf32, #tpu.memory_space<vmem>>, vector<1x64xf32>
    %c269_247 = arith.constant 269 : index
    %c0_248 = arith.constant 0 : index
    %174 = vector.load %arg10[%c269_247, %c0_248] : memref<342x64xf32, #tpu.memory_space<vmem>>, vector<1x64xf32>
    tpu.vector_store %arg10[%c269_247, %c0_248], %173 {strides = array<i32>} : memref<342x64xf32, #tpu.memory_space<vmem>>, vector<1x64xf32>,
    %c272_249 = arith.constant 272 : index
    %c0_250 = arith.constant 0 : index
    %175 = vector.load %arg10[%c272_249, %c0_250] : memref<342x64xf32, #tpu.memory_space<vmem>>, vector<1x64xf32>
    %c270_251 = arith.constant 270 : index
    %c0_252 = arith.constant 0 : index
    %176 = vector.load %arg10[%c270_251, %c0_252] : memref<342x64xf32, #tpu.memory_space<vmem>>, vector<1x64xf32>
    tpu.vector_store %arg10[%c270_251, %c0_252], %175 {strides = array<i32>} : memref<342x64xf32, #tpu.memory_space<vmem>>, vector<1x64xf32>,
    %c285_253 = arith.constant 285 : index
    %c0_254 = arith.constant 0 : index
    %177 = vector.load %arg10[%c285_253, %c0_254] : memref<342x64xf32, #tpu.memory_space<vmem>>, vector<1x64xf32>
    %c287_255 = arith.constant 287 : index
    %c0_256 = arith.constant 0 : index
    %178 = vector.load %arg10[%c287_255, %c0_256] : memref<342x64xf32, #tpu.memory_space<vmem>>, vector<1x64xf32>
    tpu.vector_store %arg10[%c287_255, %c0_256], %177 {strides = array<i32>} : memref<342x64xf32, #tpu.memory_space<vmem>>, vector<1x64xf32>,
    %c290_257 = arith.constant 290 : index
    %c0_258 = arith.constant 0 : index
    %179 = vector.load %arg10[%c290_257, %c0_258] : memref<342x64xf32, #tpu.memory_space<vmem>>, vector<1x64xf32>
    %c288_259 = arith.constant 288 : index
    %c0_260 = arith.constant 0 : index
    %180 = vector.load %arg10[%c288_259, %c0_260] : memref<342x64xf32, #tpu.memory_space<vmem>>, vector<1x64xf32>
    tpu.vector_store %arg10[%c288_259, %c0_260], %179 {strides = array<i32>} : memref<342x64xf32, #tpu.memory_space<vmem>>, vector<1x64xf32>,
    %c303_261 = arith.constant 303 : index
    %c0_262 = arith.constant 0 : index
    %181 = vector.load %arg10[%c303_261, %c0_262] : memref<342x64xf32, #tpu.memory_space<vmem>>, vector<1x64xf32>
    %c305_263 = arith.constant 305 : index
    %c0_264 = arith.constant 0 : index
    %182 = vector.load %arg10[%c305_263, %c0_264] : memref<342x64xf32, #tpu.memory_space<vmem>>, vector<1x64xf32>
    tpu.vector_store %arg10[%c305_263, %c0_264], %181 {strides = array<i32>} : memref<342x64xf32, #tpu.memory_space<vmem>>, vector<1x64xf32>,
    %c36_265 = arith.constant 36 : index
    %c0_266 = arith.constant 0 : index
    %183 = vector.load %arg10[%c36_265, %c0_266] : memref<342x64xf32, #tpu.memory_space<vmem>>, vector<18x64xf32>
    %c0_267 = arith.constant 0 : index
    %c0_268 = arith.constant 0 : index
    %184 = vector.load %arg10[%c0_267, %c0_268] : memref<342x64xf32, #tpu.memory_space<vmem>>, vector<18x64xf32>
    tpu.vector_store %arg10[%c0_267, %c0_268], %183 {strides = array<i32>} : memref<342x64xf32, #tpu.memory_space<vmem>>, vector<18x64xf32>,
    %c270_269 = arith.constant 270 : index
    %c0_270 = arith.constant 0 : index
    %185 = vector.load %arg10[%c270_269, %c0_270] : memref<342x64xf32, #tpu.memory_space<vmem>>, vector<18x64xf32>
    %c306_271 = arith.constant 306 : index
    %c0_272 = arith.constant 0 : index
    %186 = vector.load %arg10[%c306_271, %c0_272] : memref<342x64xf32, #tpu.memory_space<vmem>>, vector<18x64xf32>
    tpu.vector_store %arg10[%c306_271, %c0_272], %185 {strides = array<i32>} : memref<342x64xf32, #tpu.memory_space<vmem>>, vector<18x64xf32>,
    %cst_273 = arith.constant 0.000000e+00 : f32
    %187 = vector.broadcast %cst_273 : f32 to vector<18x64xf32>
    %c324_274 = arith.constant 324 : index
    %c0_275 = arith.constant 0 : index
    %188 = vector.load %arg10[%c324_274, %c0_275] : memref<342x64xf32, #tpu.memory_space<vmem>>, vector<18x64xf32>
    tpu.vector_store %arg10[%c324_274, %c0_275], %187 {strides = array<i32>} : memref<342x64xf32, #tpu.memory_space<vmem>>, vector<18x64xf32>,
    %c0_i32_276 = arith.constant 0 : i32
    %c4_i32_277 = arith.constant 4 : i32
    %189 = arith.addi %c0_i32_276, %c4_i32_277 : i32
    %c1_i32_278 = arith.constant 1 : i32
    scf.for %arg13 = %c0_i32_276 to %189 step %c1_i32_278  : i32 {
      %c72_i32 = arith.constant 72 : i32
      %360 = arith.muli %arg13, %c72_i32 : i32
      %361 = tpu.assume_multiple %360, 8 : i32
      %c0_i32_443 = arith.constant 0 : i32
      %362 = arith.addi %361, %c0_i32_443 : i32
      %c0_i32_444 = arith.constant 0 : i32
      %363 = arith.addi %362, %c0_i32_444 : i32
      %364 = arith.index_cast %363 : i32 to index
      %c0_445 = arith.constant 0 : index
      %365 = vector.load %arg10[%364, %c0_445] : memref<342x64xf32, #tpu.memory_space<vmem>>, vector<72x64xf32>
      %c0_446 = arith.constant 0 : index
      %c0_447 = arith.constant 0 : index
      %c0_448 = arith.constant 0 : index
      %c0_449 = arith.constant 0 : index
      %366 = vector.load %arg4[%c0_446, %c0_447, %c0_448, %c0_449] : memref<3x3x64x64xf32, #tpu.memory_space<vmem>>, vector<1x1x64x64xf32>
      %367 = vector.shape_cast %366 : vector<1x1x64x64xf32> to vector<64x64xf32>
      %cst_450 = arith.constant dense<0.000000e+00> : vector<72x64xf32>
      %368 = tpu.matmul %365, %367, %cst_450 {dimension_numbers = #tpu.dot_dimension_numbers<[1], [0], [0], [1], [0, 0, 1, 1], [], []>} : vector<72x64xf32>, vector<64x64xf32>, vector<72x64xf32> -> vector<72x64xf32>
      %c0_i32_451 = arith.constant 0 : i32
      %369 = arith.addi %361, %c0_i32_451 : i32
      %c1_i32_452 = arith.constant 1 : i32
      %370 = arith.addi %369, %c1_i32_452 : i32
      %371 = arith.index_cast %370 : i32 to index
      %c0_453 = arith.constant 0 : index
      %372 = vector.load %arg10[%371, %c0_453] : memref<342x64xf32, #tpu.memory_space<vmem>>, vector<72x64xf32>
      %c0_454 = arith.constant 0 : index
      %c1_455 = arith.constant 1 : index
      %c0_456 = arith.constant 0 : index
      %c0_457 = arith.constant 0 : index
      %373 = vector.load %arg4[%c0_454, %c1_455, %c0_456, %c0_457] : memref<3x3x64x64xf32, #tpu.memory_space<vmem>>, vector<1x1x64x64xf32>
      %374 = vector.shape_cast %373 : vector<1x1x64x64xf32> to vector<64x64xf32>
      %cst_458 = arith.constant dense<0.000000e+00> : vector<72x64xf32>
      %375 = tpu.matmul %372, %374, %cst_458 {dimension_numbers = #tpu.dot_dimension_numbers<[1], [0], [0], [1], [0, 0, 1, 1], [], []>} : vector<72x64xf32>, vector<64x64xf32>, vector<72x64xf32> -> vector<72x64xf32>
      %376 = arith.addf %368, %375 : vector<72x64xf32>
      %c0_i32_459 = arith.constant 0 : i32
      %377 = arith.addi %361, %c0_i32_459 : i32
      %c2_i32 = arith.constant 2 : i32
      %378 = arith.addi %377, %c2_i32 : i32
      %379 = arith.index_cast %378 : i32 to index
      %c0_460 = arith.constant 0 : index
      %380 = vector.load %arg10[%379, %c0_460] : memref<342x64xf32, #tpu.memory_space<vmem>>, vector<72x64xf32>
      %c0_461 = arith.constant 0 : index
      %c2_462 = arith.constant 2 : index
      %c0_463 = arith.constant 0 : index
      %c0_464 = arith.constant 0 : index
      %381 = vector.load %arg4[%c0_461, %c2_462, %c0_463, %c0_464] : memref<3x3x64x64xf32, #tpu.memory_space<vmem>>, vector<1x1x64x64xf32>
      %382 = vector.shape_cast %381 : vector<1x1x64x64xf32> to vector<64x64xf32>
      %cst_465 = arith.constant dense<0.000000e+00> : vector<72x64xf32>
      %383 = tpu.matmul %380, %382, %cst_465 {dimension_numbers = #tpu.dot_dimension_numbers<[1], [0], [0], [1], [0, 0, 1, 1], [], []>} : vector<72x64xf32>, vector<64x64xf32>, vector<72x64xf32> -> vector<72x64xf32>
      %384 = arith.addf %376, %383 : vector<72x64xf32>
      %c18_i32 = arith.constant 18 : i32
      %385 = arith.addi %361, %c18_i32 : i32
      %c0_i32_466 = arith.constant 0 : i32
      %386 = arith.addi %385, %c0_i32_466 : i32
      %387 = arith.index_cast %386 : i32 to index
      %c0_467 = arith.constant 0 : index
      %388 = vector.load %arg10[%387, %c0_467] : memref<342x64xf32, #tpu.memory_space<vmem>>, vector<72x64xf32>
      %c1_468 = arith.constant 1 : index
      %c0_469 = arith.constant 0 : index
      %c0_470 = arith.constant 0 : index
      %c0_471 = arith.constant 0 : index
      %389 = vector.load %arg4[%c1_468, %c0_469, %c0_470, %c0_471] : memref<3x3x64x64xf32, #tpu.memory_space<vmem>>, vector<1x1x64x64xf32>
      %390 = vector.shape_cast %389 : vector<1x1x64x64xf32> to vector<64x64xf32>
      %cst_472 = arith.constant dense<0.000000e+00> : vector<72x64xf32>
      %391 = tpu.matmul %388, %390, %cst_472 {dimension_numbers = #tpu.dot_dimension_numbers<[1], [0], [0], [1], [0, 0, 1, 1], [], []>} : vector<72x64xf32>, vector<64x64xf32>, vector<72x64xf32> -> vector<72x64xf32>
      %392 = arith.addf %384, %391 : vector<72x64xf32>
      %c18_i32_473 = arith.constant 18 : i32
      %393 = arith.addi %361, %c18_i32_473 : i32
      %c1_i32_474 = arith.constant 1 : i32
      %394 = arith.addi %393, %c1_i32_474 : i32
      %395 = arith.index_cast %394 : i32 to index
      %c0_475 = arith.constant 0 : index
      %396 = vector.load %arg10[%395, %c0_475] : memref<342x64xf32, #tpu.memory_space<vmem>>, vector<72x64xf32>
      %c1_476 = arith.constant 1 : index
      %c1_477 = arith.constant 1 : index
      %c0_478 = arith.constant 0 : index
      %c0_479 = arith.constant 0 : index
      %397 = vector.load %arg4[%c1_476, %c1_477, %c0_478, %c0_479] : memref<3x3x64x64xf32, #tpu.memory_space<vmem>>, vector<1x1x64x64xf32>
      %398 = vector.shape_cast %397 : vector<1x1x64x64xf32> to vector<64x64xf32>
      %cst_480 = arith.constant dense<0.000000e+00> : vector<72x64xf32>
      %399 = tpu.matmul %396, %398, %cst_480 {dimension_numbers = #tpu.dot_dimension_numbers<[1], [0], [0], [1], [0, 0, 1, 1], [], []>} : vector<72x64xf32>, vector<64x64xf32>, vector<72x64xf32> -> vector<72x64xf32>
      %400 = arith.addf %392, %399 : vector<72x64xf32>
      %c18_i32_481 = arith.constant 18 : i32
      %401 = arith.addi %361, %c18_i32_481 : i32
      %c2_i32_482 = arith.constant 2 : i32
      %402 = arith.addi %401, %c2_i32_482 : i32
      %403 = arith.index_cast %402 : i32 to index
      %c0_483 = arith.constant 0 : index
      %404 = vector.load %arg10[%403, %c0_483] : memref<342x64xf32, #tpu.memory_space<vmem>>, vector<72x64xf32>
      %c1_484 = arith.constant 1 : index
      %c2_485 = arith.constant 2 : index
      %c0_486 = arith.constant 0 : index
      %c0_487 = arith.constant 0 : index
      %405 = vector.load %arg4[%c1_484, %c2_485, %c0_486, %c0_487] : memref<3x3x64x64xf32, #tpu.memory_space<vmem>>, vector<1x1x64x64xf32>
      %406 = vector.shape_cast %405 : vector<1x1x64x64xf32> to vector<64x64xf32>
      %cst_488 = arith.constant dense<0.000000e+00> : vector<72x64xf32>
      %407 = tpu.matmul %404, %406, %cst_488 {dimension_numbers = #tpu.dot_dimension_numbers<[1], [0], [0], [1], [0, 0, 1, 1], [], []>} : vector<72x64xf32>, vector<64x64xf32>, vector<72x64xf32> -> vector<72x64xf32>
      %408 = arith.addf %400, %407 : vector<72x64xf32>
      %c36_i32 = arith.constant 36 : i32
      %409 = arith.addi %361, %c36_i32 : i32
      %c0_i32_489 = arith.constant 0 : i32
      %410 = arith.addi %409, %c0_i32_489 : i32
      %411 = arith.index_cast %410 : i32 to index
      %c0_490 = arith.constant 0 : index
      %412 = vector.load %arg10[%411, %c0_490] : memref<342x64xf32, #tpu.memory_space<vmem>>, vector<72x64xf32>
      %c2_491 = arith.constant 2 : index
      %c0_492 = arith.constant 0 : index
      %c0_493 = arith.constant 0 : index
      %c0_494 = arith.constant 0 : index
      %413 = vector.load %arg4[%c2_491, %c0_492, %c0_493, %c0_494] : memref<3x3x64x64xf32, #tpu.memory_space<vmem>>, vector<1x1x64x64xf32>
      %414 = vector.shape_cast %413 : vector<1x1x64x64xf32> to vector<64x64xf32>
      %cst_495 = arith.constant dense<0.000000e+00> : vector<72x64xf32>
      %415 = tpu.matmul %412, %414, %cst_495 {dimension_numbers = #tpu.dot_dimension_numbers<[1], [0], [0], [1], [0, 0, 1, 1], [], []>} : vector<72x64xf32>, vector<64x64xf32>, vector<72x64xf32> -> vector<72x64xf32>
      %416 = arith.addf %408, %415 : vector<72x64xf32>
      %c36_i32_496 = arith.constant 36 : i32
      %417 = arith.addi %361, %c36_i32_496 : i32
      %c1_i32_497 = arith.constant 1 : i32
      %418 = arith.addi %417, %c1_i32_497 : i32
      %419 = arith.index_cast %418 : i32 to index
      %c0_498 = arith.constant 0 : index
      %420 = vector.load %arg10[%419, %c0_498] : memref<342x64xf32, #tpu.memory_space<vmem>>, vector<72x64xf32>
      %c2_499 = arith.constant 2 : index
      %c1_500 = arith.constant 1 : index
      %c0_501 = arith.constant 0 : index
      %c0_502 = arith.constant 0 : index
      %421 = vector.load %arg4[%c2_499, %c1_500, %c0_501, %c0_502] : memref<3x3x64x64xf32, #tpu.memory_space<vmem>>, vector<1x1x64x64xf32>
      %422 = vector.shape_cast %421 : vector<1x1x64x64xf32> to vector<64x64xf32>
      %cst_503 = arith.constant dense<0.000000e+00> : vector<72x64xf32>
      %423 = tpu.matmul %420, %422, %cst_503 {dimension_numbers = #tpu.dot_dimension_numbers<[1], [0], [0], [1], [0, 0, 1, 1], [], []>} : vector<72x64xf32>, vector<64x64xf32>, vector<72x64xf32> -> vector<72x64xf32>
      %424 = arith.addf %416, %423 : vector<72x64xf32>
      %c36_i32_504 = arith.constant 36 : i32
      %425 = arith.addi %361, %c36_i32_504 : i32
      %c2_i32_505 = arith.constant 2 : i32
      %426 = arith.addi %425, %c2_i32_505 : i32
      %427 = arith.index_cast %426 : i32 to index
      %c0_506 = arith.constant 0 : index
      %428 = vector.load %arg10[%427, %c0_506] : memref<342x64xf32, #tpu.memory_space<vmem>>, vector<72x64xf32>
      %c2_507 = arith.constant 2 : index
      %c2_508 = arith.constant 2 : index
      %c0_509 = arith.constant 0 : index
      %c0_510 = arith.constant 0 : index
      %429 = vector.load %arg4[%c2_507, %c2_508, %c0_509, %c0_510] : memref<3x3x64x64xf32, #tpu.memory_space<vmem>>, vector<1x1x64x64xf32>
      %430 = vector.shape_cast %429 : vector<1x1x64x64xf32> to vector<64x64xf32>
      %cst_511 = arith.constant dense<0.000000e+00> : vector<72x64xf32>
      %431 = tpu.matmul %428, %430, %cst_511 {dimension_numbers = #tpu.dot_dimension_numbers<[1], [0], [0], [1], [0, 0, 1, 1], [], []>} : vector<72x64xf32>, vector<64x64xf32>, vector<72x64xf32> -> vector<72x64xf32>
      %432 = arith.addf %424, %431 : vector<72x64xf32>
      %c0_512 = arith.constant 0 : index
      %c0_513 = arith.constant 0 : index
      %433 = vector.load %arg5[%c0_512, %c0_513] : memref<1x64xf32, #tpu.memory_space<vmem>>, vector<1x64xf32>
      %434 = vector.broadcast %433 : vector<1x64xf32> to vector<72x64xf32>
      %435 = arith.addf %432, %434 : vector<72x64xf32>
      %cst_514 = arith.constant 0.000000e+00 : f32
      %436 = vector.broadcast %cst_514 : f32 to vector<72x64xf32>
      %437 = arith.maximumf %435, %436 : vector<72x64xf32>
      %438 = arith.index_cast %361 : i32 to index
      %c0_515 = arith.constant 0 : index
      %439 = vector.load %arg11[%438, %c0_515] : memref<288x64xf32, #tpu.memory_space<vmem>>, vector<72x64xf32>
      tpu.vector_store %arg11[%438, %c0_515], %437 {strides = array<i32>} : memref<288x64xf32, #tpu.memory_space<vmem>>, vector<72x64xf32>,
    }
    %c4_i32_279 = arith.constant 4 : i32
    %c0_280 = arith.constant 0 : index
    %c0_281 = arith.constant 0 : index
    %190 = vector.load %arg11[%c0_280, %c0_281] : memref<288x64xf32, #tpu.memory_space<vmem>>, vector<16x64xf32>
    %c18_282 = arith.constant 18 : index
    %c0_283 = arith.constant 0 : index
    %191 = vector.load %arg11[%c18_282, %c0_283] : memref<288x64xf32, #tpu.memory_space<vmem>>, vector<16x64xf32>
    %192 = arith.maximumf %190, %191 : vector<16x64xf32>
    %193 = vector.shape_cast %192 : vector<16x64xf32> to vector<8x2x64xf32>
    %194 = vector.extract_strided_slice %193 {offsets = [0, 0, 0], sizes = [8, 1, 64], strides = [1, 1, 1]} : vector<8x2x64xf32> to vector<8x1x64xf32>
    %195 = vector.shape_cast %194 : vector<8x1x64xf32> to vector<8x64xf32>
    %196 = vector.extract_strided_slice %193 {offsets = [0, 1, 0], sizes = [8, 1, 64], strides = [1, 1, 1]} : vector<8x2x64xf32> to vector<8x1x64xf32>
    %197 = vector.shape_cast %196 : vector<8x1x64xf32> to vector<8x64xf32>
    %198 = arith.maximumf %195, %197 : vector<8x64xf32>
    %c11_284 = arith.constant 11 : index
    %c0_285 = arith.constant 0 : index
    %199 = vector.load %arg12[%c11_284, %c0_285] : memref<110x64xf32, #tpu.memory_space<vmem>>, vector<8x64xf32>
    tpu.vector_store %arg12[%c11_284, %c0_285], %198 {strides = array<i32>} : memref<110x64xf32, #tpu.memory_space<vmem>>, vector<8x64xf32>,
    %c36_286 = arith.constant 36 : index
    %c0_287 = arith.constant 0 : index
    %200 = vector.load %arg11[%c36_286, %c0_287] : memref<288x64xf32, #tpu.memory_space<vmem>>, vector<16x64xf32>
    %c54_288 = arith.constant 54 : index
    %c0_289 = arith.constant 0 : index
    %201 = vector.load %arg11[%c54_288, %c0_289] : memref<288x64xf32, #tpu.memory_space<vmem>>, vector<16x64xf32>
    %202 = arith.maximumf %200, %201 : vector<16x64xf32>
    %203 = vector.shape_cast %202 : vector<16x64xf32> to vector<8x2x64xf32>
    %204 = vector.extract_strided_slice %203 {offsets = [0, 0, 0], sizes = [8, 1, 64], strides = [1, 1, 1]} : vector<8x2x64xf32> to vector<8x1x64xf32>
    %205 = vector.shape_cast %204 : vector<8x1x64xf32> to vector<8x64xf32>
    %206 = vector.extract_strided_slice %203 {offsets = [0, 1, 0], sizes = [8, 1, 64], strides = [1, 1, 1]} : vector<8x2x64xf32> to vector<8x1x64xf32>
    %207 = vector.shape_cast %206 : vector<8x1x64xf32> to vector<8x64xf32>
    %208 = arith.maximumf %205, %207 : vector<8x64xf32>
    %c21 = arith.constant 21 : index
    %c0_290 = arith.constant 0 : index
    %209 = vector.load %arg12[%c21, %c0_290] : memref<110x64xf32, #tpu.memory_space<vmem>>, vector<8x64xf32>
    tpu.vector_store %arg12[%c21, %c0_290], %208 {strides = array<i32>} : memref<110x64xf32, #tpu.memory_space<vmem>>, vector<8x64xf32>,
    %c72_291 = arith.constant 72 : index
    %c0_292 = arith.constant 0 : index
    %210 = vector.load %arg11[%c72_291, %c0_292] : memref<288x64xf32, #tpu.memory_space<vmem>>, vector<16x64xf32>
    %c90_293 = arith.constant 90 : index
    %c0_294 = arith.constant 0 : index
    %211 = vector.load %arg11[%c90_293, %c0_294] : memref<288x64xf32, #tpu.memory_space<vmem>>, vector<16x64xf32>
    %212 = arith.maximumf %210, %211 : vector<16x64xf32>
    %213 = vector.shape_cast %212 : vector<16x64xf32> to vector<8x2x64xf32>
    %214 = vector.extract_strided_slice %213 {offsets = [0, 0, 0], sizes = [8, 1, 64], strides = [1, 1, 1]} : vector<8x2x64xf32> to vector<8x1x64xf32>
    %215 = vector.shape_cast %214 : vector<8x1x64xf32> to vector<8x64xf32>
    %216 = vector.extract_strided_slice %213 {offsets = [0, 1, 0], sizes = [8, 1, 64], strides = [1, 1, 1]} : vector<8x2x64xf32> to vector<8x1x64xf32>
    %217 = vector.shape_cast %216 : vector<8x1x64xf32> to vector<8x64xf32>
    %218 = arith.maximumf %215, %217 : vector<8x64xf32>
    %c31 = arith.constant 31 : index
    %c0_295 = arith.constant 0 : index
    %219 = vector.load %arg12[%c31, %c0_295] : memref<110x64xf32, #tpu.memory_space<vmem>>, vector<8x64xf32>
    tpu.vector_store %arg12[%c31, %c0_295], %218 {strides = array<i32>} : memref<110x64xf32, #tpu.memory_space<vmem>>, vector<8x64xf32>,
    %c108_296 = arith.constant 108 : index
    %c0_297 = arith.constant 0 : index
    %220 = vector.load %arg11[%c108_296, %c0_297] : memref<288x64xf32, #tpu.memory_space<vmem>>, vector<16x64xf32>
    %c126_298 = arith.constant 126 : index
    %c0_299 = arith.constant 0 : index
    %221 = vector.load %arg11[%c126_298, %c0_299] : memref<288x64xf32, #tpu.memory_space<vmem>>, vector<16x64xf32>
    %222 = arith.maximumf %220, %221 : vector<16x64xf32>
    %223 = vector.shape_cast %222 : vector<16x64xf32> to vector<8x2x64xf32>
    %224 = vector.extract_strided_slice %223 {offsets = [0, 0, 0], sizes = [8, 1, 64], strides = [1, 1, 1]} : vector<8x2x64xf32> to vector<8x1x64xf32>
    %225 = vector.shape_cast %224 : vector<8x1x64xf32> to vector<8x64xf32>
    %226 = vector.extract_strided_slice %223 {offsets = [0, 1, 0], sizes = [8, 1, 64], strides = [1, 1, 1]} : vector<8x2x64xf32> to vector<8x1x64xf32>
    %227 = vector.shape_cast %226 : vector<8x1x64xf32> to vector<8x64xf32>
    %228 = arith.maximumf %225, %227 : vector<8x64xf32>
    %c41 = arith.constant 41 : index
    %c0_300 = arith.constant 0 : index
    %229 = vector.load %arg12[%c41, %c0_300] : memref<110x64xf32, #tpu.memory_space<vmem>>, vector<8x64xf32>
    tpu.vector_store %arg12[%c41, %c0_300], %228 {strides = array<i32>} : memref<110x64xf32, #tpu.memory_space<vmem>>, vector<8x64xf32>,
    %c144_301 = arith.constant 144 : index
    %c0_302 = arith.constant 0 : index
    %230 = vector.load %arg11[%c144_301, %c0_302] : memref<288x64xf32, #tpu.memory_space<vmem>>, vector<16x64xf32>
    %c162_303 = arith.constant 162 : index
    %c0_304 = arith.constant 0 : index
    %231 = vector.load %arg11[%c162_303, %c0_304] : memref<288x64xf32, #tpu.memory_space<vmem>>, vector<16x64xf32>
    %232 = arith.maximumf %230, %231 : vector<16x64xf32>
    %233 = vector.shape_cast %232 : vector<16x64xf32> to vector<8x2x64xf32>
    %234 = vector.extract_strided_slice %233 {offsets = [0, 0, 0], sizes = [8, 1, 64], strides = [1, 1, 1]} : vector<8x2x64xf32> to vector<8x1x64xf32>
    %235 = vector.shape_cast %234 : vector<8x1x64xf32> to vector<8x64xf32>
    %236 = vector.extract_strided_slice %233 {offsets = [0, 1, 0], sizes = [8, 1, 64], strides = [1, 1, 1]} : vector<8x2x64xf32> to vector<8x1x64xf32>
    %237 = vector.shape_cast %236 : vector<8x1x64xf32> to vector<8x64xf32>
    %238 = arith.maximumf %235, %237 : vector<8x64xf32>
    %c51_305 = arith.constant 51 : index
    %c0_306 = arith.constant 0 : index
    %239 = vector.load %arg12[%c51_305, %c0_306] : memref<110x64xf32, #tpu.memory_space<vmem>>, vector<8x64xf32>
    tpu.vector_store %arg12[%c51_305, %c0_306], %238 {strides = array<i32>} : memref<110x64xf32, #tpu.memory_space<vmem>>, vector<8x64xf32>,
    %c180_307 = arith.constant 180 : index
    %c0_308 = arith.constant 0 : index
    %240 = vector.load %arg11[%c180_307, %c0_308] : memref<288x64xf32, #tpu.memory_space<vmem>>, vector<16x64xf32>
    %c198_309 = arith.constant 198 : index
    %c0_310 = arith.constant 0 : index
    %241 = vector.load %arg11[%c198_309, %c0_310] : memref<288x64xf32, #tpu.memory_space<vmem>>, vector<16x64xf32>
    %242 = arith.maximumf %240, %241 : vector<16x64xf32>
    %243 = vector.shape_cast %242 : vector<16x64xf32> to vector<8x2x64xf32>
    %244 = vector.extract_strided_slice %243 {offsets = [0, 0, 0], sizes = [8, 1, 64], strides = [1, 1, 1]} : vector<8x2x64xf32> to vector<8x1x64xf32>
    %245 = vector.shape_cast %244 : vector<8x1x64xf32> to vector<8x64xf32>
    %246 = vector.extract_strided_slice %243 {offsets = [0, 1, 0], sizes = [8, 1, 64], strides = [1, 1, 1]} : vector<8x2x64xf32> to vector<8x1x64xf32>
    %247 = vector.shape_cast %246 : vector<8x1x64xf32> to vector<8x64xf32>
    %248 = arith.maximumf %245, %247 : vector<8x64xf32>
    %c61 = arith.constant 61 : index
    %c0_311 = arith.constant 0 : index
    %249 = vector.load %arg12[%c61, %c0_311] : memref<110x64xf32, #tpu.memory_space<vmem>>, vector<8x64xf32>
    tpu.vector_store %arg12[%c61, %c0_311], %248 {strides = array<i32>} : memref<110x64xf32, #tpu.memory_space<vmem>>, vector<8x64xf32>,
    %c216_312 = arith.constant 216 : index
    %c0_313 = arith.constant 0 : index
    %250 = vector.load %arg11[%c216_312, %c0_313] : memref<288x64xf32, #tpu.memory_space<vmem>>, vector<16x64xf32>
    %c234_314 = arith.constant 234 : index
    %c0_315 = arith.constant 0 : index
    %251 = vector.load %arg11[%c234_314, %c0_315] : memref<288x64xf32, #tpu.memory_space<vmem>>, vector<16x64xf32>
    %252 = arith.maximumf %250, %251 : vector<16x64xf32>
    %253 = vector.shape_cast %252 : vector<16x64xf32> to vector<8x2x64xf32>
    %254 = vector.extract_strided_slice %253 {offsets = [0, 0, 0], sizes = [8, 1, 64], strides = [1, 1, 1]} : vector<8x2x64xf32> to vector<8x1x64xf32>
    %255 = vector.shape_cast %254 : vector<8x1x64xf32> to vector<8x64xf32>
    %256 = vector.extract_strided_slice %253 {offsets = [0, 1, 0], sizes = [8, 1, 64], strides = [1, 1, 1]} : vector<8x2x64xf32> to vector<8x1x64xf32>
    %257 = vector.shape_cast %256 : vector<8x1x64xf32> to vector<8x64xf32>
    %258 = arith.maximumf %255, %257 : vector<8x64xf32>
    %c71_316 = arith.constant 71 : index
    %c0_317 = arith.constant 0 : index
    %259 = vector.load %arg12[%c71_316, %c0_317] : memref<110x64xf32, #tpu.memory_space<vmem>>, vector<8x64xf32>
    tpu.vector_store %arg12[%c71_316, %c0_317], %258 {strides = array<i32>} : memref<110x64xf32, #tpu.memory_space<vmem>>, vector<8x64xf32>,
    %c252_318 = arith.constant 252 : index
    %c0_319 = arith.constant 0 : index
    %260 = vector.load %arg11[%c252_318, %c0_319] : memref<288x64xf32, #tpu.memory_space<vmem>>, vector<16x64xf32>
    %c270_320 = arith.constant 270 : index
    %c0_321 = arith.constant 0 : index
    %261 = vector.load %arg11[%c270_320, %c0_321] : memref<288x64xf32, #tpu.memory_space<vmem>>, vector<16x64xf32>
    %262 = arith.maximumf %260, %261 : vector<16x64xf32>
    %263 = vector.shape_cast %262 : vector<16x64xf32> to vector<8x2x64xf32>
    %264 = vector.extract_strided_slice %263 {offsets = [0, 0, 0], sizes = [8, 1, 64], strides = [1, 1, 1]} : vector<8x2x64xf32> to vector<8x1x64xf32>
    %265 = vector.shape_cast %264 : vector<8x1x64xf32> to vector<8x64xf32>
    %266 = vector.extract_strided_slice %263 {offsets = [0, 1, 0], sizes = [8, 1, 64], strides = [1, 1, 1]} : vector<8x2x64xf32> to vector<8x1x64xf32>
    %267 = vector.shape_cast %266 : vector<8x1x64xf32> to vector<8x64xf32>
    %268 = arith.maximumf %265, %267 : vector<8x64xf32>
    %c81 = arith.constant 81 : index
    %c0_322 = arith.constant 0 : index
    %269 = vector.load %arg12[%c81, %c0_322] : memref<110x64xf32, #tpu.memory_space<vmem>>, vector<8x64xf32>
    tpu.vector_store %arg12[%c81, %c0_322], %268 {strides = array<i32>} : memref<110x64xf32, #tpu.memory_space<vmem>>, vector<8x64xf32>,
    %c12_323 = arith.constant 12 : index
    %c0_324 = arith.constant 0 : index
    %270 = vector.load %arg12[%c12_323, %c0_324] : memref<110x64xf32, #tpu.memory_space<vmem>>, vector<1x64xf32>
    %c10_325 = arith.constant 10 : index
    %c0_326 = arith.constant 0 : index
    %271 = vector.load %arg12[%c10_325, %c0_326] : memref<110x64xf32, #tpu.memory_space<vmem>>, vector<1x64xf32>
    tpu.vector_store %arg12[%c10_325, %c0_326], %270 {strides = array<i32>} : memref<110x64xf32, #tpu.memory_space<vmem>>, vector<1x64xf32>,
    %c17 = arith.constant 17 : index
    %c0_327 = arith.constant 0 : index
    %272 = vector.load %arg12[%c17, %c0_327] : memref<110x64xf32, #tpu.memory_space<vmem>>, vector<1x64xf32>
    %c19_328 = arith.constant 19 : index
    %c0_329 = arith.constant 0 : index
    %273 = vector.load %arg12[%c19_328, %c0_329] : memref<110x64xf32, #tpu.memory_space<vmem>>, vector<1x64xf32>
    tpu.vector_store %arg12[%c19_328, %c0_329], %272 {strides = array<i32>} : memref<110x64xf32, #tpu.memory_space<vmem>>, vector<1x64xf32>,
    %c22 = arith.constant 22 : index
    %c0_330 = arith.constant 0 : index
    %274 = vector.load %arg12[%c22, %c0_330] : memref<110x64xf32, #tpu.memory_space<vmem>>, vector<1x64xf32>
    %c20_331 = arith.constant 20 : index
    %c0_332 = arith.constant 0 : index
    %275 = vector.load %arg12[%c20_331, %c0_332] : memref<110x64xf32, #tpu.memory_space<vmem>>, vector<1x64xf32>
    tpu.vector_store %arg12[%c20_331, %c0_332], %274 {strides = array<i32>} : memref<110x64xf32, #tpu.memory_space<vmem>>, vector<1x64xf32>,
    %c27 = arith.constant 27 : index
    %c0_333 = arith.constant 0 : index
    %276 = vector.load %arg12[%c27, %c0_333] : memref<110x64xf32, #tpu.memory_space<vmem>>, vector<1x64xf32>
    %c29 = arith.constant 29 : index
    %c0_334 = arith.constant 0 : index
    %277 = vector.load %arg12[%c29, %c0_334] : memref<110x64xf32, #tpu.memory_space<vmem>>, vector<1x64xf32>
    tpu.vector_store %arg12[%c29, %c0_334], %276 {strides = array<i32>} : memref<110x64xf32, #tpu.memory_space<vmem>>, vector<1x64xf32>,
    %c32 = arith.constant 32 : index
    %c0_335 = arith.constant 0 : index
    %278 = vector.load %arg12[%c32, %c0_335] : memref<110x64xf32, #tpu.memory_space<vmem>>, vector<1x64xf32>
    %c30 = arith.constant 30 : index
    %c0_336 = arith.constant 0 : index
    %279 = vector.load %arg12[%c30, %c0_336] : memref<110x64xf32, #tpu.memory_space<vmem>>, vector<1x64xf32>
    tpu.vector_store %arg12[%c30, %c0_336], %278 {strides = array<i32>} : memref<110x64xf32, #tpu.memory_space<vmem>>, vector<1x64xf32>,
    %c37_337 = arith.constant 37 : index
    %c0_338 = arith.constant 0 : index
    %280 = vector.load %arg12[%c37_337, %c0_338] : memref<110x64xf32, #tpu.memory_space<vmem>>, vector<1x64xf32>
    %c39 = arith.constant 39 : index
    %c0_339 = arith.constant 0 : index
    %281 = vector.load %arg12[%c39, %c0_339] : memref<110x64xf32, #tpu.memory_space<vmem>>, vector<1x64xf32>
    tpu.vector_store %arg12[%c39, %c0_339], %280 {strides = array<i32>} : memref<110x64xf32, #tpu.memory_space<vmem>>, vector<1x64xf32>,
    %c42 = arith.constant 42 : index
    %c0_340 = arith.constant 0 : index
    %282 = vector.load %arg12[%c42, %c0_340] : memref<110x64xf32, #tpu.memory_space<vmem>>, vector<1x64xf32>
    %c40 = arith.constant 40 : index
    %c0_341 = arith.constant 0 : index
    %283 = vector.load %arg12[%c40, %c0_341] : memref<110x64xf32, #tpu.memory_space<vmem>>, vector<1x64xf32>
    tpu.vector_store %arg12[%c40, %c0_341], %282 {strides = array<i32>} : memref<110x64xf32, #tpu.memory_space<vmem>>, vector<1x64xf32>,
    %c47 = arith.constant 47 : index
    %c0_342 = arith.constant 0 : index
    %284 = vector.load %arg12[%c47, %c0_342] : memref<110x64xf32, #tpu.memory_space<vmem>>, vector<1x64xf32>
    %c49 = arith.constant 49 : index
    %c0_343 = arith.constant 0 : index
    %285 = vector.load %arg12[%c49, %c0_343] : memref<110x64xf32, #tpu.memory_space<vmem>>, vector<1x64xf32>
    tpu.vector_store %arg12[%c49, %c0_343], %284 {strides = array<i32>} : memref<110x64xf32, #tpu.memory_space<vmem>>, vector<1x64xf32>,
    %c52 = arith.constant 52 : index
    %c0_344 = arith.constant 0 : index
    %286 = vector.load %arg12[%c52, %c0_344] : memref<110x64xf32, #tpu.memory_space<vmem>>, vector<1x64xf32>
    %c50 = arith.constant 50 : index
    %c0_345 = arith.constant 0 : index
    %287 = vector.load %arg12[%c50, %c0_345] : memref<110x64xf32, #tpu.memory_space<vmem>>, vector<1x64xf32>
    tpu.vector_store %arg12[%c50, %c0_345], %286 {strides = array<i32>} : memref<110x64xf32, #tpu.memory_space<vmem>>, vector<1x64xf32>,
    %c57 = arith.constant 57 : index
    %c0_346 = arith.constant 0 : index
    %288 = vector.load %arg12[%c57, %c0_346] : memref<110x64xf32, #tpu.memory_space<vmem>>, vector<1x64xf32>
    %c59 = arith.constant 59 : index
    %c0_347 = arith.constant 0 : index
    %289 = vector.load %arg12[%c59, %c0_347] : memref<110x64xf32, #tpu.memory_space<vmem>>, vector<1x64xf32>
    tpu.vector_store %arg12[%c59, %c0_347], %288 {strides = array<i32>} : memref<110x64xf32, #tpu.memory_space<vmem>>, vector<1x64xf32>,
    %c62 = arith.constant 62 : index
    %c0_348 = arith.constant 0 : index
    %290 = vector.load %arg12[%c62, %c0_348] : memref<110x64xf32, #tpu.memory_space<vmem>>, vector<1x64xf32>
    %c60 = arith.constant 60 : index
    %c0_349 = arith.constant 0 : index
    %291 = vector.load %arg12[%c60, %c0_349] : memref<110x64xf32, #tpu.memory_space<vmem>>, vector<1x64xf32>
    tpu.vector_store %arg12[%c60, %c0_349], %290 {strides = array<i32>} : memref<110x64xf32, #tpu.memory_space<vmem>>, vector<1x64xf32>,
    %c67 = arith.constant 67 : index
    %c0_350 = arith.constant 0 : index
    %292 = vector.load %arg12[%c67, %c0_350] : memref<110x64xf32, #tpu.memory_space<vmem>>, vector<1x64xf32>
    %c69_351 = arith.constant 69 : index
    %c0_352 = arith.constant 0 : index
    %293 = vector.load %arg12[%c69_351, %c0_352] : memref<110x64xf32, #tpu.memory_space<vmem>>, vector<1x64xf32>
    tpu.vector_store %arg12[%c69_351, %c0_352], %292 {strides = array<i32>} : memref<110x64xf32, #tpu.memory_space<vmem>>, vector<1x64xf32>,
    %c72_353 = arith.constant 72 : index
    %c0_354 = arith.constant 0 : index
    %294 = vector.load %arg12[%c72_353, %c0_354] : memref<110x64xf32, #tpu.memory_space<vmem>>, vector<1x64xf32>
    %c70 = arith.constant 70 : index
    %c0_355 = arith.constant 0 : index
    %295 = vector.load %arg12[%c70, %c0_355] : memref<110x64xf32, #tpu.memory_space<vmem>>, vector<1x64xf32>
    tpu.vector_store %arg12[%c70, %c0_355], %294 {strides = array<i32>} : memref<110x64xf32, #tpu.memory_space<vmem>>, vector<1x64xf32>,
    %c77 = arith.constant 77 : index
    %c0_356 = arith.constant 0 : index
    %296 = vector.load %arg12[%c77, %c0_356] : memref<110x64xf32, #tpu.memory_space<vmem>>, vector<1x64xf32>
    %c79 = arith.constant 79 : index
    %c0_357 = arith.constant 0 : index
    %297 = vector.load %arg12[%c79, %c0_357] : memref<110x64xf32, #tpu.memory_space<vmem>>, vector<1x64xf32>
    tpu.vector_store %arg12[%c79, %c0_357], %296 {strides = array<i32>} : memref<110x64xf32, #tpu.memory_space<vmem>>, vector<1x64xf32>,
    %c82 = arith.constant 82 : index
    %c0_358 = arith.constant 0 : index
    %298 = vector.load %arg12[%c82, %c0_358] : memref<110x64xf32, #tpu.memory_space<vmem>>, vector<1x64xf32>
    %c80 = arith.constant 80 : index
    %c0_359 = arith.constant 0 : index
    %299 = vector.load %arg12[%c80, %c0_359] : memref<110x64xf32, #tpu.memory_space<vmem>>, vector<1x64xf32>
    tpu.vector_store %arg12[%c80, %c0_359], %298 {strides = array<i32>} : memref<110x64xf32, #tpu.memory_space<vmem>>, vector<1x64xf32>,
    %c87_360 = arith.constant 87 : index
    %c0_361 = arith.constant 0 : index
    %300 = vector.load %arg12[%c87_360, %c0_361] : memref<110x64xf32, #tpu.memory_space<vmem>>, vector<1x64xf32>
    %c89_362 = arith.constant 89 : index
    %c0_363 = arith.constant 0 : index
    %301 = vector.load %arg12[%c89_362, %c0_363] : memref<110x64xf32, #tpu.memory_space<vmem>>, vector<1x64xf32>
    tpu.vector_store %arg12[%c89_362, %c0_363], %300 {strides = array<i32>} : memref<110x64xf32, #tpu.memory_space<vmem>>, vector<1x64xf32>,
    %c20_364 = arith.constant 20 : index
    %c0_365 = arith.constant 0 : index
    %302 = vector.load %arg12[%c20_364, %c0_365] : memref<110x64xf32, #tpu.memory_space<vmem>>, vector<10x64xf32>
    %c0_366 = arith.constant 0 : index
    %c0_367 = arith.constant 0 : index
    %303 = vector.load %arg12[%c0_366, %c0_367] : memref<110x64xf32, #tpu.memory_space<vmem>>, vector<10x64xf32>
    tpu.vector_store %arg12[%c0_366, %c0_367], %302 {strides = array<i32>} : memref<110x64xf32, #tpu.memory_space<vmem>>, vector<10x64xf32>,
    %c70_368 = arith.constant 70 : index
    %c0_369 = arith.constant 0 : index
    %304 = vector.load %arg12[%c70_368, %c0_369] : memref<110x64xf32, #tpu.memory_space<vmem>>, vector<10x64xf32>
    %c90_370 = arith.constant 90 : index
    %c0_371 = arith.constant 0 : index
    %305 = vector.load %arg12[%c90_370, %c0_371] : memref<110x64xf32, #tpu.memory_space<vmem>>, vector<10x64xf32>
    tpu.vector_store %arg12[%c90_370, %c0_371], %304 {strides = array<i32>} : memref<110x64xf32, #tpu.memory_space<vmem>>, vector<10x64xf32>,
    %cst_372 = arith.constant 0.000000e+00 : f32
    %306 = vector.broadcast %cst_372 : f32 to vector<10x64xf32>
    %c100 = arith.constant 100 : index
    %c0_373 = arith.constant 0 : index
    %307 = vector.load %arg12[%c100, %c0_373] : memref<110x64xf32, #tpu.memory_space<vmem>>, vector<10x64xf32>
    tpu.vector_store %arg12[%c100, %c0_373], %306 {strides = array<i32>} : memref<110x64xf32, #tpu.memory_space<vmem>>, vector<10x64xf32>,
    %c0_374 = arith.constant 0 : index
    %c0_375 = arith.constant 0 : index
    %308 = vector.load %arg12[%c0_374, %c0_375] : memref<110x64xf32, #tpu.memory_space<vmem>>, vector<80x64xf32>
    %c0_376 = arith.constant 0 : index
    %c0_377 = arith.constant 0 : index
    %c0_378 = arith.constant 0 : index
    %c0_379 = arith.constant 0 : index
    %309 = vector.load %arg6[%c0_376, %c0_377, %c0_378, %c0_379] : memref<3x3x64x128xf32, #tpu.memory_space<vmem>>, vector<1x1x64x128xf32>
    %310 = vector.shape_cast %309 : vector<1x1x64x128xf32> to vector<64x128xf32>
    %cst_380 = arith.constant dense<0.000000e+00> : vector<80x128xf32>
    %311 = tpu.matmul %308, %310, %cst_380 {dimension_numbers = #tpu.dot_dimension_numbers<[1], [0], [0], [1], [0, 0, 1, 1], [], []>} : vector<80x64xf32>, vector<64x128xf32>, vector<80x128xf32> -> vector<80x128xf32>
    %c1_381 = arith.constant 1 : index
    %c0_382 = arith.constant 0 : index
    %312 = vector.load %arg12[%c1_381, %c0_382] : memref<110x64xf32, #tpu.memory_space<vmem>>, vector<80x64xf32>
    %c0_383 = arith.constant 0 : index
    %c1_384 = arith.constant 1 : index
    %c0_385 = arith.constant 0 : index
    %c0_386 = arith.constant 0 : index
    %313 = vector.load %arg6[%c0_383, %c1_384, %c0_385, %c0_386] : memref<3x3x64x128xf32, #tpu.memory_space<vmem>>, vector<1x1x64x128xf32>
    %314 = vector.shape_cast %313 : vector<1x1x64x128xf32> to vector<64x128xf32>
    %cst_387 = arith.constant dense<0.000000e+00> : vector<80x128xf32>
    %315 = tpu.matmul %312, %314, %cst_387 {dimension_numbers = #tpu.dot_dimension_numbers<[1], [0], [0], [1], [0, 0, 1, 1], [], []>} : vector<80x64xf32>, vector<64x128xf32>, vector<80x128xf32> -> vector<80x128xf32>
    %316 = arith.addf %311, %315 : vector<80x128xf32>
    %c2_388 = arith.constant 2 : index
    %c0_389 = arith.constant 0 : index
    %317 = vector.load %arg12[%c2_388, %c0_389] : memref<110x64xf32, #tpu.memory_space<vmem>>, vector<80x64xf32>
    %c0_390 = arith.constant 0 : index
    %c2_391 = arith.constant 2 : index
    %c0_392 = arith.constant 0 : index
    %c0_393 = arith.constant 0 : index
    %318 = vector.load %arg6[%c0_390, %c2_391, %c0_392, %c0_393] : memref<3x3x64x128xf32, #tpu.memory_space<vmem>>, vector<1x1x64x128xf32>
    %319 = vector.shape_cast %318 : vector<1x1x64x128xf32> to vector<64x128xf32>
    %cst_394 = arith.constant dense<0.000000e+00> : vector<80x128xf32>
    %320 = tpu.matmul %317, %319, %cst_394 {dimension_numbers = #tpu.dot_dimension_numbers<[1], [0], [0], [1], [0, 0, 1, 1], [], []>} : vector<80x64xf32>, vector<64x128xf32>, vector<80x128xf32> -> vector<80x128xf32>
    %321 = arith.addf %316, %320 : vector<80x128xf32>
    %c10_395 = arith.constant 10 : index
    %c0_396 = arith.constant 0 : index
    %322 = vector.load %arg12[%c10_395, %c0_396] : memref<110x64xf32, #tpu.memory_space<vmem>>, vector<80x64xf32>
    %c1_397 = arith.constant 1 : index
    %c0_398 = arith.constant 0 : index
    %c0_399 = arith.constant 0 : index
    %c0_400 = arith.constant 0 : index
    %323 = vector.load %arg6[%c1_397, %c0_398, %c0_399, %c0_400] : memref<3x3x64x128xf32, #tpu.memory_space<vmem>>, vector<1x1x64x128xf32>
    %324 = vector.shape_cast %323 : vector<1x1x64x128xf32> to vector<64x128xf32>
    %cst_401 = arith.constant dense<0.000000e+00> : vector<80x128xf32>
    %325 = tpu.matmul %322, %324, %cst_401 {dimension_numbers = #tpu.dot_dimension_numbers<[1], [0], [0], [1], [0, 0, 1, 1], [], []>} : vector<80x64xf32>, vector<64x128xf32>, vector<80x128xf32> -> vector<80x128xf32>
    %326 = arith.addf %321, %325 : vector<80x128xf32>
    %c11_402 = arith.constant 11 : index
    %c0_403 = arith.constant 0 : index
    %327 = vector.load %arg12[%c11_402, %c0_403] : memref<110x64xf32, #tpu.memory_space<vmem>>, vector<80x64xf32>
    %c1_404 = arith.constant 1 : index
    %c1_405 = arith.constant 1 : index
    %c0_406 = arith.constant 0 : index
    %c0_407 = arith.constant 0 : index
    %328 = vector.load %arg6[%c1_404, %c1_405, %c0_406, %c0_407] : memref<3x3x64x128xf32, #tpu.memory_space<vmem>>, vector<1x1x64x128xf32>
    %329 = vector.shape_cast %328 : vector<1x1x64x128xf32> to vector<64x128xf32>
    %cst_408 = arith.constant dense<0.000000e+00> : vector<80x128xf32>
    %330 = tpu.matmul %327, %329, %cst_408 {dimension_numbers = #tpu.dot_dimension_numbers<[1], [0], [0], [1], [0, 0, 1, 1], [], []>} : vector<80x64xf32>, vector<64x128xf32>, vector<80x128xf32> -> vector<80x128xf32>
    %331 = arith.addf %326, %330 : vector<80x128xf32>
    %c12_409 = arith.constant 12 : index
    %c0_410 = arith.constant 0 : index
    %332 = vector.load %arg12[%c12_409, %c0_410] : memref<110x64xf32, #tpu.memory_space<vmem>>, vector<80x64xf32>
    %c1_411 = arith.constant 1 : index
    %c2_412 = arith.constant 2 : index
    %c0_413 = arith.constant 0 : index
    %c0_414 = arith.constant 0 : index
    %333 = vector.load %arg6[%c1_411, %c2_412, %c0_413, %c0_414] : memref<3x3x64x128xf32, #tpu.memory_space<vmem>>, vector<1x1x64x128xf32>
    %334 = vector.shape_cast %333 : vector<1x1x64x128xf32> to vector<64x128xf32>
    %cst_415 = arith.constant dense<0.000000e+00> : vector<80x128xf32>
    %335 = tpu.matmul %332, %334, %cst_415 {dimension_numbers = #tpu.dot_dimension_numbers<[1], [0], [0], [1], [0, 0, 1, 1], [], []>} : vector<80x64xf32>, vector<64x128xf32>, vector<80x128xf32> -> vector<80x128xf32>
    %336 = arith.addf %331, %335 : vector<80x128xf32>
    %c20_416 = arith.constant 20 : index
    %c0_417 = arith.constant 0 : index
    %337 = vector.load %arg12[%c20_416, %c0_417] : memref<110x64xf32, #tpu.memory_space<vmem>>, vector<80x64xf32>
    %c2_418 = arith.constant 2 : index
    %c0_419 = arith.constant 0 : index
    %c0_420 = arith.constant 0 : index
    %c0_421 = arith.constant 0 : index
    %338 = vector.load %arg6[%c2_418, %c0_419, %c0_420, %c0_421] : memref<3x3x64x128xf32, #tpu.memory_space<vmem>>, vector<1x1x64x128xf32>
    %339 = vector.shape_cast %338 : vector<1x1x64x128xf32> to vector<64x128xf32>
    %cst_422 = arith.constant dense<0.000000e+00> : vector<80x128xf32>
    %340 = tpu.matmul %337, %339, %cst_422 {dimension_numbers = #tpu.dot_dimension_numbers<[1], [0], [0], [1], [0, 0, 1, 1], [], []>} : vector<80x64xf32>, vector<64x128xf32>, vector<80x128xf32> -> vector<80x128xf32>
    %341 = arith.addf %336, %340 : vector<80x128xf32>
    %c21_423 = arith.constant 21 : index
    %c0_424 = arith.constant 0 : index
    %342 = vector.load %arg12[%c21_423, %c0_424] : memref<110x64xf32, #tpu.memory_space<vmem>>, vector<80x64xf32>
    %c2_425 = arith.constant 2 : index
    %c1_426 = arith.constant 1 : index
    %c0_427 = arith.constant 0 : index
    %c0_428 = arith.constant 0 : index
    %343 = vector.load %arg6[%c2_425, %c1_426, %c0_427, %c0_428] : memref<3x3x64x128xf32, #tpu.memory_space<vmem>>, vector<1x1x64x128xf32>
    %344 = vector.shape_cast %343 : vector<1x1x64x128xf32> to vector<64x128xf32>
    %cst_429 = arith.constant dense<0.000000e+00> : vector<80x128xf32>
    %345 = tpu.matmul %342, %344, %cst_429 {dimension_numbers = #tpu.dot_dimension_numbers<[1], [0], [0], [1], [0, 0, 1, 1], [], []>} : vector<80x64xf32>, vector<64x128xf32>, vector<80x128xf32> -> vector<80x128xf32>
    %346 = arith.addf %341, %345 : vector<80x128xf32>
    %c22_430 = arith.constant 22 : index
    %c0_431 = arith.constant 0 : index
    %347 = vector.load %arg12[%c22_430, %c0_431] : memref<110x64xf32, #tpu.memory_space<vmem>>, vector<80x64xf32>
    %c2_432 = arith.constant 2 : index
    %c2_433 = arith.constant 2 : index
    %c0_434 = arith.constant 0 : index
    %c0_435 = arith.constant 0 : index
    %348 = vector.load %arg6[%c2_432, %c2_433, %c0_434, %c0_435] : memref<3x3x64x128xf32, #tpu.memory_space<vmem>>, vector<1x1x64x128xf32>
    %349 = vector.shape_cast %348 : vector<1x1x64x128xf32> to vector<64x128xf32>
    %cst_436 = arith.constant dense<0.000000e+00> : vector<80x128xf32>
    %350 = tpu.matmul %347, %349, %cst_436 {dimension_numbers = #tpu.dot_dimension_numbers<[1], [0], [0], [1], [0, 0, 1, 1], [], []>} : vector<80x64xf32>, vector<64x128xf32>, vector<80x128xf32> -> vector<80x128xf32>
    %351 = arith.addf %346, %350 : vector<80x128xf32>
    %c0_437 = arith.constant 0 : index
    %c0_438 = arith.constant 0 : index
    %352 = vector.load %arg7[%c0_437, %c0_438] : memref<1x128xf32, #tpu.memory_space<vmem>>, vector<1x128xf32>
    %353 = vector.broadcast %352 : vector<1x128xf32> to vector<80x128xf32>
    %354 = arith.addf %351, %353 : vector<80x128xf32>
    %cst_439 = arith.constant 0.000000e+00 : f32
    %355 = vector.broadcast %cst_439 : f32 to vector<80x128xf32>
    %356 = arith.maximumf %354, %355 : vector<80x128xf32>
    %c0_440 = arith.constant 0 : index
    %c0_441 = arith.constant 0 : index
    %c0_442 = arith.constant 0 : index
    %357 = vector.load %arg8[%c0_440, %c0_441, %c0_442] : memref<1x80x128xf32, #tpu.memory_space<vmem>>, vector<1x80x128xf32>
    %358 = vector.shape_cast %357 : vector<1x80x128xf32> to vector<80x128xf32>
    %359 = vector.shape_cast %356 : vector<80x128xf32> to vector<1x80x128xf32>
    tpu.vector_store %arg8[%c0_440, %c0_441, %c0_442], %359 {strides = array<i32>} : memref<1x80x128xf32, #tpu.memory_space<vmem>>, vector<1x80x128xf32>,
    return
  }
  func.func @transform_0(%arg0: i32) -> (i32, i32, i32, i32) {
    %c0_i32 = arith.constant 0 : i32
    %c0_i32_0 = arith.constant 0 : i32
    %c0_i32_1 = arith.constant 0 : i32
    %c0_i32_2 = arith.constant 0 : i32
    return %arg0, %c0_i32, %c0_i32_0, %c0_i32_1 : i32, i32, i32, i32
  }
  func.func @transform_1(%arg0: i32) -> (i32, i32, i32, i32) {
    %c0_i32 = arith.constant 0 : i32
    %c0_i32_0 = arith.constant 0 : i32
    %c0_i32_1 = arith.constant 0 : i32
    %c0_i32_2 = arith.constant 0 : i32
    %c0_i32_3 = arith.constant 0 : i32
    return %c0_i32, %c0_i32_0, %c0_i32_1, %c0_i32_2 : i32, i32, i32, i32
  }
  func.func @transform_2(%arg0: i32) -> (i32, i32) {
    %c0_i32 = arith.constant 0 : i32
    %c0_i32_0 = arith.constant 0 : i32
    %c0_i32_1 = arith.constant 0 : i32
    return %c0_i32, %c0_i32_0 : i32, i32
  }
  func.func @transform_3(%arg0: i32) -> (i32, i32, i32, i32) {
    %c0_i32 = arith.constant 0 : i32
    %c0_i32_0 = arith.constant 0 : i32
    %c0_i32_1 = arith.constant 0 : i32
    %c0_i32_2 = arith.constant 0 : i32
    %c0_i32_3 = arith.constant 0 : i32
    return %c0_i32, %c0_i32_0, %c0_i32_1, %c0_i32_2 : i32, i32, i32, i32
  }
  func.func @transform_4(%arg0: i32) -> (i32, i32) {
    %c0_i32 = arith.constant 0 : i32
    %c0_i32_0 = arith.constant 0 : i32
    %c0_i32_1 = arith.constant 0 : i32
    return %c0_i32, %c0_i32_0 : i32, i32
  }
  func.func @transform_5(%arg0: i32) -> (i32, i32, i32, i32) {
    %c0_i32 = arith.constant 0 : i32
    %c0_i32_0 = arith.constant 0 : i32
    %c0_i32_1 = arith.constant 0 : i32
    %c0_i32_2 = arith.constant 0 : i32
    %c0_i32_3 = arith.constant 0 : i32
    return %c0_i32, %c0_i32_0, %c0_i32_1, %c0_i32_2 : i32, i32, i32, i32
  }
  func.func @transform_6(%arg0: i32) -> (i32, i32) {
    %c0_i32 = arith.constant 0 : i32
    %c0_i32_0 = arith.constant 0 : i32
    %c0_i32_1 = arith.constant 0 : i32
    return %c0_i32, %c0_i32_0 : i32, i32
  }
  func.func @transform_7(%arg0: i32) -> (i32, i32, i32) {
    %c0_i32 = arith.constant 0 : i32
    %c0_i32_0 = arith.constant 0 : i32
    %c0_i32_1 = arith.constant 0 : i32
    return %arg0, %c0_i32, %c0_i32_0 : i32, i32, i32
  }
}

</mosaic_0001>

<bundles_post_ra>
// kernel: encoder2_forward.1
= control target key start
LH: loop header
LB: loop body
LE: loop exit
PB: predicated region body
PF: predicated region fallthrough
CT: control target
= control target key end

     0   :  { %12 = vsyncpa [#allocation7], 0  ;;  %s8777_s24 = smov 0   ;;  %s10430_s0 = inlined_call_operand.vmem [shape: f32[2,16,16,3], index: 0, kind: input, shape index: {}]   ;;  %s10431_s1 = inlined_call_operand.vmem [shape: f32[3,3,3,64], index: 1, kind: input, shape index: {}]   ;;  %s10432_s2 = inlined_call_operand.vmem [shape: f32[1,64], index: 2, kind: input, shape index: {}]   ;;  %s10433_s3 = inlined_call_operand.vmem [shape: f32[3,3,64,64], index: 3, kind: input, shape index: {}]   ;;  %s10434_s4 = inlined_call_operand.vmem [shape: f32[1,64], index: 4, kind: input, shape index: {}]   ;;  %s10435_s5 = inlined_call_operand.hbm [shape: f32[3,3,64,128], index: 5, kind: input, shape index: {}]   ;;  %s10436_s6 = inlined_call_operand.vmem [shape: f32[1,128], index: 6, kind: input, shape index: {}]   ;;  %s10437_s7 = inlined_call_operand.vmem [shape: f32[2,80,128], index: 7, kind: output, shape index: {}]  }
   0x1 LB: > { %s8783_s25 = sadd.s32 4294967295, %s8717_s24   ;;  %p6350_p0 = scmp.ge.s32.totalorder %s8717_s24, 1  ;;  %s8717_s24 = sphi %s8777_s24, %s18_s24  }
   0x2   : > { %p201_p1 = scmp.lt.s32.totalorder %s8717_s24, 3  ;;  %s8727_s26 = smov [#allocation6]  }
   0x3   : > { %s225_s27 = sshll.u32 %s8727_s26, 4  ;;  %p10438_p3 = scmp.eq.s32.totalorder %s8783_s25, 0  ;;  %s226_s27 = int_to_ptr.vmem [resolvable:$true] %s225_s27 }
   0x4   : > { %p8787_p2 = pnand %p6350_p0, %p201_p1  ;;  %s8671_s9 = scalar_lea.hbm %s10435_s5, 9216 }
   0x5   : > { %p8672_p6 = scmp.ne.s32.totalorder %s10435_s5, %s8671_s9  ;;  %p8678_p10 = scmp.lt.u32.totalorder %s8671_s9, %s10435_s5 }
   0x6   : > { %s10440_s28 = scalar_select %p8787_p2, 1, 0 }
   0x7   : > { %p8631_p4 = pneg %p8787_p2 }
   0x9   : > { %p8796_p5 = pnand %p10438_p3, %p8631_p4 }
   0xb   : > { %p8673_p7 = pneg %p8796_p5 }
   0xd   : > { %p8674_p8 = pnand %p8673_p7, %p8672_p6 }
   0xf   : > { %p8675_p9 = pneg %p8674_p8 }
  0x11   : > { %p8680_p11 = pnand %p8678_p10, %p8675_p9 }
  0x13   : > { %8683 = shalt.err (!%p8680_p11)
}
  0x14   : > { %s8684_s14 = scalar_lea.vmem %s226_s27, 9216  ;;  %p8692_p1 = scmp.lt.s32.totalorder %s226_s27, %s226_s27 }
  0x15   : > { %p8685_p12 = scmp.ne.s32.totalorder %s226_s27, %s8684_s14  ;;  %p8693_p4 = scmp.lt.s32.totalorder %s8684_s14, %s8684_s14 }
  0x17   : > { %p8687_p13 = pnand %p8685_p12, %p8673_p7  ;;  %p8694_p3 = por %p8693_p4, %p8692_p1 }
  0x19   : > { %p8688_p0 = pneg %p8687_p13 }
  0x1b   : > { %p8695_p2 = pnand %p8694_p3, %p8688_p0 }
  0x1d   : > { %8698 = shalt.err (!%p8695_p2)
}
  0x1e   : > { %s8728_s15 = smov 128   ;;  %s8729_s16 = smov 8  }
  0x1f   : > { %8634 = dma.hbm_to_vmem [thread:$0]  (!%p8796_p5), %s10435_s5, 9216, %s226_s27, [#allocation7], %s8728_s15, %s8728_s15, %s8729_s16  }
  0x20   : > { %p10442_p6 = scmp.ne.s32.totalorder %s10440_s28, 0 }
  0x21   : > { %p10443_p8 = scmp.eq.s32.totalorder (!%p10442_p6), %s8783_s25, 0 }
  0x22   : > { %252 = sbr.rel (%p10442_p6) target bundleno = 1317 (0x525), region = 48 }
  0x29   : > { %8712 = dma.done.wait (%p10443_p8), [#allocation7], 9216   ;;  %p10444_p7 = pmov %p10443_p8 }
  0x2a   : > { %p284_p2 = scmp.lt.s32.totalorder %s8783_s25, 1  ;;  %vm444_vm0 = vcmask 17408   ;;  %vm296_vm1 = vcmask 23552   ;;  %v8730_v0 = vmov 0.0   ;;  %vm375_vm2 = vcmask 16384  }
  0x2b   : > { %8714 = vsyncadd (%p10444_p7), [#allocation7], 4294958080  ;;  %452 = vst.msk [vmem:[#allocation2 + $0x144] sm:$0xff] %vm296_vm1, %v8730_v0 }
  0x2c   : > { %s10446_s25 = smov (!%p284_p2, %s8783_s25), 1  ;;  %453 = vst.msk [vmem:[#allocation2 + $0x14c] sm:$0xff] %vm296_vm1, %v8730_v0 }
  0x2d   : > { %454 = vst.msk [vmem:[#allocation2 + $0x154] sm:$0x3] %vm444_vm0, %v8730_v0  ;;  %s6943_s19 = sshll.u32 %s10446_s25, 8  ;;  %s8626_s20 = smul.u32 80, %s10446_s25 }
  0x2e   : > { %s8833_s23 = scalar_lea.vmem %s10430_s0, %s6943_s19  ;;  %s8942_s25 = smov 0  }
  0x2f   : > { %s8838_s28 = scalar_lea.vmem %s10437_s7, %s8626_s20  ;;  %v6358_v1 = vld [vmem:[%s8833_s23 + $0x10] sm:$0xff]  ;;  %v6359_v2 = vld [vmem:[%s8833_s23 + $0x18] sm:$0xff]  ;;  %v6384_v3 = vld [vmem:[%s8833_s23 + $0xe0] sm:$0xff] }
  0x30   : > { %302 = vst.msk [vmem:[#allocation2 + $0x25] sm:$0xff] %vm296_vm1, %v6358_v1  ;;  %303 = vst.msk [vmem:[#allocation2 + $0x2d] sm:$0xff] %vm296_vm1, %v6359_v2  ;;  %v6385_v4 = vld [vmem:[%s8833_s23 + $0xe8] sm:$0xff]  ;;  %v294_v5 = vld [vmem:[%s8833_s23] sm:$0xff] }
  0x31   : > { %367 = vst.msk [vmem:[#allocation2 + $0x10f] sm:$0xff] %vm296_vm1, %v6384_v3  ;;  %v295_v6 = vld [vmem:[%s8833_s23 + $0x8] sm:$0xff]  ;;  %368 = vst.msk [vmem:[#allocation2 + $0x117] sm:$0xff] %vm296_vm1, %v6385_v4  ;;  %v6360_v7 = vld [vmem:[%s8833_s23 + $0x20] sm:$0xff] }
  0x32   : > { %297 = vst.msk [vmem:[#allocation2 + $0x13] sm:$0xff] %vm296_vm1, %v294_v5  ;;  %298 = vst.msk [vmem:[#allocation2 + $0x1b] sm:$0xff] %vm296_vm1, %v295_v6  ;;  %v6361_v8 = vld [vmem:[%s8833_s23 + $0x28] sm:$0xff]  ;;  %v6362_v9 = vld [vmem:[%s8833_s23 + $0x30] sm:$0xff] }
  0x33   : > { %307 = vst.msk [vmem:[#allocation2 + $0x37] sm:$0xff] %vm296_vm1, %v6360_v7  ;;  %308 = vst.msk [vmem:[#allocation2 + $0x3f] sm:$0xff] %vm296_vm1, %v6361_v8  ;;  %v6363_v10 = vld [vmem:[%s8833_s23 + $0x38] sm:$0xff]  ;;  %v6364_v11 = vld [vmem:[%s8833_s23 + $0x40] sm:$0xff] }
  0x34   : > { %312 = vst.msk [vmem:[#allocation2 + $0x49] sm:$0xff] %vm296_vm1, %v6362_v9  ;;  %v6365_v12 = vld [vmem:[%s8833_s23 + $0x48] sm:$0xff]  ;;  %313 = vst.msk [vmem:[#allocation2 + $0x51] sm:$0xff] %vm296_vm1, %v6363_v10  ;;  %v6366_v13 = vld [vmem:[%s8833_s23 + $0x50] sm:$0xff] }
  0x35   : > { %317 = vst.msk [vmem:[#allocation2 + $0x5b] sm:$0xff] %vm296_vm1, %v6364_v11  ;;  %318 = vst.msk [vmem:[#allocation2 + $0x63] sm:$0xff] %vm296_vm1, %v6365_v12  ;;  %v6367_v14 = vld [vmem:[%s8833_s23 + $0x58] sm:$0xff]  ;;  %v6368_v15 = vld [vmem:[%s8833_s23 + $0x60] sm:$0xff] }
  0x36   : > { %322 = vst.msk [vmem:[#allocation2 + $0x6d] sm:$0xff] %vm296_vm1, %v6366_v13  ;;  %323 = vst.msk [vmem:[#allocation2 + $0x75] sm:$0xff] %vm296_vm1, %v6367_v14  ;;  %v6369_v16 = vld [vmem:[%s8833_s23 + $0x68] sm:$0xff]  ;;  %v6370_v17 = vld [vmem:[%s8833_s23 + $0x70] sm:$0xff] }
  0x37   : > { %327 = vst.msk [vmem:[#allocation2 + $0x7f] sm:$0xff] %vm296_vm1, %v6368_v15  ;;  %v6371_v18 = vld [vmem:[%s8833_s23 + $0x78] sm:$0xff]  ;;  %328 = vst.msk [vmem:[#allocation2 + $0x87] sm:$0xff] %vm296_vm1, %v6369_v16  ;;  %v6372_v19 = vld [vmem:[%s8833_s23 + $0x80] sm:$0xff] }
  0x38   : > { %332 = vst.msk [vmem:[#allocation2 + $0x91] sm:$0xff] %vm296_vm1, %v6370_v17  ;;  %333 = vst.msk [vmem:[#allocation2 + $0x99] sm:$0xff] %vm296_vm1, %v6371_v18  ;;  %v6373_v20 = vld [vmem:[%s8833_s23 + $0x88] sm:$0xff]  ;;  %v6374_v21 = vld [vmem:[%s8833_s23 + $0x90] sm:$0xff] }
  0x39   : > { %337 = vst.msk [vmem:[#allocation2 + $0xa3] sm:$0xff] %vm296_vm1, %v6372_v19  ;;  %338 = vst.msk [vmem:[#allocation2 + $0xab] sm:$0xff] %vm296_vm1, %v6373_v20  ;;  %v6375_v22 = vld [vmem:[%s8833_s23 + $0x98] sm:$0xff]  ;;  %v6376_v23 = vld [vmem:[%s8833_s23 + $0xa0] sm:$0xff] }
  0x3a   : > { %342 = vst.msk [vmem:[#allocation2 + $0xb5] sm:$0xff] %vm296_vm1, %v6374_v21  ;;  %v6377_v24 = vld [vmem:[%s8833_s23 + $0xa8] sm:$0xff]  ;;  %343 = vst.msk [vmem:[#allocation2 + $0xbd] sm:$0xff] %vm296_vm1, %v6375_v22  ;;  %v6378_v25 = vld [vmem:[%s8833_s23 + $0xb0] sm:$0xff] }
  0x3b   : > { %347 = vst.msk [vmem:[#allocation2 + $0xc7] sm:$0xff] %vm296_vm1, %v6376_v23  ;;  %348 = vst.msk [vmem:[#allocation2 + $0xcf] sm:$0xff] %vm296_vm1, %v6377_v24  ;;  %v6379_v26 = vld [vmem:[%s8833_s23 + $0xb8] sm:$0xff]  ;;  %v6380_v27 = vld [vmem:[%s8833_s23 + $0xc0] sm:$0xff] }
  0x3c   : > { %352 = vst.msk [vmem:[#allocation2 + $0xd9] sm:$0xff] %vm296_vm1, %v6378_v25  ;;  %353 = vst.msk [vmem:[#allocation2 + $0xe1] sm:$0xff] %vm296_vm1, %v6379_v26  ;;  %v6381_v28 = vld [vmem:[%s8833_s23 + $0xc8] sm:$0xff]  ;;  %v6382_v29 = vld [vmem:[%s8833_s23 + $0xd0] sm:$0xff] }
  0x3d   : > { %357 = vst.msk [vmem:[#allocation2 + $0xeb] sm:$0xff] %vm296_vm1, %v6380_v27  ;;  %v6383_v30 = vld [vmem:[%s8833_s23 + $0xd8] sm:$0xff]  ;;  %358 = vst.msk [vmem:[#allocation2 + $0xf3] sm:$0xff] %vm296_vm1, %v6381_v28  ;;  %v6386_v31 = vld [vmem:[%s8833_s23 + $0xf0] sm:$0xff] }
  0x3e   : > { %362 = vst.msk [vmem:[#allocation2 + $0xfd] sm:$0xff] %vm296_vm1, %v6382_v29  ;;  %363 = vst.msk [vmem:[#allocation2 + $0x105] sm:$0xff] %vm296_vm1, %v6383_v30  ;;  %v6387_v32 = vld [vmem:[%s8833_s23 + $0xf8] sm:$0xff]  ;;  %v379_v33 = vld [vmem:[#allocation2 + $0x26] sm:$0x1] }
  0x3f   : > { %372 = vst.msk [vmem:[#allocation2 + $0x121] sm:$0xff] %vm296_vm1, %v6386_v31  ;;  %373 = vst.msk [vmem:[#allocation2 + $0x129] sm:$0xff] %vm296_vm1, %v6387_v32  ;;  %v381_v34 = vld [vmem:[#allocation2 + $0x33] sm:$0x1]  ;;  %v431_v35 = vld [vmem:[#allocation2 + $0x110] sm:$0x1] }
  0x40   : > { %380 = vst.msk [vmem:[#allocation2 + $0x24] sm:$0x1] %vm375_vm2, %v379_v33  ;;  %v433_v36 = vld [vmem:[#allocation2 + $0x11d] sm:$0x1]  ;;  %382 = vst.msk [vmem:[#allocation2 + $0x35] sm:$0x1] %vm375_vm2, %v381_v34 }
  0x41   : > { %432 = vst.msk [vmem:[#allocation2 + $0x10e] sm:$0x1] %vm375_vm2, %v431_v35  ;;  %434 = vst.msk [vmem:[#allocation2 + $0x11f] sm:$0x1] %vm375_vm2, %v433_v36  ;;  %v440_v37 = vld [vmem:[#allocation2 + $0x2c] sm:$0xff]  ;;  %v447_v38 = vld [vmem:[#allocation2 + $0x116] sm:$0xff] }
  0x42   : > { %v374_v39 = vld [vmem:[#allocation2 + $0x14] sm:$0x1]  ;;  %443 = vst.msk [vmem:[#allocation2 + $0x8] sm:$0xff] %vm296_vm1, %v440_v37  ;;  %450 = vst.msk [vmem:[#allocation2 + $0x13a] sm:$0xff] %vm296_vm1, %v447_v38  ;;  %v377_v40 = vld [vmem:[#allocation2 + $0x21] sm:$0x1] }
  0x43   : > { %376 = vst.msk [vmem:[#allocation2 + $0x12] sm:$0x1] %vm375_vm2, %v374_v39  ;;  %v383_v41 = vld [vmem:[#allocation2 + $0x38] sm:$0x1]  ;;  %v385_v42 = vld [vmem:[#allocation2 + $0x45] sm:$0x1] }
  0x44   : > { %378 = vst.msk [vmem:[#allocation2 + $0x23] sm:$0x1] %vm375_vm2, %v377_v40  ;;  %384 = vst.msk [vmem:[#allocation2 + $0x36] sm:$0x1] %vm375_vm2, %v383_v41  ;;  %v387_v43 = vld [vmem:[#allocation2 + $0x4a] sm:$0x1] }
  0x45   : > { %386 = vst.msk [vmem:[#allocation2 + $0x47] sm:$0x1] %vm375_vm2, %v385_v42  ;;  %v389_v44 = vld [vmem:[#allocation2 + $0x57] sm:$0x1]  ;;  %v391_v45 = vld [vmem:[#allocation2 + $0x5c] sm:$0x1] }
  0x46   : > { %388 = vst.msk [vmem:[#allocation2 + $0x48] sm:$0x1] %vm375_vm2, %v387_v43  ;;  %390 = vst.msk [vmem:[#allocation2 + $0x59] sm:$0x1] %vm375_vm2, %v389_v44  ;;  %v393_v46 = vld [vmem:[#allocation2 + $0x69] sm:$0x1] }
  0x47   : > { %392 = vst.msk [vmem:[#allocation2 + $0x5a] sm:$0x1] %vm375_vm2, %v391_v45  ;;  %v395_v47 = vld [vmem:[#allocation2 + $0x6e] sm:$0x1]  ;;  %v397_v48 = vld [vmem:[#allocation2 + $0x7b] sm:$0x1] }
  0x48   : > { %394 = vst.msk [vmem:[#allocation2 + $0x6b] sm:$0x1] %vm375_vm2, %v393_v46  ;;  %396 = vst.msk [vmem:[#allocation2 + $0x6c] sm:$0x1] %vm375_vm2, %v395_v47  ;;  %v399_v49 = vld [vmem:[#allocation2 + $0x80] sm:$0x1] }
  0x49   : > { %398 = vst.msk [vmem:[#allocation2 + $0x7d] sm:$0x1] %vm375_vm2, %v397_v48  ;;  %v401_v50 = vld [vmem:[#allocation2 + $0x8d] sm:$0x1]  ;;  %v403_v51 = vld [vmem:[#allocation2 + $0x92] sm:$0x1] }
  0x4a   : > { %400 = vst.msk [vmem:[#allocation2 + $0x7e] sm:$0x1] %vm375_vm2, %v399_v49  ;;  %402 = vst.msk [vmem:[#allocation2 + $0x8f] sm:$0x1] %vm375_vm2, %v401_v50  ;;  %v405_v52 = vld [vmem:[#allocation2 + $0x9f] sm:$0x1] }
  0x4b   : > { %404 = vst.msk [vmem:[#allocation2 + $0x90] sm:$0x1] %vm375_vm2, %v403_v51  ;;  %v407_v53 = vld [vmem:[#allocation2 + $0xa4] sm:$0x1]  ;;  %v409_v54 = vld [vmem:[#allocation2 + $0xb1] sm:$0x1] }
  0x4c   : > { %406 = vst.msk [vmem:[#allocation2 + $0xa1] sm:$0x1] %vm375_vm2, %v405_v52  ;;  %408 = vst.msk [vmem:[#allocation2 + $0xa2] sm:$0x1] %vm375_vm2, %v407_v53  ;;  %v411_v55 = vld [vmem:[#allocation2 + $0xb6] sm:$0x1] }
  0x4d   : > { %410 = vst.msk [vmem:[#allocation2 + $0xb3] sm:$0x1] %vm375_vm2, %v409_v54  ;;  %v413_v56 = vld [vmem:[#allocation2 + $0xc3] sm:$0x1]  ;;  %v415_v57 = vld [vmem:[#allocation2 + $0xc8] sm:$0x1] }
  0x4e   : > { %412 = vst.msk [vmem:[#allocation2 + $0xb4] sm:$0x1] %vm375_vm2, %v411_v55  ;;  %414 = vst.msk [vmem:[#allocation2 + $0xc5] sm:$0x1] %vm375_vm2, %v413_v56  ;;  %v417_v58 = vld [vmem:[#allocation2 + $0xd5] sm:$0x1] }
  0x4f   : > { %416 = vst.msk [vmem:[#allocation2 + $0xc6] sm:$0x1] %vm375_vm2, %v415_v57  ;;  %v419_v59 = vld [vmem:[#allocation2 + $0xda] sm:$0x1]  ;;  %v421_v60 = vld [vmem:[#allocation2 + $0xe7] sm:$0x1] }
  0x50   : > { %418 = vst.msk [vmem:[#allocation2 + $0xd7] sm:$0x1] %vm375_vm2, %v417_v58  ;;  %420 = vst.msk [vmem:[#allocation2 + $0xd8] sm:$0x1] %vm375_vm2, %v419_v59  ;;  %v423_v61 = vld [vmem:[#allocation2 + $0xec] sm:$0x1] }
  0x51   : > { %422 = vst.msk [vmem:[#allocation2 + $0xe9] sm:$0x1] %vm375_vm2, %v421_v60  ;;  %v425_v62 = vld [vmem:[#allocation2 + $0xf9] sm:$0x1]  ;;  %v427_v63 = vld [vmem:[#allocation2 + $0xfe] sm:$0x1] }
  0x52   : > { %424 = vst.msk [vmem:[#allocation2 + $0xea] sm:$0x1] %vm375_vm2, %v423_v61  ;;  %426 = vst.msk [vmem:[#allocation2 + $0xfb] sm:$0x1] %vm375_vm2, %v425_v62  ;;  %v429_v1 = vld [vmem:[#allocation2 + $0x10b] sm:$0x1] }
  0x53   : > { %428 = vst.msk [vmem:[#allocation2 + $0xfc] sm:$0x1] %vm375_vm2, %v427_v63  ;;  %v435_v2 = vld [vmem:[#allocation2 + $0x122] sm:$0x1]  ;;  %v437_v3 = vld [vmem:[#allocation2 + $0x12f] sm:$0x1] }
  0x54   : > { %430 = vst.msk [vmem:[#allocation2 + $0x10d] sm:$0x1] %vm375_vm2, %v429_v1  ;;  %436 = vst.msk [vmem:[#allocation2 + $0x120] sm:$0x1] %vm375_vm2, %v435_v2  ;;  %v439_v4 = vld [vmem:[#allocation2 + $0x24] sm:$0xff]  ;;  %v446_v6 = vld [vmem:[#allocation2 + $0x10e] sm:$0xff] }
  0x55   : > { %438 = vst.msk [vmem:[#allocation2 + $0x131] sm:$0x1] %vm375_vm2, %v437_v3  ;;  %v441_v5 = vld [vmem:[#allocation2 + $0x34] sm:$0x3]  ;;  %v448_v7 = vld [vmem:[#allocation2 + $0x11e] sm:$0x3] }
  0x56   : > { %442 = vst.msk [vmem:[#allocation2] sm:$0xff] %vm296_vm1, %v439_v4  ;;  %449 = vst.msk [vmem:[#allocation2 + $0x132] sm:$0xff] %vm296_vm1, %v446_v6 }
  0x57   : > { %445 = vst.msk [vmem:[#allocation2 + $0x10] sm:$0x3] %vm444_vm0, %v441_v5  ;;  %451 = vst.msk [vmem:[#allocation2 + $0x142] sm:$0x3] %vm444_vm0, %v448_v7 }
  0x58 LB: >> { %v6397_v8 = vld [vmem:[%s10431_s1 + $0x4] sm:$0x7]  ;;  %vm513_vm3 = vcmask 1042432   ;;  %v8731_v9 = vmov 0.0   ;;  %s461_s8 = smul.u32 72, %s8721_s25  ;;  %vm8732_vm4 = vmmov 0   ;;  %s8721_s25 = sphi %s8942_s25, %s460_s25  }
  0x59   : >> { %7349 = vmatprep.subr.mxu0 %v8731_v9  ;;  %8528 = vmatprep.subr.mxu1 %v8731_v9  ;;  %v6427_v10 = vld [vmem:[%s10431_s1 + $0x8] sm:$0x7]  ;;  %v472_v11 = vld [vmem:[%s10431_s1] sm:$0x7]  ;;  %v6447_v22 = vld [vmem:[%s10431_s1 + $0xc] sm:$0x7] }
  0x5a   : >> { %7350 = vmatpush3.msk.msra.mxu0 %vm513_vm3, %v6397_v8  ;;  %8529 = vmatpush3.msk.msra.mxu1 %vm513_vm3, %v6397_v8  ;;  %s8969_s13 = scalar_lea.vmem [#allocation2], %s461_s8  ;;  %v6467_v25 = vld [vmem:[%s10431_s1 + $0x10] sm:$0x7]  ;;  %v6487_v41 = vld [vmem:[%s10431_s1 + $0x14] sm:$0x7]  ;;  %vm1927_vm5 = vcmask 523264  }
  0x5b   : >> { %7351 = vmatprep.mubr.msk.f32.mxu0 %vm8732_vm4, %v8731_v9  ;;  %7366 = vmatprep.mubr.msk.f32.mxu1 %vm8732_vm4, %v8731_v9  ;;  %v6507_v43 = vld [vmem:[%s10431_s1 + $0x18] sm:$0x7]  ;;  %v6527_v55 = vld [vmem:[%s10431_s1 + $0x1c] sm:$0x7]  ;;  %v6547_v58 = vld [vmem:[%s10431_s1 + $0x20] sm:$0x7] }
  0x5c   : >> { %7407 = vmatprep.subr.mxu0 %v8731_v9  ;;  %7378 = vmatprep.subr.mxu1 %v8731_v9  ;;  %s9323_s9 = scalar_lea.vmem [#allocation3], %s461_s8  ;;  %s460_s25 = sadd.s32 1, %s8721_s25  }
  0x5d   : >> { %p457_p3 = scmp.ge.s32.totalorder %s460_s25, 4  }
  0x5e   : >> { %v6388_v12 = vld [vmem:[%s8969_s13 + $0x1] sm:$0xff]  ;;  %v6393_v13 = vld [vmem:[%s8969_s13 + $0x29] sm:$0xff]  ;;  %v6394_v15 = vld [vmem:[%s8969_s13 + $0x31] sm:$0xff]  ;;  %vm1938_vm6 = vcmask (%p457_p3), 516096   ;;  %vm2008_vm7 = vcmask (%p457_p3), 517120   ;;  %s9401_s25 = smov (%p457_p3), 0  }
  0x5f   : >> { %7352 = vmatmul.mubr.msk.f32.vlgmr.msra.gmra.mrb[0].mxu0 %vm296_vm1, %v6388_v12  ;;  %7367 = vmatmul.mubr.msk.f32.vlgmr.msra.gmra.mrb[0].mxu1 %vm296_vm1, %v6393_v13  ;;  %v6389_v14 = vld [vmem:[%s8969_s13 + $0x9] sm:$0xff]  ;;  %v6390_v16 = vld [vmem:[%s8969_s13 + $0x11] sm:$0xff]  ;;  %v6395_v17 = vld [vmem:[%s8969_s13 + $0x39] sm:$0xff] }
  0x60   : >> { %7408 = vmatpush3.msk.msra.mxu0 %vm513_vm3, %v6427_v10  ;;  %7379 = vmatpush3.msk.msra.mxu1 %vm513_vm3, %v472_v11  ;;  %v6391_v18 = vld [vmem:[%s8969_s13 + $0x19] sm:$0xff]  ;;  %v6396_v19 = vld [vmem:[%s8969_s13 + $0x41] sm:$0xff]  ;;  %v465_v26 = vld [vmem:[%s8969_s13 + $0x10] sm:$0xff] }
  0x61   : >> { %7354 = vmatprep.mubr.msk.f32.mxu0 %vm8732_vm4, %v8731_v9  ;;  %7369 = vmatprep.mubr.msk.f32.mxu1 %vm8732_vm4, %v8731_v9  ;;  %v6392_v20 = vld [vmem:[%s8969_s13 + $0x21] sm:$0xff]  ;;  %v6419_v27 = vld [vmem:[%s8969_s13 + $0xa] sm:$0xff]  ;;  %v466_v28 = vld [vmem:[%s8969_s13 + $0x18] sm:$0xff] }
  0x62   : >> { %7436 = vmatprep.subr.mxu1 %v8731_v9  ;;  %7465 = vmatprep.subr.mxu0 %v8731_v9  ;;  %v463_v21 = vld [vmem:[%s8969_s13] sm:$0xff]  ;;  %v464_v23 = vld [vmem:[%s8969_s13 + $0x8] sm:$0xff]  ;;  %v6420_v29 = vld [vmem:[%s8969_s13 + $0x12] sm:$0xff] }
  0x63   : >> { %7355 = vmatmul.mubr.msk.f32.gmra.mrb[2].mxu0 %vm296_vm1, %v6389_v14  ;;  %7370 = vmatmul.mubr.msk.f32.gmra.mrb[2].mxu1 %vm296_vm1, %v6394_v15  ;;  %v6418_v24 = vld [vmem:[%s8969_s13 + $0x2] sm:$0xff]  ;;  %v6421_v31 = vld [vmem:[%s8969_s13 + $0x1a] sm:$0xff]  ;;  %v469_v34 = vld [vmem:[%s8969_s13 + $0x30] sm:$0xff] }
  0x64   : >> { %7357 = vmatprep.mubr.msk.f32.mxu0 %vm8732_vm4, %v8731_v9  ;;  %7372 = vmatprep.mubr.msk.f32.mxu1 %vm8732_vm4, %v8731_v9  ;;  %v467_v30 = vld [vmem:[%s8969_s13 + $0x20] sm:$0xff]  ;;  %v468_v32 = vld [vmem:[%s8969_s13 + $0x28] sm:$0xff]  ;;  %v470_v36 = vld [vmem:[%s8969_s13 + $0x38] sm:$0xff] }
  0x65   : >> { %v6422_v33 = vld [vmem:[%s8969_s13 + $0x22] sm:$0xff]  ;;  %v6423_v35 = vld [vmem:[%s8969_s13 + $0x2a] sm:$0xff]  ;;  %v6424_v37 = vld [vmem:[%s8969_s13 + $0x32] sm:$0xff] }
  0x66   : >> { %v471_v38 = vld [vmem:[%s8969_s13 + $0x40] sm:$0xff]  ;;  %v6458_v42 = vld [vmem:[%s8969_s13 + $0x13] sm:$0xff]  ;;  %v6461_v46 = vld [vmem:[%s8969_s13 + $0x2b] sm:$0xff] }
  0x67   : >> { %7358 = vmatmul.mubr.msk.f32.gmra.mrb[4].mxu0 %vm296_vm1, %v6390_v16  ;;  %7373 = vmatmul.mubr.msk.f32.gmra.mrb[4].mxu1 %vm296_vm1, %v6395_v17  ;;  %v6425_v39 = vld [vmem:[%s8969_s13 + $0x3a] sm:$0xff]  ;;  %v6426_v40 = vld [vmem:[%s8969_s13 + $0x42] sm:$0xff]  ;;  %v6445_v49 = vld [vmem:[%s8969_s13 + $0x4a] sm:$0xff] }
  0x68   : >> { %7360 = vmatprep.mubr.msk.f32.mxu0 %vm8732_vm4, %v8731_v9  ;;  %7375 = vmatprep.mubr.msk.f32.mxu1 %vm8732_vm4, %v8731_v9  ;;  %v6459_v44 = vld [vmem:[%s8969_s13 + $0x1b] sm:$0xff]  ;;  %v6460_v45 = vld [vmem:[%s8969_s13 + $0x23] sm:$0xff]  ;;  %v6462_v47 = vld [vmem:[%s8969_s13 + $0x33] sm:$0xff] }
  0x69   : >> { %v6463_v48 = vld [vmem:[%s8969_s13 + $0x3b] sm:$0xff]  ;;  %v6464_v50 = vld [vmem:[%s8969_s13 + $0x43] sm:$0xff]  ;;  %v6446_v51 = vld [vmem:[%s8969_s13 + $0x52] sm:$0xff] }
  0x6a   : >> { %v6465_v52 = vld [vmem:[%s8969_s13 + $0x4b] sm:$0xff]  ;;  %v6466_v53 = vld [vmem:[%s8969_s13 + $0x53] sm:$0xff]  ;;  %v6479_v56 = vld [vmem:[%s8969_s13 + $0x1c] sm:$0xff] }
  0x6b   : >> { %7361 = vmatmul.mubr.msk.f32.gmra.mrb[6].mxu0 %vm296_vm1, %v6391_v18  ;;  %7376 = vmatmul.mubr.msk.f32.gmra.mrb[6].mxu1 %vm296_vm1, %v6396_v19  ;;  %v6478_v54 = vld [vmem:[%s8969_s13 + $0x14] sm:$0xff]  ;;  %v6498_v57 = vld [vmem:[%s8969_s13 + $0x24] sm:$0xff]  ;;  %v6499_v59 = vld [vmem:[%s8969_s13 + $0x2c] sm:$0xff] }
  0x6c   : >> { %7363 = vmatprep.mubr.msk.f32.mxu0 %vm8732_vm4, %v8731_v9  ;;  %7380 = vmatprep.mubr.msk.f32.mxu1 %vm8732_vm4, %v8731_v9  ;;  %v6500_v60 = vld [vmem:[%s8969_s13 + $0x34] sm:$0xff]  ;;  %v6501_v61 = vld [vmem:[%s8969_s13 + $0x3c] sm:$0xff]  ;;  %v6502_v62 = vld [vmem:[%s8969_s13 + $0x44] sm:$0xff] }
  0x6d   : >> { %v6503_v63 = vld [vmem:[%s8969_s13 + $0x4c] sm:$0xff]  ;;  %v6504_v1 = vld [vmem:[%s8969_s13 + $0x54] sm:$0xff]  ;;  %v6505_v2 = vld [vmem:[%s8969_s13 + $0x5c] sm:$0xff] }
  0x6e   : >> { %v6506_v3 = vld [vmem:[%s8969_s13 + $0x64] sm:$0xff]  ;;  %v6519_v5 = vld [vmem:[%s8969_s13 + $0x2d] sm:$0xff]  ;;  %v6520_v7 = vld [vmem:[%s8969_s13 + $0x35] sm:$0xff] }
  0x6f   : >> { %7364 = vmatmul.mubr.msk.f32.gmra.mrb[8].mxu0 %vm296_vm1, %v6392_v20  ;;  %7381 = vmatmul.mubr.msk.f32.vlgmr.msra.gmra.mrb[8].mxu1 %vm296_vm1, %v463_v21  ;;  %v6518_v4 = vld [vmem:[%s8969_s13 + $0x25] sm:$0xff]  ;;  %v6539_v8 = vld [vmem:[%s8969_s13 + $0x2e] sm:$0xff]  ;;  %v6521_v10 = vld [vmem:[%s8969_s13 + $0x3d] sm:$0xff] }
  0x70   : >> { %7437 = vmatpush3.msk.msra.mxu1 %vm513_vm3, %v6447_v22  ;;  %7383 = vmatprep.mubr.msk.f32.mxu1 %vm8732_vm4, %v8731_v9  ;;  %v6538_v6 = vld [vmem:[%s8969_s13 + $0x26] sm:$0xff]  ;;  %v6540_v11 = vld [vmem:[%s8969_s13 + $0x36] sm:$0xff]  ;;  %v6541_v13 = vld [vmem:[%s8969_s13 + $0x3e] sm:$0xff] }
  0x71   : >> { %7409 = vmatprep.mubr.msk.f32.mxu0 %vm8732_vm4, %v8731_v9  ;;  %7494 = vmatprep.subr.mxu1 %v8731_v9  ;;  %v6522_v12 = vld [vmem:[%s8969_s13 + $0x45] sm:$0xff]  ;;  %v6523_v14 = vld [vmem:[%s8969_s13 + $0x4d] sm:$0xff]  ;;  %v6524_v16 = vld [vmem:[%s8969_s13 + $0x55] sm:$0xff] }
  0x72   : >> { %v6542_v15 = vld [vmem:[%s8969_s13 + $0x46] sm:$0xff]  ;;  %v6543_v17 = vld [vmem:[%s8969_s13 + $0x4e] sm:$0xff]  ;;  %v6525_v18 = vld [vmem:[%s8969_s13 + $0x5d] sm:$0xff] }
  0x73   : >> { %7384 = vmatmul.mubr.msk.f32.gmra.mrb[10].mxu1 %vm296_vm1, %v464_v23  ;;  %7410 = vmatmul.mubr.msk.f32.vlgmr.msra.gmra.mrb[10].mxu0 %vm296_vm1, %v6418_v24  ;;  %v6544_v19 = vld [vmem:[%s8969_s13 + $0x56] sm:$0xff]  ;;  %v6526_v20 = vld [vmem:[%s8969_s13 + $0x65] sm:$0xff] }
  0x74   : >> { %7466 = vmatpush3.msk.msra.mxu0 %vm513_vm3, %v6467_v25  ;;  %7386 = vmatprep.mubr.msk.f32.mxu1 %vm8732_vm4, %v8731_v9  ;;  %v6545_v21 = vld [vmem:[%s8969_s13 + $0x5e] sm:$0xff]  ;;  %v6546_v22 = vld [vmem:[%s8969_s13 + $0x66] sm:$0xff] }
  0x75   : >> { %7412 = vmatprep.mubr.msk.f32.mxu0 %vm8732_vm4, %v8731_v9  ;;  %7523 = vmatprep.subr.mxu0 %v8731_v9 }
  0x77   : >> { %7387 = vmatmul.mubr.msk.f32.gmra.mrb[12].mxu1 %vm296_vm1, %v465_v26  ;;  %7413 = vmatmul.mubr.msk.f32.gmra.mrb[12].mxu0 %vm296_vm1, %v6419_v27 }
  0x78   : >> { %7389 = vmatprep.mubr.msk.f32.mxu1 %vm8732_vm4, %v8731_v9  ;;  %7415 = vmatprep.mubr.msk.f32.mxu0 %vm8732_vm4, %v8731_v9 }
  0x7b   : >> { %7390 = vmatmul.mubr.msk.f32.gmra.mrb[14].mxu1 %vm296_vm1, %v466_v28  ;;  %7416 = vmatmul.mubr.msk.f32.gmra.mrb[14].mxu0 %vm296_vm1, %v6420_v29 }
  0x7c   : >> { %7392 = vmatprep.mubr.msk.f32.mxu1 %vm8732_vm4, %v8731_v9  ;;  %7418 = vmatprep.mubr.msk.f32.mxu0 %vm8732_vm4, %v8731_v9 }
  0x7f   : >> { %7393 = vmatmul.mubr.msk.f32.gmra.mrb[16].mxu1 %vm296_vm1, %v467_v30  ;;  %7419 = vmatmul.mubr.msk.f32.gmra.mrb[16].mxu0 %vm296_vm1, %v6421_v31 }
  0x80   : >> { %7395 = vmatprep.mubr.msk.f32.mxu1 %vm8732_vm4, %v8731_v9  ;;  %7421 = vmatprep.mubr.msk.f32.mxu0 %vm8732_vm4, %v8731_v9 }
  0x83   : >> { %7396 = vmatmul.mubr.msk.f32.gmra.mrb[18].mxu1 %vm296_vm1, %v468_v32  ;;  %7422 = vmatmul.mubr.msk.f32.gmra.mrb[18].mxu0 %vm296_vm1, %v6422_v33 }
  0x84   : >> { %7398 = vmatprep.mubr.msk.f32.mxu1 %vm8732_vm4, %v8731_v9  ;;  %7424 = vmatprep.mubr.msk.f32.mxu0 %vm8732_vm4, %v8731_v9 }
  0x87   : >> { %7399 = vmatmul.mubr.msk.f32.gmra.mrb[20].mxu1 %vm296_vm1, %v469_v34  ;;  %7425 = vmatmul.mubr.msk.f32.gmra.mrb[20].mxu0 %vm296_vm1, %v6423_v35 }
  0x88   : >> { %7401 = vmatprep.mubr.msk.f32.mxu1 %vm8732_vm4, %v8731_v9  ;;  %7427 = vmatprep.mubr.msk.f32.mxu0 %vm8732_vm4, %v8731_v9 }
  0x8b   : >> { %7402 = vmatmul.mubr.msk.f32.gmra.mrb[22].mxu1 %vm296_vm1, %v470_v36  ;;  %7428 = vmatmul.mubr.msk.f32.gmra.mrb[22].mxu0 %vm296_vm1, %v6424_v37 }
  0x8c   : >> { %7404 = vmatprep.mubr.msk.f32.mxu1 %vm8732_vm4, %v8731_v9  ;;  %7430 = vmatprep.mubr.msk.f32.mxu0 %vm8732_vm4, %v8731_v9 }
  0x8f   : >> { %7405 = vmatmul.mubr.msk.f32.gmra.mrb[24].mxu1 %vm296_vm1, %v471_v38  ;;  %7431 = vmatmul.mubr.msk.f32.gmra.mrb[24].mxu0 %vm296_vm1, %v6425_v39 }
  0x90   : >> { %7433 = vmatprep.mubr.msk.f32.mxu0 %vm8732_vm4, %v8731_v9  ;;  %7438 = vmatprep.mubr.msk.f32.mxu1 %vm8732_vm4, %v8731_v9 }
  0x93   : >> { %7434 = vmatmul.mubr.msk.f32.gmra.mrb[26].mxu0 %vm296_vm1, %v6426_v40  ;;  %7439 = vmatmul.mubr.msk.f32.vlgmr.msra.gmra.mrb[26].mxu1 %vm296_vm1, %v6420_v29 }
  0x94   : >> { %7495 = vmatpush3.msk.msra.mxu1 %vm513_vm3, %v6487_v41  ;;  %7441 = vmatprep.mubr.msk.f32.mxu1 %vm8732_vm4, %v8731_v9 }
  0x95   : >> { %7467 = vmatprep.mubr.msk.f32.mxu0 %vm8732_vm4, %v8731_v9  ;;  %7552 = vmatprep.subr.mxu1 %v8731_v9 }
  0x97   : >> { %7442 = vmatmul.mubr.msk.f32.gmra.mrb[28].mxu1 %vm296_vm1, %v6421_v31  ;;  %7468 = vmatmul.mubr.msk.f32.vlgmr.msra.gmra.mrb[28].mxu0 %vm296_vm1, %v6458_v42 }
  0x98   : >> { %7524 = vmatpush3.msk.msra.mxu0 %vm513_vm3, %v6507_v43  ;;  %7444 = vmatprep.mubr.msk.f32.mxu1 %vm8732_vm4, %v8731_v9 }
  0x99   : >> { %7470 = vmatprep.mubr.msk.f32.mxu0 %vm8732_vm4, %v8731_v9  ;;  %7581 = vmatprep.subr.mxu0 %v8731_v9 }
  0x9b   : >> { %7445 = vmatmul.mubr.msk.f32.gmra.mrb[30].mxu1 %vm296_vm1, %v6422_v33  ;;  %7471 = vmatmul.mubr.msk.f32.gmra.mrb[30].mxu0 %vm296_vm1, %v6459_v44 }
  0x9c   : >> { %7447 = vmatprep.mubr.msk.f32.mxu1 %vm8732_vm4, %v8731_v9  ;;  %7473 = vmatprep.mubr.msk.f32.mxu0 %vm8732_vm4, %v8731_v9 }
  0x9f   : >> { %7448 = vmatmul.mubr.msk.f32.gmra.mrb[32].mxu1 %vm296_vm1, %v6423_v35  ;;  %7474 = vmatmul.mubr.msk.f32.gmra.mrb[32].mxu0 %vm296_vm1, %v6460_v45 }
  0xa0   : >> { %7450 = vmatprep.mubr.msk.f32.mxu1 %vm8732_vm4, %v8731_v9  ;;  %7476 = vmatprep.mubr.msk.f32.mxu0 %vm8732_vm4, %v8731_v9 }
  0xa3   : >> { %7451 = vmatmul.mubr.msk.f32.gmra.mrb[34].mxu1 %vm296_vm1, %v6424_v37  ;;  %7477 = vmatmul.mubr.msk.f32.gmra.mrb[34].mxu0 %vm296_vm1, %v6461_v46 }
  0xa4   : >> { %7453 = vmatprep.mubr.msk.f32.mxu1 %vm8732_vm4, %v8731_v9  ;;  %7479 = vmatprep.mubr.msk.f32.mxu0 %vm8732_vm4, %v8731_v9 }
  0xa7   : >> { %7454 = vmatmul.mubr.msk.f32.gmra.mrb[36].mxu1 %vm296_vm1, %v6425_v39  ;;  %7480 = vmatmul.mubr.msk.f32.gmra.mrb[36].mxu0 %vm296_vm1, %v6462_v47 }
  0xa8   : >> { %7456 = vmatprep.mubr.msk.f32.mxu1 %vm8732_vm4, %v8731_v9  ;;  %7482 = vmatprep.mubr.msk.f32.mxu0 %vm8732_vm4, %v8731_v9 }
  0xab   : >> { %7457 = vmatmul.mubr.msk.f32.gmra.mrb[38].mxu1 %vm296_vm1, %v6426_v40  ;;  %7483 = vmatmul.mubr.msk.f32.gmra.mrb[38].mxu0 %vm296_vm1, %v6463_v48 }
  0xac   : >> { %7459 = vmatprep.mubr.msk.f32.mxu1 %vm8732_vm4, %v8731_v9  ;;  %7485 = vmatprep.mubr.msk.f32.mxu0 %vm8732_vm4, %v8731_v9 }
  0xaf   : >> { %7460 = vmatmul.mubr.msk.f32.gmra.mrb[40].mxu1 %vm296_vm1, %v6445_v49  ;;  %7486 = vmatmul.mubr.msk.f32.gmra.mrb[40].mxu0 %vm296_vm1, %v6464_v50 }
  0xb0   : >> { %7462 = vmatprep.mubr.msk.f32.mxu1 %vm8732_vm4, %v8731_v9  ;;  %7488 = vmatprep.mubr.msk.f32.mxu0 %vm8732_vm4, %v8731_v9 }
  0xb3   : >> { %7463 = vmatmul.mubr.msk.f32.gmra.mrb[42].mxu1 %vm296_vm1, %v6446_v51  ;;  %7489 = vmatmul.mubr.msk.f32.gmra.mrb[42].mxu0 %vm296_vm1, %v6465_v52 }
  0xb4   : >> { %7491 = vmatprep.mubr.msk.f32.mxu0 %vm8732_vm4, %v8731_v9  ;;  %7496 = vmatprep.mubr.msk.f32.mxu1 %vm8732_vm4, %v8731_v9 }
  0xb7   : >> { %7492 = vmatmul.mubr.msk.f32.gmra.mrb[44].mxu0 %vm296_vm1, %v6466_v53  ;;  %7497 = vmatmul.mubr.msk.f32.vlgmr.msra.gmra.mrb[44].mxu1 %vm296_vm1, %v6478_v54 }
  0xb8   : >> { %7553 = vmatpush3.msk.msra.mxu1 %vm513_vm3, %v6527_v55  ;;  %7499 = vmatprep.mubr.msk.f32.mxu1 %vm8732_vm4, %v8731_v9 }
  0xb9   : >> { %7525 = vmatprep.mubr.msk.f32.mxu0 %vm8732_vm4, %v8731_v9 }
  0xbb   : >> { %7500 = vmatmul.mubr.msk.f32.gmra.mrb[46].mxu1 %vm296_vm1, %v6479_v56  ;;  %7526 = vmatmul.mubr.msk.f32.vlgmr.msra.gmra.mrb[46].mxu0 %vm296_vm1, %v6498_v57 }
  0xbc   : >> { %7582 = vmatpush3.msk.msra.mxu0 %vm513_vm3, %v6547_v58  ;;  %7502 = vmatprep.mubr.msk.f32.mxu1 %vm8732_vm4, %v8731_v9 }
  0xbd   : >> { %7528 = vmatprep.mubr.msk.f32.mxu0 %vm8732_vm4, %v8731_v9 }
  0xbf   : >> { %7503 = vmatmul.mubr.msk.f32.gmra.mrb[48].mxu1 %vm296_vm1, %v6498_v57  ;;  %7529 = vmatmul.mubr.msk.f32.gmra.mrb[48].mxu0 %vm296_vm1, %v6499_v59 }
  0xc0   : >> { %7505 = vmatprep.mubr.msk.f32.mxu1 %vm8732_vm4, %v8731_v9  ;;  %7531 = vmatprep.mubr.msk.f32.mxu0 %vm8732_vm4, %v8731_v9 }
  0xc3   : >> { %7506 = vmatmul.mubr.msk.f32.gmra.mrb[50].mxu1 %vm296_vm1, %v6499_v59  ;;  %7532 = vmatmul.mubr.msk.f32.gmra.mrb[50].mxu0 %vm296_vm1, %v6500_v60 }
  0xc4   : >> { %7508 = vmatprep.mubr.msk.f32.mxu1 %vm8732_vm4, %v8731_v9  ;;  %7534 = vmatprep.mubr.msk.f32.mxu0 %vm8732_vm4, %v8731_v9 }
  0xc7   : >> { %7509 = vmatmul.mubr.msk.f32.gmra.mrb[52].mxu1 %vm296_vm1, %v6500_v60  ;;  %7535 = vmatmul.mubr.msk.f32.gmra.mrb[52].mxu0 %vm296_vm1, %v6501_v61 }
  0xc8   : >> { %7511 = vmatprep.mubr.msk.f32.mxu1 %vm8732_vm4, %v8731_v9  ;;  %7537 = vmatprep.mubr.msk.f32.mxu0 %vm8732_vm4, %v8731_v9 }
  0xcb   : >> { %7512 = vmatmul.mubr.msk.f32.gmra.mrb[54].mxu1 %vm296_vm1, %v6501_v61  ;;  %7538 = vmatmul.mubr.msk.f32.gmra.mrb[54].mxu0 %vm296_vm1, %v6502_v62 }
  0xcc   : >> { %7514 = vmatprep.mubr.msk.f32.mxu1 %vm8732_vm4, %v8731_v9  ;;  %7540 = vmatprep.mubr.msk.f32.mxu0 %vm8732_vm4, %v8731_v9 }
  0xcf   : >> { %7515 = vmatmul.mubr.msk.f32.gmra.mrb[56].mxu1 %vm296_vm1, %v6502_v62  ;;  %7541 = vmatmul.mubr.msk.f32.gmra.mrb[56].mxu0 %vm296_vm1, %v6503_v63 }
  0xd0   : >> { %7517 = vmatprep.mubr.msk.f32.mxu1 %vm8732_vm4, %v8731_v9  ;;  %7543 = vmatprep.mubr.msk.f32.mxu0 %vm8732_vm4, %v8731_v9 }
  0xd3   : >> { %7518 = vmatmul.mubr.msk.f32.gmra.mrb[58].mxu1 %vm296_vm1, %v6503_v63  ;;  %7544 = vmatmul.mubr.msk.f32.gmra.mrb[58].mxu0 %vm296_vm1, %v6504_v1 }
  0xd4   : >> { %7520 = vmatprep.mubr.msk.f32.mxu1 %vm8732_vm4, %v8731_v9  ;;  %7546 = vmatprep.mubr.msk.f32.mxu0 %vm8732_vm4, %v8731_v9 }
  0xd7   : >> { %7521 = vmatmul.mubr.msk.f32.gmra.mrb[60].mxu1 %vm296_vm1, %v6504_v1  ;;  %7547 = vmatmul.mubr.msk.f32.gmra.mrb[60].mxu0 %vm296_vm1, %v6505_v2 }
  0xd8   : >> { %7549 = vmatprep.mubr.msk.f32.mxu0 %vm8732_vm4, %v8731_v9  ;;  %7554 = vmatprep.mubr.msk.f32.mxu1 %vm8732_vm4, %v8731_v9 }
  0xdb   : >> { %7550 = vmatmul.mubr.msk.f32.gmra.mrb[62].mxu0 %vm296_vm1, %v6506_v3  ;;  %7555 = vmatmul.mubr.msk.f32.vlgmr.msra.gmra.mrb[62].mxu1 %vm296_vm1, %v6518_v4 }
  0xdc   : >> { %7557 = vmatprep.mubr.msk.f32.mxu1 %vm8732_vm4, %v8731_v9  ;;  %7583 = vmatprep.mubr.msk.f32.mxu0 %vm8732_vm4, %v8731_v9 }
  0xdf   : >> { %7558 = vmatmul.mubr.msk.f32.gmra.mrb[64].mxu1 %vm296_vm1, %v6519_v5  ;;  %7584 = vmatmul.mubr.msk.f32.vlgmr.msra.gmra.mrb[64].mxu0 %vm296_vm1, %v6538_v6 }
  0xe0   : >> { %7560 = vmatprep.mubr.msk.f32.mxu1 %vm8732_vm4, %v8731_v9  ;;  %7586 = vmatprep.mubr.msk.f32.mxu0 %vm8732_vm4, %v8731_v9 }
  0xe3   : >> { %7561 = vmatmul.mubr.msk.f32.gmra.mrb[66].mxu1 %vm296_vm1, %v6520_v7  ;;  %7587 = vmatmul.mubr.msk.f32.gmra.mrb[66].mxu0 %vm296_vm1, %v6539_v8 }
  0xe4   : >> { %7563 = vmatprep.mubr.msk.f32.mxu1 %vm8732_vm4, %v8731_v9  ;;  %7589 = vmatprep.mubr.msk.f32.mxu0 %vm8732_vm4, %v8731_v9 }
  0xe7   : >> { %7564 = vmatmul.mubr.msk.f32.gmra.mrb[68].mxu1 %vm296_vm1, %v6521_v10  ;;  %7590 = vmatmul.mubr.msk.f32.gmra.mrb[68].mxu0 %vm296_vm1, %v6540_v11 }
  0xe8   : >> { %7566 = vmatprep.mubr.msk.f32.mxu1 %vm8732_vm4, %v8731_v9  ;;  %7592 = vmatprep.mubr.msk.f32.mxu0 %vm8732_vm4, %v8731_v9 }
  0xeb   : >> { %7567 = vmatmul.mubr.msk.f32.gmra.mrb[70].mxu1 %vm296_vm1, %v6522_v12  ;;  %7593 = vmatmul.mubr.msk.f32.gmra.mrb[70].mxu0 %vm296_vm1, %v6541_v13 }
  0xec   : >> { %7569 = vmatprep.mubr.msk.f32.mxu1 %vm8732_vm4, %v8731_v9  ;;  %7595 = vmatprep.mubr.msk.f32.mxu0 %vm8732_vm4, %v8731_v9 }
  0xef   : >> { %7570 = vmatmul.mubr.msk.f32.gmra.mrb[72].mxu1 %vm296_vm1, %v6523_v14  ;;  %7596 = vmatmul.mubr.msk.f32.gmra.mrb[72].mxu0 %vm296_vm1, %v6542_v15 }
  0xf0   : >> { %7572 = vmatprep.mubr.msk.f32.mxu1 %vm8732_vm4, %v8731_v9  ;;  %7598 = vmatprep.mubr.msk.f32.mxu0 %vm8732_vm4, %v8731_v9 }
  0xf3   : >> { %7573 = vmatmul.mubr.msk.f32.gmra.mrb[74].mxu1 %vm296_vm1, %v6524_v16  ;;  %7599 = vmatmul.mubr.msk.f32.gmra.mrb[74].mxu0 %vm296_vm1, %v6543_v17 }
  0xf4   : >> { %7575 = vmatprep.mubr.msk.f32.mxu1 %vm8732_vm4, %v8731_v9  ;;  %7601 = vmatprep.mubr.msk.f32.mxu0 %vm8732_vm4, %v8731_v9 }
  0xf7   : >> { %7576 = vmatmul.mubr.msk.f32.gmra.mrb[76].mxu1 %vm296_vm1, %v6525_v18  ;;  %7602 = vmatmul.mubr.msk.f32.gmra.mrb[76].mxu0 %vm296_vm1, %v6544_v19 }
  0xf8   : >> { %7578 = vmatprep.mubr.msk.f32.mxu1 %vm8732_vm4, %v8731_v9  ;;  %7604 = vmatprep.mubr.msk.f32.mxu0 %vm8732_vm4, %v8731_v9 }
  0xfb   : >> { %7579 = vmatmul.mubr.msk.f32.gmra.mrb[78].mxu1 %vm296_vm1, %v6526_v20  ;;  %7605 = vmatmul.mubr.msk.f32.gmra.mrb[78].mxu0 %vm296_vm1, %v6545_v21 }
  0xfc   : >> { %7607 = vmatprep.mubr.msk.f32.mxu0 %vm8732_vm4, %v8731_v9 }
  0xff   : >> { %7608 = vmatmul.mubr.msk.f32.gmra.mrb[80].mxu0 %vm296_vm1, %v6546_v22 }
 0x132   : >> { %v583_v23 = vpop.f32.mrb[0].mxu0  ;;  %v608_v24 = vpop.f32.mrb[0].mxu1 }
 0x133   : >> { %v7353_v25 = vpop.f32.mrb[1].mxu0  ;;  %v7368_v26 = vpop.f32.mrb[1].mxu1 }
 0x136   : >> { %v588_v27 = vpop.f32.mrb[2].mxu0  ;;  %v613_v28 = vpop.f32.mrb[2].mxu1 }
 0x137   : >> { %v7356_v29 = vpop.f32.mrb[3].mxu0  ;;  %v7371_v30 = vpop.f32.mrb[3].mxu1 }
 0x13a   : >> { %v593_v31 = vpop.f32.mrb[4].mxu0  ;;  %v618_v32 = vpop.f32.mrb[4].mxu1 }
 0x13b   : >> { %v7359_v33 = vpop.f32.mrb[5].mxu0  ;;  %v7374_v34 = vpop.f32.mrb[5].mxu1 }
 0x13e   : >> { %v598_v35 = vpop.f32.mrb[6].mxu0  ;;  %v623_v36 = vpop.f32.mrb[6].mxu1 }
 0x13f   : >> { %v7362_v37 = vpop.f32.mrb[7].mxu0  ;;  %v7377_v38 = vpop.f32.mrb[7].mxu1 }
 0x142   : >> { %v603_v9 = vpop.f32.mrb[8].mxu0  ;;  %v723_v39 = vpop.f32.mrb[8].mxu1 }
 0x143   : >> { %v724_v40 = vadd.f32 %v723_v39, %v583_v23  ;;  %v7365_v41 = vpop.f32.mrb[9].mxu0  ;;  %v7382_v42 = vpop.f32.mrb[9].mxu1 }
 0x146   : >> { %v728_v43 = vpop.f32.mrb[10].mxu1  ;;  %v876_v44 = vpop.f32.mrb[10].mxu0 }
 0x147   : >> { %v729_v45 = vadd.f32 %v728_v43, %v588_v27  ;;  %v920_v46 = vadd.f32 %v876_v44, %v724_v40  ;;  %v7411_v47 = vpop.f32.mrb[11].mxu0  ;;  %v7385_v48 = vpop.f32.mrb[11].mxu1 }
 0x14a   : >> { %v733_v49 = vpop.f32.mrb[12].mxu1  ;;  %v881_v50 = vpop.f32.mrb[12].mxu0 }
 0x14b   : >> { %v734_v51 = vadd.f32 %v733_v49, %v593_v31  ;;  %v921_v52 = vadd.f32 %v881_v50, %v729_v45  ;;  %v7414_v53 = vpop.f32.mrb[13].mxu0  ;;  %v7388_v54 = vpop.f32.mrb[13].mxu1 }
 0x14e   : >> { %v738_v55 = vpop.f32.mrb[14].mxu1  ;;  %v886_v56 = vpop.f32.mrb[14].mxu0 }
 0x14f   : >> { %v739_v57 = vadd.f32 %v738_v55, %v598_v35  ;;  %v922_v58 = vadd.f32 %v886_v56, %v734_v51  ;;  %v7417_v59 = vpop.f32.mrb[15].mxu0  ;;  %v7391_v60 = vpop.f32.mrb[15].mxu1 }
 0x152   : >> { %v743_v61 = vpop.f32.mrb[16].mxu1  ;;  %v891_v62 = vpop.f32.mrb[16].mxu0 }
 0x153   : >> { %v744_v63 = vadd.f32 %v743_v61, %v603_v9  ;;  %v923_v1 = vadd.f32 %v891_v62, %v739_v57  ;;  %v7420_v2 = vpop.f32.mrb[17].mxu0  ;;  %v7394_v3 = vpop.f32.mrb[17].mxu1 }
 0x156   : >> { %v748_v4 = vpop.f32.mrb[18].mxu1  ;;  %v896_v5 = vpop.f32.mrb[18].mxu0 }
 0x157   : >> { %v749_v6 = vadd.f32 %v748_v4, %v608_v24  ;;  %v924_v7 = vadd.f32 %v896_v5, %v744_v63  ;;  %v7423_v8 = vpop.f32.mrb[19].mxu0  ;;  %v7397_v10 = vpop.f32.mrb[19].mxu1 }
 0x15a   : >> { %v753_v11 = vpop.f32.mrb[20].mxu1  ;;  %v901_v12 = vpop.f32.mrb[20].mxu0 }
 0x15b   : >> { %v754_v13 = vadd.f32 %v753_v11, %v613_v28  ;;  %v925_v14 = vadd.f32 %v901_v12, %v749_v6  ;;  %v7426_v15 = vpop.f32.mrb[21].mxu0  ;;  %v7400_v16 = vpop.f32.mrb[21].mxu1 }
 0x15e   : >> { %v758_v17 = vpop.f32.mrb[22].mxu1  ;;  %v906_v18 = vpop.f32.mrb[22].mxu0 }
 0x15f   : >> { %v759_v19 = vadd.f32 %v758_v17, %v618_v32  ;;  %v926_v20 = vadd.f32 %v906_v18, %v754_v13  ;;  %v7429_v21 = vpop.f32.mrb[23].mxu0  ;;  %v7403_v22 = vpop.f32.mrb[23].mxu1 }
 0x162   : >> { %v763_v23 = vpop.f32.mrb[24].mxu1  ;;  %v911_v25 = vpop.f32.mrb[24].mxu0 }
 0x163   : >> { %v764_v26 = vadd.f32 %v763_v23, %v623_v36  ;;  %v927_v27 = vadd.f32 %v911_v25, %v759_v19  ;;  %v7432_v24 = vpop.f32.mrb[25].mxu0  ;;  %v7406_v29 = vpop.f32.mrb[25].mxu1 }
 0x166   : >> { %v916_v30 = vpop.f32.mrb[26].mxu0  ;;  %v1038_v31 = vpop.f32.mrb[26].mxu1 }
 0x167   : >> { %v928_v33 = vadd.f32 %v916_v30, %v764_v26  ;;  %v1082_v34 = vadd.f32 %v1038_v31, %v920_v46  ;;  %v7435_v28 = vpop.f32.mrb[27].mxu0  ;;  %v7440_v35 = vpop.f32.mrb[27].mxu1 }
 0x16a   : >> { %v1043_v37 = vpop.f32.mrb[28].mxu1  ;;  %v1200_v38 = vpop.f32.mrb[28].mxu0 }
 0x16b   : >> { %v1083_v9 = vadd.f32 %v1043_v37, %v921_v52  ;;  %v1244_v39 = vadd.f32 %v1200_v38, %v1082_v34  ;;  %v7469_v32 = vpop.f32.mrb[29].mxu0  ;;  %v7443_v40 = vpop.f32.mrb[29].mxu1 }
 0x16e   : >> { %v1048_v41 = vpop.f32.mrb[30].mxu1  ;;  %v1205_v42 = vpop.f32.mrb[30].mxu0 }
 0x16f   : >> { %v1084_v43 = vadd.f32 %v1048_v41, %v922_v58  ;;  %v1245_v44 = vadd.f32 %v1205_v42, %v1083_v9  ;;  %v7472_v36 = vpop.f32.mrb[31].mxu0  ;;  %v7446_v45 = vpop.f32.mrb[31].mxu1 }
 0x172   : >> { %v1053_v47 = vpop.f32.mrb[32].mxu1  ;;  %v1210_v48 = vpop.f32.mrb[32].mxu0 }
 0x173   : >> { %v1085_v49 = vadd.f32 %v1053_v47, %v923_v1  ;;  %v1246_v50 = vadd.f32 %v1210_v48, %v1084_v43  ;;  %v7475_v51 = vpop.f32.mrb[33].mxu0  ;;  %v7449_v46 = vpop.f32.mrb[33].mxu1 }
 0x176   : >> { %v1058_v53 = vpop.f32.mrb[34].mxu1  ;;  %v1215_v54 = vpop.f32.mrb[34].mxu0 }
 0x177   : >> { %v1086_v55 = vadd.f32 %v1058_v53, %v924_v7  ;;  %v1247_v56 = vadd.f32 %v1215_v54, %v1085_v49  ;;  %v7478_v52 = vpop.f32.mrb[35].mxu0  ;;  %v7452_v57 = vpop.f32.mrb[35].mxu1 }
 0x17a   : >> { %v1063_v59 = vpop.f32.mrb[36].mxu1  ;;  %v1220_v60 = vpop.f32.mrb[36].mxu0 }
 0x17b   : >> { %v1087_v61 = vadd.f32 %v1063_v59, %v925_v14  ;;  %v1248_v62 = vadd.f32 %v1220_v60, %v1086_v55  ;;  %v7481_v58 = vpop.f32.mrb[37].mxu0  ;;  %v7455_v63 = vpop.f32.mrb[37].mxu1 }
 0x17e   : >> { %v1068_v2 = vpop.f32.mrb[38].mxu1  ;;  %v1225_v3 = vpop.f32.mrb[38].mxu0 }
 0x17f   : >> { %v1088_v4 = vadd.f32 %v1068_v2, %v926_v20  ;;  %v1249_v5 = vadd.f32 %v1225_v3, %v1087_v61  ;;  %v7484_v1 = vpop.f32.mrb[39].mxu0  ;;  %v7458_v6 = vpop.f32.mrb[39].mxu1 }
 0x182   : >> { %v1073_v8 = vpop.f32.mrb[40].mxu1  ;;  %v1230_v10 = vpop.f32.mrb[40].mxu0 }
 0x183   : >> { %v1089_v11 = vadd.f32 %v1073_v8, %v927_v27  ;;  %v1250_v12 = vadd.f32 %v1230_v10, %v1088_v4  ;;  %v7487_v7 = vpop.f32.mrb[41].mxu0  ;;  %v7461_v13 = vpop.f32.mrb[41].mxu1 }
 0x186   : >> { %v1078_v15 = vpop.f32.mrb[42].mxu1  ;;  %v1235_v16 = vpop.f32.mrb[42].mxu0 }
 0x187   : >> { %v1090_v17 = vadd.f32 %v1078_v15, %v928_v33  ;;  %v1251_v18 = vadd.f32 %v1235_v16, %v1089_v11  ;;  %v7490_v14 = vpop.f32.mrb[43].mxu0  ;;  %v7464_v19 = vpop.f32.mrb[43].mxu1 }
 0x188   : >> { %v9318_v19 = vld [vmem:[%s10432_s2] ss:$0 sm:$0xff] }
 0x18a   : >> { %v1240_v21 = vpop.f32.mrb[44].mxu0  ;;  %v1362_v22 = vpop.f32.mrb[44].mxu1 }
 0x18b   : >> { %v1252_v23 = vadd.f32 %v1240_v21, %v1090_v17  ;;  %v1406_v25 = vadd.f32 %v1362_v22, %v1244_v39  ;;  %v7493_v20 = vpop.f32.mrb[45].mxu0  ;;  %v7498_v26 = vpop.f32.mrb[45].mxu1 }
 0x18e   : >> { %v1367_v24 = vpop.f32.mrb[46].mxu1  ;;  %v1524_v29 = vpop.f32.mrb[46].mxu0 }
 0x18f   : >> { %v1407_v30 = vadd.f32 %v1367_v24, %v1245_v44  ;;  %v1568_v31 = vadd.f32 %v1524_v29, %v1406_v25  ;;  %v7527_v27 = vpop.f32.mrb[47].mxu0  ;;  %v7501_v34 = vpop.f32.mrb[47].mxu1 }
 0x192   : >> { %v1372_v28 = vpop.f32.mrb[48].mxu1  ;;  %v1529_v35 = vpop.f32.mrb[48].mxu0 }
 0x193   : >> { %v1408_v37 = vadd.f32 %v1372_v28, %v1246_v50  ;;  %v1569_v38 = vadd.f32 %v1529_v35, %v1407_v30  ;;  %v7530_v33 = vpop.f32.mrb[49].mxu0  ;;  %v7504_v9 = vpop.f32.mrb[49].mxu1 }
 0x196   : >> { %v1377_v32 = vpop.f32.mrb[50].mxu1  ;;  %v1534_v40 = vpop.f32.mrb[50].mxu0 }
 0x197   : >> { %v1409_v41 = vadd.f32 %v1377_v32, %v1247_v56  ;;  %v1570_v42 = vadd.f32 %v1534_v40, %v1408_v37  ;;  %v7533_v43 = vpop.f32.mrb[51].mxu0  ;;  %v7507_v39 = vpop.f32.mrb[51].mxu1 }
 0x19a   : >> { %v1382_v36 = vpop.f32.mrb[52].mxu1  ;;  %v1539_v45 = vpop.f32.mrb[52].mxu0 }
 0x19b   : >> { %v1410_v47 = vadd.f32 %v1382_v36, %v1248_v62  ;;  %v1571_v48 = vadd.f32 %v1539_v45, %v1409_v41  ;;  %v7536_v44 = vpop.f32.mrb[53].mxu0  ;;  %v7510_v49 = vpop.f32.mrb[53].mxu1 }
 0x19e   : >> { %v1387_v51 = vpop.f32.mrb[54].mxu1  ;;  %v1544_v46 = vpop.f32.mrb[54].mxu0 }
 0x19f   : >> { %v1411_v53 = vadd.f32 %v1387_v51, %v1249_v5  ;;  %v1572_v54 = vadd.f32 %v1544_v46, %v1410_v47  ;;  %v7539_v50 = vpop.f32.mrb[55].mxu0  ;;  %v7513_v55 = vpop.f32.mrb[55].mxu1 }
 0x1a2   : >> { %v1392_v52 = vpop.f32.mrb[56].mxu1  ;;  %v1549_v57 = vpop.f32.mrb[56].mxu0 }
 0x1a3   : >> { %v1412_v59 = vadd.f32 %v1392_v52, %v1250_v12  ;;  %v1573_v60 = vadd.f32 %v1549_v57, %v1411_v53  ;;  %v7542_v56 = vpop.f32.mrb[57].mxu0  ;;  %v7516_v61 = vpop.f32.mrb[57].mxu1 }
 0x1a6   : >> { %v1397_v58 = vpop.f32.mrb[58].mxu1  ;;  %v1554_v63 = vpop.f32.mrb[58].mxu0 }
 0x1a7   : >> { %v1413_v2 = vadd.f32 %v1397_v58, %v1251_v18  ;;  %v9309_v3 = vadd.f32 %v1554_v63, %v1412_v59  ;;  %v7545_v62 = vpop.f32.mrb[59].mxu0  ;;  %v7519_v4 = vpop.f32.mrb[59].mxu1 }
 0x1aa   : >> { %v1402_v1 = vpop.f32.mrb[60].mxu1  ;;  %v1559_v6 = vpop.f32.mrb[60].mxu0 }
 0x1ab   : >> { %v1414_v8 = vadd.f32 %v1402_v1, %v1252_v23  ;;  %v9311_v5 = vadd.f32 %v1559_v6, %v1413_v2  ;;  %v7548_v10 = vpop.f32.mrb[61].mxu0  ;;  %v7522_v11 = vpop.f32.mrb[61].mxu1 }
 0x1ae   : >> { %v1564_v7 = vpop.f32.mrb[62].mxu0  ;;  %v1686_v13 = vpop.f32.mrb[62].mxu1 }
 0x1af   : >> { %v9313_v12 = vadd.f32 %v1564_v7, %v1414_v8  ;;  %v1730_v15 = vadd.f32 %v1686_v13, %v1568_v31  ;;  %v7551_v16 = vpop.f32.mrb[63].mxu0  ;;  %v7556_v17 = vpop.f32.mrb[63].mxu1 }
 0x1b2   : >> { %v1691_v14 = vpop.f32.mrb[64].mxu1  ;;  %v1848_v18 = vpop.f32.mrb[64].mxu0 }
 0x1b3   : >> { %v1731_v21 = vadd.f32 %v1691_v14, %v1569_v38  ;;  %v1892_v22 = vadd.f32 %v1848_v18, %v1730_v15  ;;  %v7585_v23 = vpop.f32.mrb[65].mxu0  ;;  %v7559_v25 = vpop.f32.mrb[65].mxu1 }
 0x1b5   : >> { %v1908_v20 = vadd.f32 %v9318_v19, %v1892_v22 }
 0x1b6   : >> { %v1696_v26 = vpop.f32.mrb[66].mxu1  ;;  %v1853_v24 = vpop.f32.mrb[66].mxu0 }
 0x1b7   : >> { %v1917_v29 = vmax.f32 %v1908_v20, 0.0  ;;  %v1732_v30 = vadd.f32 %v1696_v26, %v1570_v42  ;;  %v1893_v31 = vadd.f32 %v1853_v24, %v1731_v21  ;;  %v7588_v27 = vpop.f32.mrb[67].mxu0  ;;  %v7562_v34 = vpop.f32.mrb[67].mxu1 }
 0x1b9   : >> { %6559 = vst.msk [vmem:[%s9323_s9 + $0x13] sm:$0xff] %vm1927_vm5, %v1917_v29  ;;  %v1909_v28 = vadd.f32 %v9318_v19, %v1893_v31 }
 0x1ba   : >> { %v1701_v35 = vpop.f32.mrb[68].mxu1  ;;  %v1858_v37 = vpop.f32.mrb[68].mxu0 }
 0x1bb   : >> { %v1918_v38 = vmax.f32 %v1909_v28, 0.0  ;;  %v1733_v33 = vadd.f32 %v1701_v35, %v1571_v48  ;;  %v1894_v9 = vadd.f32 %v1858_v37, %v1732_v30  ;;  %v7591_v32 = vpop.f32.mrb[69].mxu0  ;;  %v7565_v40 = vpop.f32.mrb[69].mxu1 }
 0x1bd   : >> { %6560 = vst.msk [vmem:[%s9323_s9 + $0x1b] sm:$0xff] %vm1927_vm5, %v1918_v38  ;;  %v1910_v41 = vadd.f32 %v9318_v19, %v1894_v9 }
 0x1be   : >> { %v1706_v42 = vpop.f32.mrb[70].mxu1  ;;  %v1863_v43 = vpop.f32.mrb[70].mxu0 }
 0x1bf   : >> { %v1919_v39 = vmax.f32 %v1910_v41, 0.0  ;;  %v1734_v36 = vadd.f32 %v1706_v42, %v1572_v54  ;;  %v1895_v45 = vadd.f32 %v1863_v43, %v1733_v33  ;;  %v7594_v47 = vpop.f32.mrb[71].mxu0  ;;  %v7568_v44 = vpop.f32.mrb[71].mxu1 }
 0x1c1   : >> { %6561 = vst.msk [vmem:[%s9323_s9 + $0x23] sm:$0xff] %vm1927_vm5, %v1919_v39  ;;  %v1911_v49 = vadd.f32 %v9318_v19, %v1895_v45 }
 0x1c2   : >> { %v1711_v48 = vpop.f32.mrb[72].mxu1  ;;  %v1868_v51 = vpop.f32.mrb[72].mxu0 }
 0x1c3   : >> { %v1920_v46 = vmax.f32 %v1911_v49, 0.0  ;;  %v1735_v53 = vadd.f32 %v1711_v48, %v1573_v60  ;;  %v1896_v50 = vadd.f32 %v1868_v51, %v1734_v36  ;;  %v7597_v55 = vpop.f32.mrb[73].mxu0  ;;  %v7571_v52 = vpop.f32.mrb[73].mxu1 }
 0x1c5   : >> { %6562 = vst.msk [vmem:[%s9323_s9 + $0x2b] sm:$0xff] %vm1927_vm5, %v1920_v46  ;;  %v1912_v57 = vadd.f32 %v9318_v19, %v1896_v50 }
 0x1c6   : >> { %v1716_v54 = vpop.f32.mrb[74].mxu1  ;;  %v1873_v59 = vpop.f32.mrb[74].mxu0 }
 0x1c7   : >> { %v1921_v56 = vmax.f32 %v1912_v57, 0.0  ;;  %v1736_v61 = vadd.f32 %v1716_v54, %v9309_v3  ;;  %v1897_v58 = vadd.f32 %v1873_v59, %v1735_v53  ;;  %v7600_v63 = vpop.f32.mrb[75].mxu0  ;;  %v7574_v2 = vpop.f32.mrb[75].mxu1 }
 0x1c9   : >> { %6563 = vst.msk [vmem:[%s9323_s9 + $0x33] sm:$0xff] %vm1927_vm5, %v1921_v56  ;;  %v1913_v60 = vadd.f32 %v9318_v19, %v1897_v58 }
 0x1ca   : >> { %v1721_v62 = vpop.f32.mrb[76].mxu1  ;;  %v1878_v4 = vpop.f32.mrb[76].mxu0 }
 0x1cb   : >> { %v1922_v1 = vmax.f32 %v1913_v60, 0.0  ;;  %v1737_v6 = vadd.f32 %v1721_v62, %v9311_v5  ;;  %v1898_v8 = vadd.f32 %v1878_v4, %v1736_v61  ;;  %v7603_v10 = vpop.f32.mrb[77].mxu0  ;;  %v7577_v11 = vpop.f32.mrb[77].mxu1 }
 0x1cd   : >> { %6564 = vst.msk [vmem:[%s9323_s9 + $0x3b] sm:$0xff] %vm1927_vm5, %v1922_v1  ;;  %v1914_v3 = vadd.f32 %v9318_v19, %v1898_v8 }
 0x1ce   : >> { %v1726_v7 = vpop.f32.mrb[78].mxu1  ;;  %v1883_v13 = vpop.f32.mrb[78].mxu0 }
 0x1cf   : >> { %v1923_v15 = vmax.f32 %v1914_v3, 0.0  ;;  %v1738_v16 = vadd.f32 %v1726_v7, %v9313_v12  ;;  %v1899_v17 = vadd.f32 %v1883_v13, %v1737_v6  ;;  %v7606_v14 = vpop.f32.mrb[79].mxu0  ;;  %v7580_v18 = vpop.f32.mrb[79].mxu1 }
 0x1d1   : >> { %6565 = vst.msk [vmem:[%s9323_s9 + $0x43] sm:$0xff] %vm1927_vm5, %v1923_v15  ;;  %v1915_v5 = vadd.f32 %v9318_v19, %v1899_v17 }
 0x1d2   : >> { %v1888_v21 = vpop.f32.mrb[80].mxu0 }
 0x1d3   : >> { %v1924_v22 = vmax.f32 %v1915_v5, 0.0  ;;  %v1900_v23 = vadd.f32 %v1888_v21, %v1738_v16  ;;  %v7609_v25 = vpop.f32.mrb[81].mxu0  ;;  %459 = sbr.rel (!%p457_p3) target bundleno = 88 (0x58), region = 156 }
 0x1d5   : >> { %6566 = vst.msk [vmem:[%s9323_s9 + $0x4b] sm:$0xff] %vm1927_vm5, %v1924_v22  ;;  %v1916_v20 = vadd.f32 %v9318_v19, %v1900_v23 }
 0x1d7   : >> { %v1925_v26 = vmax.f32 %v1916_v20, 0.0 }
 0x1d9   : >> { %6567 = vst.msk [vmem:[%s9323_s9 + $0x53] sm:$0xff] %vm1927_vm5, %v1925_v26 }
 0x1da   : > { %2016 = vst.msk [vmem:[#allocation3 + $0x144] sm:$0xff] %vm1927_vm5, %v8730_v0  ;;  %2017 = vst.msk [vmem:[#allocation3 + $0x14c] sm:$0xff] %vm1927_vm5, %v8730_v0 }
 0x1db   : > { %2018 = vst.msk [vmem:[#allocation3 + $0x154] sm:$0x3] %vm2008_vm7, %v8730_v0 }
 0x1e0   : > { %v1942_v12 = vld [vmem:[#allocation3 + $0x26] sm:$0x1]  ;;  %v1944_v24 = vld [vmem:[#allocation3 + $0x33] sm:$0x1]  ;;  %v1994_v19 = vld [vmem:[#allocation3 + $0x110] sm:$0x1] }
 0x1e1   : > { %v2003_v29 = vld [vmem:[#allocation3 + $0x2c] sm:$0xff]  ;;  %1943 = vst.msk [vmem:[#allocation3 + $0x24] sm:$0x1] %vm1938_vm6, %v1942_v12  ;;  %1945 = vst.msk [vmem:[#allocation3 + $0x35] sm:$0x1] %vm1938_vm6, %v1944_v24  ;;  %v2011_v61 = vld [vmem:[#allocation3 + $0x116] sm:$0xff] }
 0x1e2   : > { %v1996_v30 = vld [vmem:[#allocation3 + $0x11d] sm:$0x1]  ;;  %v1937_v31 = vld [vmem:[#allocation3 + $0x14] sm:$0x1]  ;;  %2007 = vst.msk [vmem:[#allocation3 + $0x8] sm:$0xff] %vm1927_vm5, %v2003_v29  ;;  %2014 = vst.msk [vmem:[#allocation3 + $0x13a] sm:$0xff] %vm1927_vm5, %v2011_v61 }
 0x1e3   : > { %1995 = vst.msk [vmem:[#allocation3 + $0x10e] sm:$0x1] %vm1938_vm6, %v1994_v19  ;;  %1997 = vst.msk [vmem:[#allocation3 + $0x11f] sm:$0x1] %vm1938_vm6, %v1996_v30  ;;  %v1940_v27 = vld [vmem:[#allocation3 + $0x21] sm:$0x1] }
 0x1e4   : > { %1939 = vst.msk [vmem:[#allocation3 + $0x12] sm:$0x1] %vm1938_vm6, %v1937_v31  ;;  %v1946_v34 = vld [vmem:[#allocation3 + $0x38] sm:$0x1]  ;;  %v1948_v28 = vld [vmem:[#allocation3 + $0x45] sm:$0x1] }
 0x1e5   : > { %1941 = vst.msk [vmem:[#allocation3 + $0x23] sm:$0x1] %vm1938_vm6, %v1940_v27  ;;  %1947 = vst.msk [vmem:[#allocation3 + $0x36] sm:$0x1] %vm1938_vm6, %v1946_v34  ;;  %v1950_v35 = vld [vmem:[#allocation3 + $0x4a] sm:$0x1] }
 0x1e6   : > { %1949 = vst.msk [vmem:[#allocation3 + $0x47] sm:$0x1] %vm1938_vm6, %v1948_v28  ;;  %v1952_v37 = vld [vmem:[#allocation3 + $0x57] sm:$0x1]  ;;  %v1954_v38 = vld [vmem:[#allocation3 + $0x5c] sm:$0x1] }
 0x1e7   : > { %1951 = vst.msk [vmem:[#allocation3 + $0x48] sm:$0x1] %vm1938_vm6, %v1950_v35  ;;  %1953 = vst.msk [vmem:[#allocation3 + $0x59] sm:$0x1] %vm1938_vm6, %v1952_v37  ;;  %v1956_v33 = vld [vmem:[#allocation3 + $0x69] sm:$0x1] }
 0x1e8   : > { %1955 = vst.msk [vmem:[#allocation3 + $0x5a] sm:$0x1] %vm1938_vm6, %v1954_v38  ;;  %v1958_v9 = vld [vmem:[#allocation3 + $0x6e] sm:$0x1]  ;;  %v1960_v32 = vld [vmem:[#allocation3 + $0x7b] sm:$0x1] }
 0x1e9   : > { %1957 = vst.msk [vmem:[#allocation3 + $0x6b] sm:$0x1] %vm1938_vm6, %v1956_v33  ;;  %1959 = vst.msk [vmem:[#allocation3 + $0x6c] sm:$0x1] %vm1938_vm6, %v1958_v9  ;;  %v1962_v40 = vld [vmem:[#allocation3 + $0x80] sm:$0x1] }
 0x1ea   : > { %1961 = vst.msk [vmem:[#allocation3 + $0x7d] sm:$0x1] %vm1938_vm6, %v1960_v32  ;;  %v1964_v41 = vld [vmem:[#allocation3 + $0x8d] sm:$0x1]  ;;  %v1966_v42 = vld [vmem:[#allocation3 + $0x92] sm:$0x1] }
 0x1eb   : > { %1963 = vst.msk [vmem:[#allocation3 + $0x7e] sm:$0x1] %vm1938_vm6, %v1962_v40  ;;  %1965 = vst.msk [vmem:[#allocation3 + $0x8f] sm:$0x1] %vm1938_vm6, %v1964_v41  ;;  %v1968_v43 = vld [vmem:[#allocation3 + $0x9f] sm:$0x1] }
 0x1ec   : > { %1967 = vst.msk [vmem:[#allocation3 + $0x90] sm:$0x1] %vm1938_vm6, %v1966_v42  ;;  %v1970_v39 = vld [vmem:[#allocation3 + $0xa4] sm:$0x1]  ;;  %v1972_v36 = vld [vmem:[#allocation3 + $0xb1] sm:$0x1] }
 0x1ed   : > { %1969 = vst.msk [vmem:[#allocation3 + $0xa1] sm:$0x1] %vm1938_vm6, %v1968_v43  ;;  %1971 = vst.msk [vmem:[#allocation3 + $0xa2] sm:$0x1] %vm1938_vm6, %v1970_v39  ;;  %v1974_v45 = vld [vmem:[#allocation3 + $0xb6] sm:$0x1] }
 0x1ee   : > { %1973 = vst.msk [vmem:[#allocation3 + $0xb3] sm:$0x1] %vm1938_vm6, %v1972_v36  ;;  %v1976_v47 = vld [vmem:[#allocation3 + $0xc3] sm:$0x1]  ;;  %v1978_v44 = vld [vmem:[#allocation3 + $0xc8] sm:$0x1] }
 0x1ef   : > { %1975 = vst.msk [vmem:[#allocation3 + $0xb4] sm:$0x1] %vm1938_vm6, %v1974_v45  ;;  %1977 = vst.msk [vmem:[#allocation3 + $0xc5] sm:$0x1] %vm1938_vm6, %v1976_v47  ;;  %v1980_v49 = vld [vmem:[#allocation3 + $0xd5] sm:$0x1] }
 0x1f0   : > { %1979 = vst.msk [vmem:[#allocation3 + $0xc6] sm:$0x1] %vm1938_vm6, %v1978_v44  ;;  %v1982_v48 = vld [vmem:[#allocation3 + $0xda] sm:$0x1]  ;;  %v1984_v51 = vld [vmem:[#allocation3 + $0xe7] sm:$0x1] }
 0x1f1   : > { %1981 = vst.msk [vmem:[#allocation3 + $0xd7] sm:$0x1] %vm1938_vm6, %v1980_v49  ;;  %1983 = vst.msk [vmem:[#allocation3 + $0xd8] sm:$0x1] %vm1938_vm6, %v1982_v48  ;;  %v1986_v46 = vld [vmem:[#allocation3 + $0xec] sm:$0x1] }
 0x1f2   : > { %1985 = vst.msk [vmem:[#allocation3 + $0xe9] sm:$0x1] %vm1938_vm6, %v1984_v51  ;;  %v1988_v53 = vld [vmem:[#allocation3 + $0xf9] sm:$0x1]  ;;  %v1990_v50 = vld [vmem:[#allocation3 + $0xfe] sm:$0x1] }
 0x1f3   : > { %1987 = vst.msk [vmem:[#allocation3 + $0xea] sm:$0x1] %vm1938_vm6, %v1986_v46  ;;  %1989 = vst.msk [vmem:[#allocation3 + $0xfb] sm:$0x1] %vm1938_vm6, %v1988_v53  ;;  %v1992_v55 = vld [vmem:[#allocation3 + $0x10b] sm:$0x1] }
 0x1f4   : > { %1991 = vst.msk [vmem:[#allocation3 + $0xfc] sm:$0x1] %vm1938_vm6, %v1990_v50  ;;  %v1998_v52 = vld [vmem:[#allocation3 + $0x122] sm:$0x1]  ;;  %v2000_v57 = vld [vmem:[#allocation3 + $0x12f] sm:$0x1] }
 0x1f5   : > { %1993 = vst.msk [vmem:[#allocation3 + $0x10d] sm:$0x1] %vm1938_vm6, %v1992_v55  ;;  %1999 = vst.msk [vmem:[#allocation3 + $0x120] sm:$0x1] %vm1938_vm6, %v1998_v52  ;;  %v2002_v54 = vld [vmem:[#allocation3 + $0x24] sm:$0xff]  ;;  %v2010_v56 = vld [vmem:[#allocation3 + $0x10e] sm:$0xff] }
 0x1f6   : > { %2001 = vst.msk [vmem:[#allocation3 + $0x131] sm:$0x1] %vm1938_vm6, %v2000_v57  ;;  %v2004_v59 = vld [vmem:[#allocation3 + $0x34] sm:$0x3]  ;;  %v2012_v58 = vld [vmem:[#allocation3 + $0x11e] sm:$0x3] }
 0x1f7   : > { %2006 = vst.msk [vmem:[#allocation3] sm:$0xff] %vm1927_vm5, %v2002_v54  ;;  %2013 = vst.msk [vmem:[#allocation3 + $0x132] sm:$0xff] %vm1927_vm5, %v2010_v56 }
 0x1f8   : > { %2009 = vst.msk [vmem:[#allocation3 + $0x10] sm:$0x3] %vm2008_vm7, %v2004_v59  ;;  %2015 = vst.msk [vmem:[#allocation3 + $0x142] sm:$0x3] %vm2008_vm7, %v2012_v58 }
 0x1f9 LB: >> { %v6577_v63 = vld [vmem:[%s10433_s3 + $0x40] sm:$0xff]  ;;  %v6578_v2 = vld [vmem:[%s10433_s3 + $0x48] sm:$0xff]  ;;  %v6579_v60 = vld [vmem:[%s10433_s3 + $0x50] sm:$0xff]  ;;  %v8733_v62 = vmov 0.0|0.0   ;;  %vm8734_vm8 = vmmov 0   ;;  %v8735_v6 = vmov 0.0   ;;  %s8725_s25 = sphi %s9401_s25, %s2024_s25  }
 0x1fa   : >> { %8530 = vmatprep.subr.bf16.mxu1 %v8733_v62  ;;  %v8277_v4 = vpack.c.bf16 %v6578_v2, %v6577_v63  ;;  %v6580_v1 = vld [vmem:[%s10433_s3 + $0x58] sm:$0xff]  ;;  %8276 = vmatprep.subr.bf16.mxu0 %v8733_v62  ;;  %v6581_v10 = vld [vmem:[%s10433_s3 + $0x60] sm:$0xff]  ;;  %v6582_v11 = vld [vmem:[%s10433_s3 + $0x68] sm:$0xff]  ;;  %s2025_s27 = smul.u32 72, %s8725_s25  ;;  %s2024_s25 = sadd.s32 1, %s8725_s25  }
 0x1fb   : >> { %7638 = vmatprep.mubr.msk.f32.mxu1 %vm8734_vm8, %v8735_v6  ;;  %7626 = vmatprep.mubr.msk.f32.mxu0 %vm8734_vm8, %v8735_v6  ;;  %v8280_v8 = vpack.c.bf16 %v6580_v1, %v6579_v60  ;;  %v8283_v3 = vpack.c.bf16 %v6582_v11, %v6581_v10  ;;  %v6583_v7 = vld [vmem:[%s10433_s3 + $0x70] sm:$0xff]  ;;  %v6584_v13 = vld [vmem:[%s10433_s3 + $0x78] sm:$0xff]  ;;  %v2036_v16 = vld [vmem:[%s10433_s3] sm:$0xff]  ;;  %p2021_p5 = scmp.ge.s32.totalorder %s2024_s25, 4  }
 0x1fc   : >> { %8534 = vmatpush3.bf16.msra.mxu1 %v8277_v4  ;;  %8278 = vmatpush3.bf16.msra.mxu0 %v8277_v4  ;;  %v8286_v15 = vpack.c.bf16 %v6584_v13, %v6583_v7  ;;  %v2037_v17 = vld [vmem:[%s10433_s3 + $0x8] sm:$0xff]  ;;  %v6612_v14 = vld [vmem:[%s10433_s3 + $0x80] sm:$0xff]  ;;  %s9457_s14 = scalar_lea.vmem [#allocation3], %s2025_s27  ;;  %v2038_v23 = vld [vmem:[%s10433_s3 + $0x10] sm:$0xff]  ;;  %s10023_s8 = scalar_lea.vmem [#allocation4], %s2025_s27  ;;  %4630 = vst.msk [vmem:[#allocation5 + $0x64] sm:$0xff] (%p2021_p5), %vm1927_vm5, %v8730_v0 }
 0x1fd   : >> { %8531 = vmatprep.subr.bf16.mxu1 %v8733_v62  ;;  %8279 = vmatprep.subr.bf16.mxu0 %v8733_v62  ;;  %v6613_v18 = vld [vmem:[%s10433_s3 + $0x88] sm:$0xff]  ;;  %v8289_v21 = vpack.c.bf16 %v2037_v17, %v2036_v16  ;;  %v2039_v25 = vld [vmem:[%s10433_s3 + $0x18] sm:$0xff]  ;;  %v6614_v26 = vld [vmem:[%s10433_s3 + $0x90] sm:$0xff]  ;;  %vm3657_vm9 = vcmask (%p2021_p5), 1041409   ;;  %vm3659_vm10 = vcmask (%p2021_p5), 1042434   ;;  %vm3661_vm11 = vcmask (%p2021_p5), 1043459  }
 0x1fe   : >> { %v8301_v20 = vpack.c.bf16 %v6613_v18, %v6612_v14  ;;  %v6615_v12 = vld [vmem:[%s10433_s3 + $0x98] sm:$0xff]  ;;  %v8292_v29 = vpack.c.bf16 %v2039_v25, %v2038_v23  ;;  %v2040_v30 = vld [vmem:[%s10433_s3 + $0x20] sm:$0xff]  ;;  %v2041_v31 = vld [vmem:[%s10433_s3 + $0x28] sm:$0xff]  ;;  %vm3663_vm12 = vcmask (%p2021_p5), 1044484   ;;  %vm3665_vm13 = vcmask (%p2021_p5), 1045509  }
 0x1ff   : >> { %v6572_v5 = vld [vmem:[%s9457_s14 + $0x21] sm:$0xff]  ;;  %v6573_v24 = vld [vmem:[%s9457_s14 + $0x29] sm:$0xff]  ;;  %v8304_v27 = vpack.c.bf16 %v6615_v12, %v6614_v26  ;;  %v6574_v35 = vld [vmem:[%s9457_s14 + $0x31] sm:$0xff]  ;;  %v8295_v37 = vpack.c.bf16 %v2041_v31, %v2040_v30  ;;  %vm3667_vm14 = vcmask (%p2021_p5), 1046534   ;;  %vm3669_vm15 = vcmask (%p2021_p5), 1047559  }
 0x200   : >> { %8535 = vmatpush3.bf16.msra.mxu1 %v8280_v8  ;;  %8281 = vmatpush3.bf16.msra.mxu0 %v8280_v8  ;;  %v6568_v22 = vld [vmem:[%s9457_s14 + $0x1] sm:$0xff]  ;;  %v6569_v19 = vld [vmem:[%s9457_s14 + $0x9] sm:$0xff]  ;;  %v6570_v38 = vld [vmem:[%s9457_s14 + $0x11] sm:$0xff] }
 0x201   : >> { %8532 = vmatprep.subr.bf16.mxu1 %v8733_v62  ;;  %8282 = vmatprep.subr.bf16.mxu0 %v8733_v62  ;;  %v6616_v34 = vld [vmem:[%s10433_s3 + $0xa0] sm:$0xff]  ;;  %v6617_v28 = vld [vmem:[%s10433_s3 + $0xa8] sm:$0xff]  ;;  %v2042_v9 = vld [vmem:[%s10433_s3 + $0x30] sm:$0xff] }
 0x202   : >> { %v8307_v33 = vpack.c.bf16 %v6617_v28, %v6616_v34  ;;  %v2043_v32 = vld [vmem:[%s10433_s3 + $0x38] sm:$0xff]  ;;  %v6618_v40 = vld [vmem:[%s10433_s3 + $0xb0] sm:$0xff]  ;;  %v6664_v45 = vld [vmem:[%s10433_s3 + $0x100] sm:$0xff] }
 0x203   : >> { %v6619_v41 = vld [vmem:[%s10433_s3 + $0xb8] sm:$0xff]  ;;  %v8298_v43 = vpack.c.bf16 %v2043_v32, %v2042_v9  ;;  %v6665_v47 = vld [vmem:[%s10433_s3 + $0x108] sm:$0xff]  ;;  %v6638_v49 = vld [vmem:[%s10433_s3 + $0xc0] sm:$0xff] }
 0x204   : >> { %8536 = vmatpush3.bf16.msra.mxu1 %v8283_v3  ;;  %8284 = vmatpush3.bf16.msra.mxu0 %v8283_v3  ;;  %v6575_v42 = vld [vmem:[%s9457_s14 + $0x39] sm:$0xff]  ;;  %v8310_v36 = vpack.c.bf16 %v6619_v41, %v6618_v40  ;;  %v6576_v44 = vld [vmem:[%s9457_s14 + $0x41] sm:$0xff]  ;;  %v8325_v46 = vpack.c.bf16 %v6665_v47, %v6664_v45  ;;  %v6666_v53 = vld [vmem:[%s10433_s3 + $0x110] sm:$0xff] }
 0x205   : >> { %8533 = vmatprep.subr.bf16.mxu1 %v8733_v62  ;;  %8285 = vmatprep.subr.bf16.mxu0 %v8733_v62  ;;  %v6571_v39 = vld [vmem:[%s9457_s14 + $0x19] sm:$0xff]  ;;  %v6639_v48 = vld [vmem:[%s10433_s3 + $0xc8] sm:$0xff]  ;;  %v6640_v57 = vld [vmem:[%s10433_s3 + $0xd0] sm:$0xff] }
 0x206   : >> { %v6603_v51 = vld [vmem:[%s9457_s14 + $0x2] sm:$0xff]  ;;  %v6667_v50 = vld [vmem:[%s10433_s3 + $0x118] sm:$0xff]  ;;  %v8313_v52 = vpack.c.bf16 %v6639_v48, %v6638_v49  ;;  %v6604_v59 = vld [vmem:[%s9457_s14 + $0xa] sm:$0xff] }
 0x207   : >> { %v2027_v55 = vld [vmem:[%s9457_s14] sm:$0xff]  ;;  %v6641_v54 = vld [vmem:[%s10433_s3 + $0xd8] sm:$0xff]  ;;  %v8328_v56 = vpack.c.bf16 %v6667_v50, %v6666_v53  ;;  %v6669_v58 = vld [vmem:[%s10433_s3 + $0x128] sm:$0xff] }
 0x208   : >> { %8537 = vmatpush3.bf16.msra.mxu1 %v8286_v15  ;;  %8287 = vmatpush3.bf16.msra.mxu0 %v8286_v15  ;;  %v6668_v61 = vld [vmem:[%s10433_s3 + $0x120] sm:$0xff]  ;;  %v2028_v63 = vld [vmem:[%s9457_s14 + $0x8] sm:$0xff]  ;;  %v8316_v2 = vpack.c.bf16 %v6641_v54, %v6640_v57  ;;  %v9593_v1 = vld [vmem:[%s9457_s14 + $0x12] sm:$0xff] }
 0x209   : >> { %8288 = vmatprep.subr.bf16.mxu1 %v8733_v62  ;;  %8300 = vmatprep.subr.bf16.mxu0 %v8733_v62  ;;  %v6642_v60 = vld [vmem:[%s10433_s3 + $0xe0] sm:$0xff]  ;;  %v6643_v4 = vld [vmem:[%s10433_s3 + $0xe8] sm:$0xff]  ;;  %v8331_v8 = vpack.c.bf16 %v6669_v58, %v6668_v61  ;;  %v6670_v10 = vld [vmem:[%s10433_s3 + $0x130] sm:$0xff] }
 0x20a   : >> { %v6671_v11 = vld [vmem:[%s10433_s3 + $0x138] sm:$0xff]  ;;  %v2029_v3 = vld [vmem:[%s9457_s14 + $0x10] sm:$0xff]  ;;  %v8319_v7 = vpack.c.bf16 %v6643_v4, %v6642_v60  ;;  %v2032_v23 = vld [vmem:[%s9457_s14 + $0x28] sm:$0xff] }
 0x20b   : >> { %7639 = vmatmul.mubr.msk.f32.vlgmr.msra.gmra.mrb[0].mxu1 %vm1927_vm5, %v6572_v5  ;;  %7627 = vmatmul.mubr.msk.f32.vlgmr.msra.gmra.mrb[0].mxu0 %vm1927_vm5, %v6568_v22  ;;  %v6644_v13 = vld [vmem:[%s10433_s3 + $0xf0] sm:$0xff]  ;;  %v6645_v15 = vld [vmem:[%s10433_s3 + $0xf8] sm:$0xff]  ;;  %v8334_v17 = vpack.c.bf16 %v6671_v11, %v6670_v10  ;;  %v9631_v5 = vld [vmem:[%s9457_s14 + $0x22] sm:$0xff] }
 0x20c   : >> { %8290 = vmatpush3.bf16.msra.mxu1 %v8289_v21  ;;  %7641 = vmatprep.mubr.msk.f32.mxu1 %vm8734_vm8, %v8735_v6  ;;  %v9618_v16 = vld [vmem:[%s9457_s14 + $0x1a] sm:$0xff]  ;;  %v8322_v18 = vpack.c.bf16 %v6645_v15, %v6644_v13  ;;  %v9644_v22 = vld [vmem:[%s9457_s14 + $0x2a] sm:$0xff]  ;;  %v9655_v25 = vld [vmem:[%s9457_s14 + $0x32] sm:$0xff] }
 0x20d   : >> { %8291 = vmatprep.subr.bf16.mxu1 %v8733_v62  ;;  %8302 = vmatpush3.bf16.msra.mxu0 %v8301_v20  ;;  %v2030_v14 = vld [vmem:[%s9457_s14 + $0x18] sm:$0xff]  ;;  %v2031_v21 = vld [vmem:[%s9457_s14 + $0x20] sm:$0xff]  ;;  %v2033_v20 = vld [vmem:[%s9457_s14 + $0x30] sm:$0xff] }
 0x20e   : >> { %7629 = vmatprep.mubr.msk.f32.mxu0 %vm8734_vm8, %v8735_v6  ;;  %8303 = vmatprep.subr.bf16.mxu0 %v8733_v62  ;;  %v9666_v26 = vld [vmem:[%s9457_s14 + $0x3a] sm:$0xff]  ;;  %v6657_v45 = vld [vmem:[%s9457_s14 + $0x23] sm:$0xff]  ;;  %v6658_v53 = vld [vmem:[%s9457_s14 + $0x2b] sm:$0xff] }
 0x20f   : >> { %7642 = vmatmul.mubr.msk.f32.gmra.mrb[2].mxu1 %vm1927_vm5, %v6573_v24  ;;  %7630 = vmatmul.mubr.msk.f32.gmra.mrb[2].mxu0 %vm1927_vm5, %v6569_v19  ;;  %v2034_v12 = vld [vmem:[%s9457_s14 + $0x38] sm:$0xff]  ;;  %v9677_v24 = vld [vmem:[%s9457_s14 + $0x42] sm:$0xff]  ;;  %v6770_v10 = vld [vmem:[%s10433_s3 + $0x210] sm:$0xff] }
 0x210   : >> { %8293 = vmatpush3.bf16.msra.mxu1 %v8292_v29  ;;  %7644 = vmatprep.mubr.msk.f32.mxu1 %vm8734_vm8, %v8735_v6  ;;  %v6716_v29 = vld [vmem:[%s10433_s3 + $0x180] sm:$0xff]  ;;  %v6717_v19 = vld [vmem:[%s10433_s3 + $0x188] sm:$0xff]  ;;  %v6655_v34 = vld [vmem:[%s9457_s14 + $0x13] sm:$0xff] }
 0x211   : >> { %8294 = vmatprep.subr.bf16.mxu1 %v8733_v62  ;;  %8305 = vmatpush3.bf16.msra.mxu0 %v8304_v27  ;;  %v2035_v30 = vld [vmem:[%s9457_s14 + $0x40] sm:$0xff]  ;;  %v6691_v27 = vld [vmem:[%s10433_s3 + $0x148] sm:$0xff]  ;;  %v8349_v28 = vpack.c.bf16 %v6717_v19, %v6716_v29  ;;  %v6693_v9 = vld [vmem:[%s10433_s3 + $0x158] sm:$0xff] }
 0x212   : >> { %7632 = vmatprep.mubr.msk.f32.mxu0 %vm8734_vm8, %v8735_v6  ;;  %8306 = vmatprep.subr.bf16.mxu0 %v8733_v62  ;;  %v6690_v31 = vld [vmem:[%s10433_s3 + $0x140] sm:$0xff]  ;;  %v6723_v49 = vld [vmem:[%s10433_s3 + $0x1b8] sm:$0xff]  ;;  %v6743_v4 = vld [vmem:[%s10433_s3 + $0x1c8] sm:$0xff] }
 0x213   : >> { %7645 = vmatmul.mubr.msk.f32.gmra.mrb[4].mxu1 %vm1927_vm5, %v6574_v35  ;;  %7633 = vmatmul.mubr.msk.f32.gmra.mrb[4].mxu0 %vm1927_vm5, %v6570_v38  ;;  %v6718_v35 = vld [vmem:[%s10433_s3 + $0x190] sm:$0xff]  ;;  %v8337_v38 = vpack.c.bf16 %v6691_v27, %v6690_v31  ;;  %v6656_v32 = vld [vmem:[%s9457_s14 + $0x1b] sm:$0xff]  ;;  %v6661_v54 = vld [vmem:[%s9457_s14 + $0x43] sm:$0xff] }
 0x214   : >> { %7647 = vmatprep.mubr.msk.f32.mxu1 %vm8734_vm8, %v8735_v6  ;;  %8296 = vmatpush3.bf16.msra.mxu1 %v8295_v37  ;;  %v6719_v37 = vld [vmem:[%s10433_s3 + $0x198] sm:$0xff]  ;;  %v6720_v41 = vld [vmem:[%s10433_s3 + $0x1a0] sm:$0xff]  ;;  %v6744_v13 = vld [vmem:[%s10433_s3 + $0x1d0] sm:$0xff] }
 0x215   : >> { %8297 = vmatprep.subr.bf16.mxu1 %v8733_v62  ;;  %8308 = vmatpush3.bf16.msra.mxu0 %v8307_v33  ;;  %v6692_v33 = vld [vmem:[%s10433_s3 + $0x150] sm:$0xff]  ;;  %v8352_v40 = vpack.c.bf16 %v6719_v37, %v6718_v35  ;;  %v6660_v57 = vld [vmem:[%s9457_s14 + $0x3b] sm:$0xff]  ;;  %v6715_v37 = vld [vmem:[%s9457_s14 + $0x64] sm:$0xff] }
 0x216   : >> { %7635 = vmatprep.mubr.msk.f32.mxu0 %vm8734_vm8, %v8735_v6  ;;  %8309 = vmatprep.subr.bf16.mxu0 %v8733_v62  ;;  %v6663_v61 = vld [vmem:[%s9457_s14 + $0x53] sm:$0xff]  ;;  %v6768_v58 = vld [vmem:[%s10433_s3 + $0x200] sm:$0xff] }
 0x217   : >> { %7648 = vmatmul.mubr.msk.f32.gmra.mrb[6].mxu1 %vm1927_vm5, %v6575_v42  ;;  %7636 = vmatmul.mubr.msk.f32.gmra.mrb[6].mxu0 %vm1927_vm5, %v6571_v39  ;;  %v6721_v42 = vld [vmem:[%s10433_s3 + $0x1a8] sm:$0xff]  ;;  %v6694_v39 = vld [vmem:[%s10433_s3 + $0x160] sm:$0xff]  ;;  %v6771_v11 = vld [vmem:[%s10433_s3 + $0x218] sm:$0xff] }
 0x218   : >> { %7650 = vmatprep.mubr.msk.f32.mxu1 %vm8734_vm8, %v8735_v6  ;;  %8299 = vmatpush3.bf16.msra.mxu1 %v8298_v43  ;;  %v8340_v43 = vpack.c.bf16 %v6693_v9, %v6692_v33  ;;  %v8355_v47 = vpack.c.bf16 %v6721_v42, %v6720_v41  ;;  %v6742_v60 = vld [vmem:[%s10433_s3 + $0x1c0] sm:$0xff]  ;;  %v6745_v15 = vld [vmem:[%s10433_s3 + $0x1d8] sm:$0xff]  ;;  %v6748_v29 = vld [vmem:[%s10433_s3 + $0x1f0] sm:$0xff] }
 0x219   : >> { %8311 = vmatpush3.bf16.msra.mxu0 %v8310_v36  ;;  %8312 = vmatprep.subr.bf16.mxu1 %v8733_v62  ;;  %v6695_v36 = vld [vmem:[%s10433_s3 + $0x168] sm:$0xff]  ;;  %v6749_v19 = vld [vmem:[%s10433_s3 + $0x1f8] sm:$0xff] }
 0x21a   : >> { %7712 = vmatprep.mubr.msk.f32.mxu0 %vm8734_vm8, %v8735_v6  ;;  %8324 = vmatprep.subr.bf16.mxu0 %v8733_v62  ;;  %v8343_v48 = vpack.c.bf16 %v6695_v36, %v6694_v39  ;;  %v8370_v27 = vpack.c.bf16 %v6749_v19, %v6748_v29  ;;  %v6714_v35 = vld [vmem:[%s9457_s14 + $0x5c] sm:$0xff]  ;;  %v6733_v33 = vld [vmem:[%s9457_s14 + $0x25] sm:$0xff]  ;;  %v6760_v9 = vld [vmem:[%s9457_s14 + $0x2e] sm:$0xff] }
 0x21b   : >> { %7651 = vmatmul.mubr.msk.f32.gmra.mrb[8].mxu1 %vm1927_vm5, %v6576_v44  ;;  %v6722_v44 = vld [vmem:[%s10433_s3 + $0x1b0] sm:$0xff]  ;;  %v6762_v42 = vld [vmem:[%s9457_s14 + $0x3e] sm:$0xff]  ;;  %v6763_v39 = vld [vmem:[%s9457_s14 + $0x46] sm:$0xff] }
 0x21c   : >> { %7669 = vmatprep.mubr.msk.f32.mxu1 %vm8734_vm8, %v8735_v6  ;;  %7713 = vmatmul.mubr.msk.f32.vlgmr.msra.gmra.mrb[8].mxu0 %vm1927_vm5, %v6603_v51  ;;  %v6696_v51 = vld [vmem:[%s10433_s3 + $0x170] sm:$0xff]  ;;  %v8358_v50 = vpack.c.bf16 %v6723_v49, %v6722_v44  ;;  %v6737_v36 = vld [vmem:[%s9457_s14 + $0x45] sm:$0xff] }
 0x21d   : >> { %8326 = vmatpush3.bf16.msra.mxu0 %v8325_v46  ;;  %7715 = vmatprep.mubr.msk.f32.mxu0 %vm8734_vm8, %v8735_v6  ;;  %v6697_v46 = vld [vmem:[%s10433_s3 + $0x178] sm:$0xff] }
 0x21e   : >> { %8327 = vmatprep.subr.bf16.mxu0 %v8733_v62  ;;  %v6735_v41 = vld [vmem:[%s9457_s14 + $0x35] sm:$0xff] }
 0x21f   : >> { %7670 = vmatmul.mubr.msk.f32.vlgmr.msra.gmra.mrb[10].mxu1 %vm1927_vm5, %v2027_v55  ;;  %v8346_v55 = vpack.c.bf16 %v6697_v46, %v6696_v51  ;;  %v6765_v44 = vld [vmem:[%s9457_s14 + $0x56] sm:$0xff]  ;;  %v6767_v46 = vld [vmem:[%s9457_s14 + $0x66] sm:$0xff] }
 0x220   : >> { %8314 = vmatpush3.bf16.msra.mxu1 %v8313_v52  ;;  %7672 = vmatprep.mubr.msk.f32.mxu1 %vm8734_vm8, %v8735_v6  ;;  %v6659_v52 = vld [vmem:[%s9457_s14 + $0x33] sm:$0xff]  ;;  %v6740_v51 = vld [vmem:[%s9457_s14 + $0x5d] sm:$0xff] }
 0x221   : >> { %7716 = vmatmul.mubr.msk.f32.gmra.mrb[10].mxu0 %vm1927_vm5, %v6604_v59  ;;  %8315 = vmatprep.subr.bf16.mxu1 %v8733_v62  ;;  %v6662_v59 = vld [vmem:[%s9457_s14 + $0x4b] sm:$0xff]  ;;  %v6739_v49 = vld [vmem:[%s9457_s14 + $0x55] sm:$0xff] }
 0x222   : >> { %7718 = vmatprep.mubr.msk.f32.mxu0 %vm8734_vm8, %v8735_v6  ;;  %8329 = vmatpush3.bf16.msra.mxu0 %v8328_v56  ;;  %v6636_v56 = vld [vmem:[%s9457_s14 + $0x4a] sm:$0xff] }
 0x223   : >> { %7673 = vmatmul.mubr.msk.f32.gmra.mrb[12].mxu1 %vm1927_vm5, %v2028_v63  ;;  %8330 = vmatprep.subr.bf16.mxu0 %v8733_v62  ;;  %v6769_v63 = vld [vmem:[%s10433_s3 + $0x208] sm:$0xff] }
 0x224   : >> { %7675 = vmatprep.mubr.msk.f32.mxu1 %vm8734_vm8, %v8735_v6  ;;  %8317 = vmatpush3.bf16.msra.mxu1 %v8316_v2  ;;  %v6637_v2 = vld [vmem:[%s9457_s14 + $0x52] sm:$0xff] }
 0x225   : >> { %7719 = vmatmul.mubr.msk.f32.gmra.mrb[12].mxu0 %vm1927_vm5, %v9593_v1  ;;  %8318 = vmatprep.subr.bf16.mxu1 %v8733_v62 }
 0x226   : >> { %7721 = vmatprep.mubr.msk.f32.mxu0 %vm8734_vm8, %v8735_v6  ;;  %8332 = vmatpush3.bf16.msra.mxu0 %v8331_v8  ;;  %v8373_v8 = vpack.c.bf16 %v6769_v63, %v6768_v58 }
 0x227   : >> { %7676 = vmatmul.mubr.msk.f32.gmra.mrb[14].mxu1 %vm1927_vm5, %v2029_v3  ;;  %8333 = vmatprep.subr.bf16.mxu0 %v8733_v62  ;;  %v6681_v3 = vld [vmem:[%s9457_s14 + $0x14] sm:$0xff] }
 0x228   : >> { %7678 = vmatprep.mubr.msk.f32.mxu1 %vm8734_vm8, %v8735_v6  ;;  %8320 = vmatpush3.bf16.msra.mxu1 %v8319_v7  ;;  %v8361_v7 = vpack.c.bf16 %v6743_v4, %v6742_v60 }
 0x229   : >> { %7722 = vmatmul.mubr.msk.f32.gmra.mrb[14].mxu0 %vm1927_vm5, %v9618_v16  ;;  %8321 = vmatprep.subr.bf16.mxu1 %v8733_v62 }
 0x22a   : >> { %7724 = vmatprep.mubr.msk.f32.mxu0 %vm8734_vm8, %v8735_v6  ;;  %8335 = vmatpush3.bf16.msra.mxu0 %v8334_v17  ;;  %v8376_v17 = vpack.c.bf16 %v6771_v11, %v6770_v10 }
 0x22b   : >> { %7679 = vmatmul.mubr.msk.f32.gmra.mrb[16].mxu1 %vm1927_vm5, %v2030_v14  ;;  %8348 = vmatprep.subr.bf16.mxu0 %v8733_v62  ;;  %v6772_v14 = vld [vmem:[%s10433_s3 + $0x220] sm:$0xff] }
 0x22c   : >> { %7681 = vmatprep.mubr.msk.f32.mxu1 %vm8734_vm8, %v8735_v6  ;;  %8323 = vmatpush3.bf16.msra.mxu1 %v8322_v18  ;;  %v6773_v18 = vld [vmem:[%s10433_s3 + $0x228] sm:$0xff] }
 0x22d   : >> { %7725 = vmatmul.mubr.msk.f32.gmra.mrb[16].mxu0 %vm1927_vm5, %v9631_v5  ;;  %8336 = vmatprep.subr.bf16.mxu1 %v8733_v62 }
 0x22e   : >> { %7727 = vmatprep.mubr.msk.f32.mxu0 %vm8734_vm8, %v8735_v6 }
 0x22f   : >> { %7682 = vmatmul.mubr.msk.f32.gmra.mrb[18].mxu1 %vm1927_vm5, %v2031_v21  ;;  %v8364_v21 = vpack.c.bf16 %v6745_v15, %v6744_v13 }
 0x230   : >> { %7684 = vmatprep.mubr.msk.f32.mxu1 %vm8734_vm8, %v8735_v6 }
 0x231   : >> { %7728 = vmatmul.mubr.msk.f32.gmra.mrb[18].mxu0 %vm1927_vm5, %v9644_v22 }
 0x232   : >> { %7730 = vmatprep.mubr.msk.f32.mxu0 %vm8734_vm8, %v8735_v6 }
 0x233   : >> { %7685 = vmatmul.mubr.msk.f32.gmra.mrb[20].mxu1 %vm1927_vm5, %v2032_v23  ;;  %v6747_v23 = vld [vmem:[%s10433_s3 + $0x1e8] sm:$0xff] }
 0x234   : >> { %7687 = vmatprep.mubr.msk.f32.mxu1 %vm8734_vm8, %v8735_v6 }
 0x235   : >> { %7731 = vmatmul.mubr.msk.f32.gmra.mrb[20].mxu0 %vm1927_vm5, %v9655_v25 }
 0x236   : >> { %7733 = vmatprep.mubr.msk.f32.mxu0 %vm8734_vm8, %v8735_v6 }
 0x237   : >> { %7688 = vmatmul.mubr.msk.f32.gmra.mrb[22].mxu1 %vm1927_vm5, %v2033_v20  ;;  %v8379_v20 = vpack.c.bf16 %v6773_v18, %v6772_v14 }
 0x238   : >> { %7690 = vmatprep.mubr.msk.f32.mxu1 %vm8734_vm8, %v8735_v6 }
 0x239   : >> { %7734 = vmatmul.mubr.msk.f32.gmra.mrb[22].mxu0 %vm1927_vm5, %v9666_v26 }
 0x23a   : >> { %7736 = vmatprep.mubr.msk.f32.mxu0 %vm8734_vm8, %v8735_v6 }
 0x23b   : >> { %7691 = vmatmul.mubr.msk.f32.gmra.mrb[24].mxu1 %vm1927_vm5, %v2034_v12  ;;  %v6775_v12 = vld [vmem:[%s10433_s3 + $0x238] sm:$0xff] }
 0x23c   : >> { %7693 = vmatprep.mubr.msk.f32.mxu1 %vm8734_vm8, %v8735_v6 }
 0x23d   : >> { %7737 = vmatmul.mubr.msk.f32.gmra.mrb[24].mxu0 %vm1927_vm5, %v9677_v24 }
 0x23e   : >> { %7798 = vmatprep.mubr.msk.f32.mxu0 %vm8734_vm8, %v8735_v6 }
 0x23f   : >> { %7694 = vmatmul.mubr.msk.f32.gmra.mrb[26].mxu1 %vm1927_vm5, %v2035_v30  ;;  %v6710_v30 = vld [vmem:[%s9457_s14 + $0x3c] sm:$0xff] }
 0x240   : >> { %7755 = vmatprep.mubr.msk.f32.mxu1 %vm8734_vm8, %v8735_v6 }
 0x241   : >> { %7799 = vmatmul.mubr.msk.f32.vlgmr.msra.gmra.mrb[26].mxu0 %vm1927_vm5, %v6655_v34  ;;  %v6711_v34 = vld [vmem:[%s9457_s14 + $0x44] sm:$0xff] }
 0x242   : >> { %8350 = vmatpush3.bf16.msra.mxu0 %v8349_v28  ;;  %7801 = vmatprep.mubr.msk.f32.mxu0 %vm8734_vm8, %v8735_v6  ;;  %v6712_v28 = vld [vmem:[%s9457_s14 + $0x4c] sm:$0xff] }
 0x243   : >> { %7756 = vmatmul.mubr.msk.f32.vlgmr.msra.gmra.mrb[28].mxu1 %vm1927_vm5, %v9593_v1  ;;  %8351 = vmatprep.subr.bf16.mxu0 %v8733_v62  ;;  %v6707_v1 = vld [vmem:[%s9457_s14 + $0x24] sm:$0xff] }
 0x244   : >> { %8338 = vmatpush3.bf16.msra.mxu1 %v8337_v38  ;;  %7758 = vmatprep.mubr.msk.f32.mxu1 %vm8734_vm8, %v8735_v6  ;;  %v6759_v38 = vld [vmem:[%s9457_s14 + $0x26] sm:$0xff] }
 0x245   : >> { %7802 = vmatmul.mubr.msk.f32.gmra.mrb[28].mxu0 %vm1927_vm5, %v6656_v32  ;;  %8339 = vmatprep.subr.bf16.mxu1 %v8733_v62  ;;  %v6734_v32 = vld [vmem:[%s9457_s14 + $0x2d] sm:$0xff] }
 0x246   : >> { %7804 = vmatprep.mubr.msk.f32.mxu0 %vm8734_vm8, %v8735_v6  ;;  %8353 = vmatpush3.bf16.msra.mxu0 %v8352_v40  ;;  %v6761_v40 = vld [vmem:[%s9457_s14 + $0x36] sm:$0xff] }
 0x247   : >> { %7759 = vmatmul.mubr.msk.f32.gmra.mrb[30].mxu1 %vm1927_vm5, %v9618_v16  ;;  %8354 = vmatprep.subr.bf16.mxu0 %v8733_v62  ;;  %v6708_v16 = vld [vmem:[%s9457_s14 + $0x2c] sm:$0xff] }
 0x248   : >> { %7761 = vmatprep.mubr.msk.f32.mxu1 %vm8734_vm8, %v8735_v6  ;;  %8341 = vmatpush3.bf16.msra.mxu1 %v8340_v43  ;;  %v6736_v43 = vld [vmem:[%s9457_s14 + $0x3d] sm:$0xff] }
 0x249   : >> { %7805 = vmatmul.mubr.msk.f32.gmra.mrb[30].mxu0 %vm1927_vm5, %v6657_v45  ;;  %8342 = vmatprep.subr.bf16.mxu1 %v8733_v62  ;;  %v6764_v45 = vld [vmem:[%s9457_s14 + $0x4e] sm:$0xff] }
 0x24a   : >> { %7807 = vmatprep.mubr.msk.f32.mxu0 %vm8734_vm8, %v8735_v6  ;;  %8356 = vmatpush3.bf16.msra.mxu0 %v8355_v47  ;;  %v6738_v47 = vld [vmem:[%s9457_s14 + $0x4d] sm:$0xff] }
 0x24b   : >> { %7762 = vmatmul.mubr.msk.f32.gmra.mrb[32].mxu1 %vm1927_vm5, %v9631_v5  ;;  %8357 = vmatprep.subr.bf16.mxu0 %v8733_v62  ;;  %v6682_v5 = vld [vmem:[%s9457_s14 + $0x1c] sm:$0xff] }
 0x24c   : >> { %7764 = vmatprep.mubr.msk.f32.mxu1 %vm8734_vm8, %v8735_v6  ;;  %8344 = vmatpush3.bf16.msra.mxu1 %v8343_v48  ;;  %v6766_v48 = vld [vmem:[%s9457_s14 + $0x5e] sm:$0xff] }
 0x24d   : >> { %7808 = vmatmul.mubr.msk.f32.gmra.mrb[32].mxu0 %vm1927_vm5, %v6658_v53  ;;  %8345 = vmatprep.subr.bf16.mxu1 %v8733_v62  ;;  %v6741_v53 = vld [vmem:[%s9457_s14 + $0x65] sm:$0xff] }
 0x24e   : >> { %7810 = vmatprep.mubr.msk.f32.mxu0 %vm8734_vm8, %v8735_v6  ;;  %8359 = vmatpush3.bf16.msra.mxu0 %v8358_v50 }
 0x24f   : >> { %7765 = vmatmul.mubr.msk.f32.gmra.mrb[34].mxu1 %vm1927_vm5, %v9644_v22  ;;  %8372 = vmatprep.subr.bf16.mxu0 %v8733_v62  ;;  %v6746_v22 = vld [vmem:[%s10433_s3 + $0x1e0] sm:$0xff] }
 0x250   : >> { %7767 = vmatprep.mubr.msk.f32.mxu1 %vm8734_vm8, %v8735_v6  ;;  %8347 = vmatpush3.bf16.msra.mxu1 %v8346_v55 }
 0x251   : >> { %7811 = vmatmul.mubr.msk.f32.gmra.mrb[34].mxu0 %vm1927_vm5, %v6659_v52  ;;  %8360 = vmatprep.subr.bf16.mxu1 %v8733_v62 }
 0x252   : >> { %7813 = vmatprep.mubr.msk.f32.mxu0 %vm8734_vm8, %v8735_v6 }
 0x253   : >> { %7768 = vmatmul.mubr.msk.f32.gmra.mrb[36].mxu1 %vm1927_vm5, %v9655_v25  ;;  %v6709_v25 = vld [vmem:[%s9457_s14 + $0x34] sm:$0xff] }
 0x254   : >> { %7770 = vmatprep.mubr.msk.f32.mxu1 %vm8734_vm8, %v8735_v6 }
 0x255   : >> { %7814 = vmatmul.mubr.msk.f32.gmra.mrb[36].mxu0 %vm1927_vm5, %v6660_v57 }
 0x256   : >> { %7816 = vmatprep.mubr.msk.f32.mxu0 %vm8734_vm8, %v8735_v6 }
 0x257   : >> { %7771 = vmatmul.mubr.msk.f32.gmra.mrb[38].mxu1 %vm1927_vm5, %v9666_v26  ;;  %v6774_v26 = vld [vmem:[%s10433_s3 + $0x230] sm:$0xff] }
 0x258   : >> { %7773 = vmatprep.mubr.msk.f32.mxu1 %vm8734_vm8, %v8735_v6  ;;  %v8382_v31 = vpack.c.bf16 %v6775_v12, %v6774_v26 }
 0x259   : >> { %7817 = vmatmul.mubr.msk.f32.gmra.mrb[38].mxu0 %vm1927_vm5, %v6661_v54 }
 0x25a   : >> { %7819 = vmatprep.mubr.msk.f32.mxu0 %vm8734_vm8, %v8735_v6 }
 0x25b   : >> { %7774 = vmatmul.mubr.msk.f32.gmra.mrb[40].mxu1 %vm1927_vm5, %v9677_v24  ;;  %v8367_v24 = vpack.c.bf16 %v6747_v23, %v6746_v22 }
 0x25c   : >> { %7776 = vmatprep.mubr.msk.f32.mxu1 %vm8734_vm8, %v8735_v6 }
 0x25d   : >> { %7820 = vmatmul.mubr.msk.f32.gmra.mrb[40].mxu0 %vm1927_vm5, %v6662_v59 }
 0x25e   : >> { %7822 = vmatprep.mubr.msk.f32.mxu0 %vm8734_vm8, %v8735_v6 }
 0x25f   : >> { %7777 = vmatmul.mubr.msk.f32.gmra.mrb[42].mxu1 %vm1927_vm5, %v6636_v56 }
 0x260   : >> { %7779 = vmatprep.mubr.msk.f32.mxu1 %vm8734_vm8, %v8735_v6 }
 0x261   : >> { %7823 = vmatmul.mubr.msk.f32.gmra.mrb[42].mxu0 %vm1927_vm5, %v6663_v61 }
 0x262   : >> { %7884 = vmatprep.mubr.msk.f32.mxu0 %vm8734_vm8, %v8735_v6 }
 0x263   : >> { %7780 = vmatmul.mubr.msk.f32.gmra.mrb[44].mxu1 %vm1927_vm5, %v6637_v2 }
 0x264   : >> { %7841 = vmatprep.mubr.msk.f32.mxu1 %vm8734_vm8, %v8735_v6 }
 0x265   : >> { %7885 = vmatmul.mubr.msk.f32.vlgmr.msra.gmra.mrb[44].mxu0 %vm1927_vm5, %v6707_v1 }
 0x266   : >> { %8374 = vmatpush3.bf16.msra.mxu0 %v8373_v8  ;;  %7887 = vmatprep.mubr.msk.f32.mxu0 %vm8734_vm8, %v8735_v6 }
 0x267   : >> { %7842 = vmatmul.mubr.msk.f32.vlgmr.msra.gmra.mrb[46].mxu1 %vm1927_vm5, %v6681_v3  ;;  %8375 = vmatprep.subr.bf16.mxu0 %v8733_v62 }
 0x268   : >> { %8362 = vmatpush3.bf16.msra.mxu1 %v8361_v7  ;;  %7844 = vmatprep.mubr.msk.f32.mxu1 %vm8734_vm8, %v8735_v6 }
 0x269   : >> { %7888 = vmatmul.mubr.msk.f32.gmra.mrb[46].mxu0 %vm1927_vm5, %v6708_v16  ;;  %8363 = vmatprep.subr.bf16.mxu1 %v8733_v62 }
 0x26a   : >> { %7890 = vmatprep.mubr.msk.f32.mxu0 %vm8734_vm8, %v8735_v6  ;;  %8377 = vmatpush3.bf16.msra.mxu0 %v8376_v17 }
 0x26b   : >> { %7845 = vmatmul.mubr.msk.f32.gmra.mrb[48].mxu1 %vm1927_vm5, %v6682_v5  ;;  %8378 = vmatprep.subr.bf16.mxu0 %v8733_v62 }
 0x26c   : >> { %7847 = vmatprep.mubr.msk.f32.mxu1 %vm8734_vm8, %v8735_v6  ;;  %8365 = vmatpush3.bf16.msra.mxu1 %v8364_v21 }
 0x26d   : >> { %7891 = vmatmul.mubr.msk.f32.gmra.mrb[48].mxu0 %vm1927_vm5, %v6709_v25  ;;  %8366 = vmatprep.subr.bf16.mxu1 %v8733_v62 }
 0x26e   : >> { %7893 = vmatprep.mubr.msk.f32.mxu0 %vm8734_vm8, %v8735_v6  ;;  %8380 = vmatpush3.bf16.msra.mxu0 %v8379_v20 }
 0x26f   : >> { %7848 = vmatmul.mubr.msk.f32.gmra.mrb[50].mxu1 %vm1927_vm5, %v6707_v1  ;;  %8381 = vmatprep.subr.bf16.mxu0 %v8733_v62 }
 0x270   : >> { %7850 = vmatprep.mubr.msk.f32.mxu1 %vm8734_vm8, %v8735_v6  ;;  %8368 = vmatpush3.bf16.msra.mxu1 %v8367_v24 }
 0x271   : >> { %7894 = vmatmul.mubr.msk.f32.gmra.mrb[50].mxu0 %vm1927_vm5, %v6710_v30  ;;  %8369 = vmatprep.subr.bf16.mxu1 %v8733_v62  ;;  %v6713_v62 = vld [vmem:[%s9457_s14 + $0x54] sm:$0xff] }
 0x272   : >> { %7896 = vmatprep.mubr.msk.f32.mxu0 %vm8734_vm8, %v8735_v6  ;;  %8383 = vmatpush3.bf16.msra.mxu0 %v8382_v31 }
 0x273   : >> { %7851 = vmatmul.mubr.msk.f32.gmra.mrb[52].mxu1 %vm1927_vm5, %v6708_v16 }
 0x274   : >> { %7853 = vmatprep.mubr.msk.f32.mxu1 %vm8734_vm8, %v8735_v6  ;;  %8371 = vmatpush3.bf16.msra.mxu1 %v8370_v27 }
 0x275   : >> { %7897 = vmatmul.mubr.msk.f32.gmra.mrb[52].mxu0 %vm1927_vm5, %v6711_v34 }
 0x276   : >> { %7899 = vmatprep.mubr.msk.f32.mxu0 %vm8734_vm8, %v8735_v6 }
 0x277   : >> { %7854 = vmatmul.mubr.msk.f32.gmra.mrb[54].mxu1 %vm1927_vm5, %v6709_v25 }
 0x278   : >> { %7856 = vmatprep.mubr.msk.f32.mxu1 %vm8734_vm8, %v8735_v6 }
 0x279   : >> { %7900 = vmatmul.mubr.msk.f32.gmra.mrb[54].mxu0 %vm1927_vm5, %v6712_v28 }
 0x27a   : >> { %7902 = vmatprep.mubr.msk.f32.mxu0 %vm8734_vm8, %v8735_v6 }
 0x27b   : >> { %7857 = vmatmul.mubr.msk.f32.gmra.mrb[56].mxu1 %vm1927_vm5, %v6710_v30 }
 0x27c   : >> { %7859 = vmatprep.mubr.msk.f32.mxu1 %vm8734_vm8, %v8735_v6 }
 0x27d   : >> { %7903 = vmatmul.mubr.msk.f32.gmra.mrb[56].mxu0 %vm1927_vm5, %v6713_v62 }
 0x27e   : >> { %7905 = vmatprep.mubr.msk.f32.mxu0 %vm8734_vm8, %v8735_v6 }
 0x27f   : >> { %7860 = vmatmul.mubr.msk.f32.gmra.mrb[58].mxu1 %vm1927_vm5, %v6711_v34 }
 0x280   : >> { %7862 = vmatprep.mubr.msk.f32.mxu1 %vm8734_vm8, %v8735_v6 }
 0x281   : >> { %7906 = vmatmul.mubr.msk.f32.gmra.mrb[58].mxu0 %vm1927_vm5, %v6714_v35 }
 0x282   : >> { %7908 = vmatprep.mubr.msk.f32.mxu0 %vm8734_vm8, %v8735_v6 }
 0x283   : >> { %7863 = vmatmul.mubr.msk.f32.gmra.mrb[60].mxu1 %vm1927_vm5, %v6712_v28 }
 0x284   : >> { %7865 = vmatprep.mubr.msk.f32.mxu1 %vm8734_vm8, %v8735_v6 }
 0x285   : >> { %7909 = vmatmul.mubr.msk.f32.gmra.mrb[60].mxu0 %vm1927_vm5, %v6715_v37 }
 0x286   : >> { %7970 = vmatprep.mubr.msk.f32.mxu0 %vm8734_vm8, %v8735_v6 }
 0x287   : >> { %7866 = vmatmul.mubr.msk.f32.gmra.mrb[62].mxu1 %vm1927_vm5, %v6713_v62 }
 0x288   : >> { %7927 = vmatprep.mubr.msk.f32.mxu1 %vm8734_vm8, %v8735_v6 }
 0x289   : >> { %7971 = vmatmul.mubr.msk.f32.vlgmr.msra.gmra.mrb[62].mxu0 %vm1927_vm5, %v6759_v38 }
 0x28a   : >> { %7973 = vmatprep.mubr.msk.f32.mxu0 %vm8734_vm8, %v8735_v6 }
 0x28b   : >> { %7928 = vmatmul.mubr.msk.f32.vlgmr.msra.gmra.mrb[64].mxu1 %vm1927_vm5, %v6733_v33 }
 0x28c   : >> { %7930 = vmatprep.mubr.msk.f32.mxu1 %vm8734_vm8, %v8735_v6 }
 0x28d   : >> { %7974 = vmatmul.mubr.msk.f32.gmra.mrb[64].mxu0 %vm1927_vm5, %v6760_v9 }
 0x28e   : >> { %7976 = vmatprep.mubr.msk.f32.mxu0 %vm8734_vm8, %v8735_v6 }
 0x28f   : >> { %7931 = vmatmul.mubr.msk.f32.gmra.mrb[66].mxu1 %vm1927_vm5, %v6734_v32 }
 0x290   : >> { %7933 = vmatprep.mubr.msk.f32.mxu1 %vm8734_vm8, %v8735_v6 }
 0x291   : >> { %7977 = vmatmul.mubr.msk.f32.gmra.mrb[66].mxu0 %vm1927_vm5, %v6761_v40 }
 0x292   : >> { %7979 = vmatprep.mubr.msk.f32.mxu0 %vm8734_vm8, %v8735_v6 }
 0x293   : >> { %7934 = vmatmul.mubr.msk.f32.gmra.mrb[68].mxu1 %vm1927_vm5, %v6735_v41 }
 0x294   : >> { %7936 = vmatprep.mubr.msk.f32.mxu1 %vm8734_vm8, %v8735_v6 }
 0x295   : >> { %7980 = vmatmul.mubr.msk.f32.gmra.mrb[68].mxu0 %vm1927_vm5, %v6762_v42 }
 0x296   : >> { %7982 = vmatprep.mubr.msk.f32.mxu0 %vm8734_vm8, %v8735_v6 }
 0x297   : >> { %7937 = vmatmul.mubr.msk.f32.gmra.mrb[70].mxu1 %vm1927_vm5, %v6736_v43 }
 0x298   : >> { %7939 = vmatprep.mubr.msk.f32.mxu1 %vm8734_vm8, %v8735_v6 }
 0x299   : >> { %7983 = vmatmul.mubr.msk.f32.gmra.mrb[70].mxu0 %vm1927_vm5, %v6763_v39 }
 0x29a   : >> { %7985 = vmatprep.mubr.msk.f32.mxu0 %vm8734_vm8, %v8735_v6 }
 0x29b   : >> { %7940 = vmatmul.mubr.msk.f32.gmra.mrb[72].mxu1 %vm1927_vm5, %v6737_v36 }
 0x29c   : >> { %7942 = vmatprep.mubr.msk.f32.mxu1 %vm8734_vm8, %v8735_v6 }
 0x29d   : >> { %7986 = vmatmul.mubr.msk.f32.gmra.mrb[72].mxu0 %vm1927_vm5, %v6764_v45 }
 0x29e   : >> { %7988 = vmatprep.mubr.msk.f32.mxu0 %vm8734_vm8, %v8735_v6 }
 0x29f   : >> { %7943 = vmatmul.mubr.msk.f32.gmra.mrb[74].mxu1 %vm1927_vm5, %v6738_v47 }
 0x2a0   : >> { %7945 = vmatprep.mubr.msk.f32.mxu1 %vm8734_vm8, %v8735_v6 }
 0x2a1   : >> { %7989 = vmatmul.mubr.msk.f32.gmra.mrb[74].mxu0 %vm1927_vm5, %v6765_v44 }
 0x2a2   : >> { %7991 = vmatprep.mubr.msk.f32.mxu0 %vm8734_vm8, %v8735_v6 }
 0x2a3   : >> { %7946 = vmatmul.mubr.msk.f32.gmra.mrb[76].mxu1 %vm1927_vm5, %v6739_v49 }
 0x2a4   : >> { %7948 = vmatprep.mubr.msk.f32.mxu1 %vm8734_vm8, %v8735_v6 }
 0x2a5   : >> { %7992 = vmatmul.mubr.msk.f32.gmra.mrb[76].mxu0 %vm1927_vm5, %v6766_v48 }
 0x2a6   : >> { %7994 = vmatprep.mubr.msk.f32.mxu0 %vm8734_vm8, %v8735_v6 }
 0x2a7   : >> { %7949 = vmatmul.mubr.msk.f32.gmra.mrb[78].mxu1 %vm1927_vm5, %v6740_v51 }
 0x2a8   : >> { %7951 = vmatprep.mubr.msk.f32.mxu1 %vm8734_vm8, %v8735_v6 }
 0x2a9   : >> { %7995 = vmatmul.mubr.msk.f32.gmra.mrb[78].mxu0 %vm1927_vm5, %v6767_v46 }
 0x2ab   : >> { %7952 = vmatmul.mubr.msk.f32.gmra.mrb[80].mxu1 %vm1927_vm5, %v6741_v53 }
 0x2de   : >> { %v2177_v50 = vpop.f32.mrb[0].mxu1  ;;  %v2157_v55 = vpop.f32.mrb[0].mxu0 }
 0x2df   : >> { %v7640_v52 = vpop.f32.mrb[1].mxu1  ;;  %v7628_v57 = vpop.f32.mrb[1].mxu0 }
 0x2e2   : >> { %v2182_v54 = vpop.f32.mrb[2].mxu1  ;;  %v2162_v59 = vpop.f32.mrb[2].mxu0 }
 0x2e3   : >> { %v7643_v56 = vpop.f32.mrb[3].mxu1  ;;  %v7631_v61 = vpop.f32.mrb[3].mxu0 }
 0x2e6   : >> { %v2187_v58 = vpop.f32.mrb[4].mxu1  ;;  %v2167_v63 = vpop.f32.mrb[4].mxu0 }
 0x2e7   : >> { %v7646_v2 = vpop.f32.mrb[5].mxu1  ;;  %v7634_v60 = vpop.f32.mrb[5].mxu0 }
 0x2ea   : >> { %v2192_v4 = vpop.f32.mrb[6].mxu1  ;;  %v2172_v1 = vpop.f32.mrb[6].mxu0 }
 0x2eb   : >> { %v7649_v6 = vpop.f32.mrb[7].mxu1  ;;  %v7637_v8 = vpop.f32.mrb[7].mxu0 }
 0x2ee   : >> { %v2197_v10 = vpop.f32.mrb[8].mxu1 }
 0x2ef   : >> { %v7652_v11 = vpop.f32.mrb[9].mxu1  ;;  %v2451_v3 = vpop.f32.mrb[8].mxu0 }
 0x2f0   : >> { %v7714_v7 = vpop.f32.mrb[9].mxu0 }
 0x2f2   : >> { %v2294_v13 = vpop.f32.mrb[10].mxu1 }
 0x2f3   : >> { %v2295_v15 = vadd.f32 %v2294_v13, %v2157_v55  ;;  %v7671_v16 = vpop.f32.mrb[11].mxu1 }
 0x2f4   : >> { %v2456_v17 = vpop.f32.mrb[10].mxu0 }
 0x2f5   : >> { %v2495_v14 = vadd.f32 %v2451_v3, %v2295_v15  ;;  %v7717_v18 = vpop.f32.mrb[11].mxu0 }
 0x2f6   : >> { %v2299_v5 = vpop.f32.mrb[12].mxu1 }
 0x2f7   : >> { %v2300_v21 = vadd.f32 %v2299_v5, %v2162_v59  ;;  %v7674_v22 = vpop.f32.mrb[13].mxu1 }
 0x2f8   : >> { %v2461_v23 = vpop.f32.mrb[12].mxu0 }
 0x2f9   : >> { %v2496_v25 = vadd.f32 %v2456_v17, %v2300_v21  ;;  %v7720_v20 = vpop.f32.mrb[13].mxu0 }
 0x2fa   : >> { %v2304_v26 = vpop.f32.mrb[14].mxu1 }
 0x2fb   : >> { %v2305_v12 = vadd.f32 %v2304_v26, %v2167_v63  ;;  %v7677_v24 = vpop.f32.mrb[15].mxu1 }
 0x2fc   : >> { %v2466_v29 = vpop.f32.mrb[14].mxu0 }
 0x2fd   : >> { %v2497_v19 = vadd.f32 %v2461_v23, %v2305_v12  ;;  %v7723_v30 = vpop.f32.mrb[15].mxu0 }
 0x2fe   : >> { %v2309_v31 = vpop.f32.mrb[16].mxu1 }
 0x2ff   : >> { %v2310_v27 = vadd.f32 %v2309_v31, %v2172_v1  ;;  %v7680_v34 = vpop.f32.mrb[17].mxu1 }
 0x300   : >> { %v2471_v28 = vpop.f32.mrb[16].mxu0 }
 0x301   : >> { %v2498_v62 = vadd.f32 %v2466_v29, %v2310_v27  ;;  %v7726_v35 = vpop.f32.mrb[17].mxu0 }
 0x302   : >> { %v2314_v37 = vpop.f32.mrb[18].mxu1 }
 0x303   : >> { %v2315_v38 = vadd.f32 %v2314_v37, %v2177_v50  ;;  %v7683_v33 = vpop.f32.mrb[19].mxu1 }
 0x304   : >> { %v2476_v9 = vpop.f32.mrb[18].mxu0 }
 0x305   : >> { %v2499_v32 = vadd.f32 %v2471_v28, %v2315_v38  ;;  %v7729_v40 = vpop.f32.mrb[19].mxu0 }
 0x306   : >> { %v2319_v41 = vpop.f32.mrb[20].mxu1 }
 0x307   : >> { %v2320_v42 = vadd.f32 %v2319_v41, %v2182_v54  ;;  %v7686_v43 = vpop.f32.mrb[21].mxu1 }
 0x308   : >> { %v2481_v39 = vpop.f32.mrb[20].mxu0 }
 0x309   : >> { %v2500_v36 = vadd.f32 %v2476_v9, %v2320_v42  ;;  %v7732_v45 = vpop.f32.mrb[21].mxu0 }
 0x30a   : >> { %v2324_v47 = vpop.f32.mrb[22].mxu1 }
 0x30b   : >> { %v2325_v44 = vadd.f32 %v2324_v47, %v2187_v58  ;;  %v7689_v49 = vpop.f32.mrb[23].mxu1 }
 0x30c   : >> { %v2486_v48 = vpop.f32.mrb[22].mxu0 }
 0x30d   : >> { %v2501_v51 = vadd.f32 %v2481_v39, %v2325_v44  ;;  %v7735_v46 = vpop.f32.mrb[23].mxu0 }
 0x30e   : >> { %v2329_v53 = vpop.f32.mrb[24].mxu1 }
 0x30f   : >> { %v2330_v55 = vadd.f32 %v2329_v53, %v2192_v4  ;;  %v7692_v52 = vpop.f32.mrb[25].mxu1 }
 0x310   : >> { %v2491_v50 = vpop.f32.mrb[24].mxu0 }
 0x311   : >> { %v2502_v57 = vadd.f32 %v2486_v48, %v2330_v55  ;;  %v7738_v59 = vpop.f32.mrb[25].mxu0 }
 0x312   : >> { %v2334_v56 = vpop.f32.mrb[26].mxu1 }
 0x313   : >> { %v2335_v61 = vadd.f32 %v2334_v56, %v2197_v10  ;;  %v7695_v63 = vpop.f32.mrb[27].mxu1 }
 0x314   : >> { %v2783_v54 = vpop.f32.mrb[26].mxu0 }
 0x315   : >> { %v2503_v2 = vadd.f32 %v2491_v50, %v2335_v61  ;;  %v7800_v60 = vpop.f32.mrb[27].mxu0 }
 0x316   : >> { %v2617_v1 = vpop.f32.mrb[28].mxu1 }
 0x317   : >> { %v2661_v6 = vadd.f32 %v2617_v1, %v2495_v14  ;;  %v7757_v8 = vpop.f32.mrb[29].mxu1 }
 0x318   : >> { %v2788_v58 = vpop.f32.mrb[28].mxu0 }
 0x319   : >> { %v2827_v11 = vadd.f32 %v2783_v54, %v2661_v6  ;;  %v7803_v3 = vpop.f32.mrb[29].mxu0 }
 0x31a   : >> { %v2622_v7 = vpop.f32.mrb[30].mxu1 }
 0x31b   : >> { %v2662_v13 = vadd.f32 %v2622_v7, %v2496_v25  ;;  %v7760_v15 = vpop.f32.mrb[31].mxu1 }
 0x31c   : >> { %v2793_v4 = vpop.f32.mrb[30].mxu0 }
 0x31d   : >> { %v2828_v16 = vadd.f32 %v2788_v58, %v2662_v13  ;;  %v7806_v17 = vpop.f32.mrb[31].mxu0 }
 0x31e   : >> { %v2627_v18 = vpop.f32.mrb[32].mxu1 }
 0x31f   : >> { %v2663_v5 = vadd.f32 %v2627_v18, %v2497_v19  ;;  %v7763_v21 = vpop.f32.mrb[33].mxu1 }
 0x320   : >> { %v2798_v10 = vpop.f32.mrb[32].mxu0 }
 0x321   : >> { %v2829_v22 = vadd.f32 %v2793_v4, %v2663_v5  ;;  %v7809_v23 = vpop.f32.mrb[33].mxu0 }
 0x322   : >> { %v2632_v20 = vpop.f32.mrb[34].mxu1 }
 0x323   : >> { %v2664_v26 = vadd.f32 %v2632_v20, %v2498_v62  ;;  %v7766_v12 = vpop.f32.mrb[35].mxu1 }
 0x324   : >> { %v2803_v14 = vpop.f32.mrb[34].mxu0 }
 0x325   : >> { %v2830_v24 = vadd.f32 %v2798_v10, %v2664_v26  ;;  %v7812_v29 = vpop.f32.mrb[35].mxu0 }
 0x326   : >> { %v2637_v30 = vpop.f32.mrb[36].mxu1 }
 0x327   : >> { %v2665_v31 = vadd.f32 %v2637_v30, %v2499_v32  ;;  %v7769_v27 = vpop.f32.mrb[37].mxu1 }
 0x328   : >> { %v2808_v25 = vpop.f32.mrb[36].mxu0 }
 0x329   : >> { %v2831_v34 = vadd.f32 %v2803_v14, %v2665_v31  ;;  %v7815_v28 = vpop.f32.mrb[37].mxu0 }
 0x32a   : >> { %v2642_v35 = vpop.f32.mrb[38].mxu1 }
 0x32b   : >> { %v2666_v37 = vadd.f32 %v2642_v35, %v2500_v36  ;;  %v7772_v38 = vpop.f32.mrb[39].mxu1 }
 0x32c   : >> { %v2813_v19 = vpop.f32.mrb[38].mxu0 }
 0x32d   : >> { %v2832_v33 = vadd.f32 %v2808_v25, %v2666_v37  ;;  %v7818_v9 = vpop.f32.mrb[39].mxu0 }
 0x32e   : >> { %v2647_v40 = vpop.f32.mrb[40].mxu1 }
 0x32f   : >> { %v2667_v41 = vadd.f32 %v2647_v40, %v2501_v51  ;;  %v7775_v42 = vpop.f32.mrb[41].mxu1 }
 0x330   : >> { %v2818_v62 = vpop.f32.mrb[40].mxu0 }
 0x331   : >> { %v2833_v43 = vadd.f32 %v2813_v19, %v2667_v41  ;;  %v7821_v39 = vpop.f32.mrb[41].mxu0 }
 0x332   : >> { %v2652_v45 = vpop.f32.mrb[42].mxu1 }
 0x333   : >> { %v2668_v47 = vadd.f32 %v2652_v45, %v2502_v57  ;;  %v7778_v44 = vpop.f32.mrb[43].mxu1 }
 0x334   : >> { %v2823_v32 = vpop.f32.mrb[42].mxu0 }
 0x335   : >> { %v2834_v49 = vadd.f32 %v2818_v62, %v2668_v47  ;;  %v7824_v48 = vpop.f32.mrb[43].mxu0 }
 0x336   : >> { %v2657_v46 = vpop.f32.mrb[44].mxu1 }
 0x337   : >> { %v2669_v53 = vadd.f32 %v2657_v46, %v2503_v2  ;;  %v7781_v55 = vpop.f32.mrb[45].mxu1 }
 0x338   : >> { %v3115_v36 = vpop.f32.mrb[44].mxu0 }
 0x339   : >> { %v2835_v52 = vadd.f32 %v2823_v32, %v2669_v53  ;;  %v7886_v50 = vpop.f32.mrb[45].mxu0 }
 0x33a   : >> { %v2949_v59 = vpop.f32.mrb[46].mxu1 }
 0x33b   : >> { %v2993_v56 = vadd.f32 %v2949_v59, %v2827_v11  ;;  %v7843_v61 = vpop.f32.mrb[47].mxu1 }
 0x33c   : >> { %v3120_v51 = vpop.f32.mrb[46].mxu0 }
 0x33d   : >> { %v3159_v63 = vadd.f32 %v3115_v36, %v2993_v56  ;;  %v7889_v54 = vpop.f32.mrb[47].mxu0 }
 0x33e   : >> { %v2954_v60 = vpop.f32.mrb[48].mxu1 }
 0x33f   : >> { %v2994_v1 = vadd.f32 %v2954_v60, %v2828_v16  ;;  %v7846_v6 = vpop.f32.mrb[49].mxu1 }
 0x340   : >> { %v3125_v57 = vpop.f32.mrb[48].mxu0 }
 0x341   : >> { %v3160_v8 = vadd.f32 %v3120_v51, %v2994_v1  ;;  %v7892_v58 = vpop.f32.mrb[49].mxu0 }
 0x342   : >> { %v2959_v3 = vpop.f32.mrb[50].mxu1 }
 0x343   : >> { %v2995_v7 = vadd.f32 %v2959_v3, %v2829_v22  ;;  %v7849_v13 = vpop.f32.mrb[51].mxu1 }
 0x344   : >> { %v3130_v2 = vpop.f32.mrb[50].mxu0 }
 0x345   : >> { %v3161_v15 = vadd.f32 %v3125_v57, %v2995_v7  ;;  %v7895_v4 = vpop.f32.mrb[51].mxu0 }
 0x346   : >> { %v2964_v17 = vpop.f32.mrb[52].mxu1 }
 0x347   : >> { %v2996_v18 = vadd.f32 %v2964_v17, %v2830_v24  ;;  %v7852_v5 = vpop.f32.mrb[53].mxu1 }
 0x348   : >> { %v3135_v11 = vpop.f32.mrb[52].mxu0 }
 0x349   : >> { %v3162_v21 = vadd.f32 %v3130_v2, %v2996_v18  ;;  %v7898_v10 = vpop.f32.mrb[53].mxu0 }
 0x34a   : >> { %v2969_v23 = vpop.f32.mrb[54].mxu1 }
 0x34b   : >> { %v2997_v20 = vadd.f32 %v2969_v23, %v2831_v34  ;;  %v7855_v26 = vpop.f32.mrb[55].mxu1 }
 0x34c   : >> { %v3140_v16 = vpop.f32.mrb[54].mxu0 }
 0x34d   : >> { %v10005_v12 = vadd.f32 %v3135_v11, %v2997_v20  ;;  %v7901_v14 = vpop.f32.mrb[55].mxu0 }
 0x34e   : >> { %v2974_v29 = vpop.f32.mrb[56].mxu1 }
 0x34f   : >> { %v2998_v30 = vadd.f32 %v2974_v29, %v2832_v33  ;;  %v7858_v22 = vpop.f32.mrb[57].mxu1 }
 0x350   : >> { %v3145_v31 = vpop.f32.mrb[56].mxu0 }
 0x351   : >> { %v10007_v27 = vadd.f32 %v3140_v16, %v2998_v30  ;;  %v7904_v25 = vpop.f32.mrb[57].mxu0 }
 0x352   : >> { %v2979_v28 = vpop.f32.mrb[58].mxu1 }
 0x353   : >> { %v2999_v24 = vadd.f32 %v2979_v28, %v2833_v43  ;;  %v7861_v35 = vpop.f32.mrb[59].mxu1 }
 0x354   : >> { %v3150_v37 = vpop.f32.mrb[58].mxu0 }
 0x355   : >> { %v10009_v38 = vadd.f32 %v3145_v31, %v2999_v24  ;;  %v7907_v19 = vpop.f32.mrb[59].mxu0 }
 0x356   : >> { %v2984_v34 = vpop.f32.mrb[60].mxu1 }
 0x357   : >> { %v3000_v9 = vadd.f32 %v2984_v34, %v2834_v49  ;;  %v7864_v40 = vpop.f32.mrb[61].mxu1  ;;  %v10018_v49 = vld [vmem:[%s10434_s4] ss:$0 sm:$0xff] }
 0x358   : >> { %v3155_v41 = vpop.f32.mrb[60].mxu0 }
 0x359   : >> { %v10011_v42 = vadd.f32 %v3150_v37, %v3000_v9  ;;  %v7910_v62 = vpop.f32.mrb[61].mxu0 }
 0x35a   : >> { %v2989_v33 = vpop.f32.mrb[62].mxu1 }
 0x35b   : >> { %v3001_v39 = vadd.f32 %v2989_v33, %v2835_v52  ;;  %v7867_v45 = vpop.f32.mrb[63].mxu1 }
 0x35c   : >> { %v3447_v47 = vpop.f32.mrb[62].mxu0 }
 0x35d   : >> { %v10013_v44 = vadd.f32 %v3155_v41, %v3001_v39  ;;  %v7972_v32 = vpop.f32.mrb[63].mxu0 }
 0x35e   : >> { %v3281_v43 = vpop.f32.mrb[64].mxu1 }
 0x35f   : >> { %v3325_v48 = vadd.f32 %v3281_v43, %v3159_v63  ;;  %v7929_v46 = vpop.f32.mrb[65].mxu1 }
 0x360   : >> { %v3452_v53 = vpop.f32.mrb[64].mxu0 }
 0x361   : >> { %v3491_v55 = vadd.f32 %v3447_v47, %v3325_v48  ;;  %v7975_v36 = vpop.f32.mrb[65].mxu0 }
 0x362   : >> { %v3286_v50 = vpop.f32.mrb[66].mxu1 }
 0x363   : >> { %v3507_v52 = vadd.f32 %v10018_v49, %v3491_v55  ;;  %v3326_v59 = vadd.f32 %v3286_v50, %v3160_v8  ;;  %v7932_v56 = vpop.f32.mrb[67].mxu1 }
 0x364   : >> { %v3457_v61 = vpop.f32.mrb[66].mxu0  ;;  %v5318_v56 = vld [vmem:[#allocation6 + $0x100] sm:$0xff] (%p2021_p5) }
 0x365   : >> { %v3516_v51 = vmax.f32 %v3507_v52, 0.0  ;;  %v3492_v54 = vadd.f32 %v3452_v53, %v3326_v59  ;;  %v7978_v60 = vpop.f32.mrb[67].mxu0 }
 0x366   : >> { %v3291_v1 = vpop.f32.mrb[68].mxu1  ;;  %v5321_v60 = vld [vmem:[#allocation6 + $0x118] sm:$0xff] (%p2021_p5) }
 0x367   : >> { %3526 = vst.msk [vmem:[%s10023_s8] sm:$0xff] %vm1927_vm5, %v3516_v51  ;;  %v3508_v63 = vadd.f32 %v10018_v49, %v3492_v54  ;;  %v3327_v6 = vadd.f32 %v3291_v1, %v3161_v15  ;;  %v7935_v57 = vpop.f32.mrb[69].mxu1  ;;  %v5320_v51 = vld [vmem:[#allocation6 + $0x110] sm:$0xff] (%p2021_p5)  ;;  %v4661_v1 = vld [vmem:[#allocation6 + $0x40] sm:$0xff] (%p2021_p5) }
 0x368   : >> { %v3462_v58 = vpop.f32.mrb[68].mxu0  ;;  %v8452_v57 = vpack.c.bf16 (%p2021_p5), %v5321_v60, %v5320_v51 }
 0x369   : >> { %v3517_v8 = vmax.f32 %v3508_v63, 0.0  ;;  %v3493_v3 = vadd.f32 %v3457_v61, %v3327_v6  ;;  %v7981_v7 = vpop.f32.mrb[69].mxu0  ;;  %v5319_v61 = vld [vmem:[#allocation6 + $0x108] sm:$0xff] (%p2021_p5)  ;;  %v8736_v63 = vmov (%p2021_p5), 1983009808  }
 0x36a   : >> { %v3296_v13 = vpop.f32.mrb[70].mxu1  ;;  %v8448_v54 = vpack.c.bf16 (%p2021_p5), %v5319_v61, %v5318_v56  ;;  %v3545_v6 = vunpack.c.l.s4 (%p2021_p5), %v8736_v63  ;;  %v4663_v7 = vld [vmem:[#allocation6 + $0x50] sm:$0xff] (%p2021_p5) }
 0x36b   : >> { %3527 = vst.msk [vmem:[%s10023_s8 + $0x8] sm:$0xff] %vm1927_vm5, %v3517_v8  ;;  %v3509_v2 = vadd.f32 %v10018_v49, %v3493_v3  ;;  %v3328_v4 = vadd.f32 %v3296_v13, %v3162_v21  ;;  %v7938_v17 = vpop.f32.mrb[71].mxu1  ;;  %v5322_v8 = vld [vmem:[#allocation6 + $0x120] sm:$0xff] (%p2021_p5)  ;;  %v5323_v3 = vld [vmem:[#allocation6 + $0x128] sm:$0xff] (%p2021_p5) }
 0x36c   : >> { %v3467_v18 = vpop.f32.mrb[70].mxu0  ;;  %8449 = vmatprep.subr.bf16.mxu0 (%p2021_p5), %v8448_v54  ;;  %v5325_v17 = vld [vmem:[#allocation6 + $0x138] sm:$0xff] (%p2021_p5) }
 0x36d   : >> { %v3518_v5 = vmax.f32 %v3509_v2, 0.0  ;;  %v3494_v11 = vadd.f32 %v3462_v58, %v3328_v4  ;;  %v7984_v10 = vpop.f32.mrb[71].mxu0  ;;  %v4664_v2 = vld [vmem:[#allocation6 + $0x58] sm:$0xff] (%p2021_p5)  ;;  %v5324_v4 = vld [vmem:[#allocation6 + $0x130] sm:$0xff] (%p2021_p5)  ;;  %8451 = vmatpush3.bf16.msra.mxu0 (%p2021_p5), %v8448_v54 }
 0x36e   : >> { %v3301_v23 = vpop.f32.mrb[72].mxu1  ;;  %v8388_v0 = vpack.c.bf16 (%p2021_p5), %v4664_v2, %v4663_v7  ;;  %8453 = vmatprep.subr.bf16.mxu0 (%p2021_p5), %v8452_v57 }
 0x36f   : >> { %3528 = vst.msk [vmem:[%s10023_s8 + $0x10] sm:$0xff] %vm1927_vm5, %v3518_v5  ;;  %v3510_v15 = vadd.f32 %v10018_v49, %v3494_v11  ;;  %v3329_v20 = vadd.f32 %v3301_v23, %v10005_v12  ;;  %v7941_v26 = vpop.f32.mrb[73].mxu1  ;;  %v8456_v23 = vpack.c.bf16 (%p2021_p5), %v5323_v3, %v5322_v8 }
 0x370   : >> { %v3472_v16 = vpop.f32.mrb[72].mxu0 }
 0x371   : >> { %v3519_v14 = vmax.f32 %v3510_v15, 0.0  ;;  %v3495_v29 = vadd.f32 %v3467_v18, %v3329_v20  ;;  %v7987_v30 = vpop.f32.mrb[73].mxu0  ;;  %v3546_v18 = vunpack.c.0.s8 (%p2021_p5), %v3545_v6  ;;  %8455 = vmatpush3.bf16.msra.mxu0 (%p2021_p5), %v8452_v57 }
 0x372   : >> { %v3306_v21 = vpop.f32.mrb[74].mxu1  ;;  %8457 = vmatprep.subr.bf16.mxu0 (%p2021_p5), %v8456_v23 }
 0x373   : >> { %3529 = vst.msk [vmem:[%s10023_s8 + $0x18] sm:$0xff] %vm1927_vm5, %v3519_v14  ;;  %v3511_v22 = vadd.f32 %v10018_v49, %v3495_v29  ;;  %v3330_v31 = vadd.f32 %v3306_v21, %v10007_v27  ;;  %v7944_v25 = vpop.f32.mrb[75].mxu1  ;;  %v8460_v29 = vpack.c.bf16 (%p2021_p5), %v5325_v17, %v5324_v4 }
 0x374   : >> { %v3477_v28 = vpop.f32.mrb[74].mxu0 }
 0x375   : >> { %v3520_v24 = vmax.f32 %v3511_v22, 0.0  ;;  %v3496_v35 = vadd.f32 %v3472_v16, %v3330_v31  ;;  %v7990_v37 = vpop.f32.mrb[75].mxu0  ;;  %v4665_v31 = vld [vmem:[#allocation6 + $0x60] sm:$0xff] (%p2021_p5)  ;;  %8459 = vmatpush3.bf16.msra.mxu0 (%p2021_p5), %v8456_v23 }
 0x376   : >> { %v3311_v12 = vpop.f32.mrb[76].mxu1  ;;  %v4666_v37 = vld [vmem:[#allocation6 + $0x68] sm:$0xff] (%p2021_p5)  ;;  %8461 = vmatprep.subr.bf16.mxu0 (%p2021_p5), %v8460_v29 }
 0x377   : >> { %3530 = vst.msk [vmem:[%s10023_s8 + $0x20] sm:$0xff] %vm1927_vm5, %v3520_v24  ;;  %v3512_v19 = vadd.f32 %v10018_v49, %v3496_v35  ;;  %v3331_v34 = vadd.f32 %v3311_v12, %v10009_v38  ;;  %v7947_v9 = vpop.f32.mrb[77].mxu1 }
 0x378   : >> { %v3482_v40 = vpop.f32.mrb[76].mxu0  ;;  %v8392_v9 = vpack.c.bf16 (%p2021_p5), %v4666_v37, %v4665_v31 }
 0x379   : >> { %v3521_v41 = vmax.f32 %v3512_v19, 0.0  ;;  %v3497_v62 = vadd.f32 %v3477_v28, %v3331_v34  ;;  %v7993_v33 = vpop.f32.mrb[77].mxu0  ;;  %8463 = vmatpush3.bf16.msra.mxu0 (%p2021_p5), %v8460_v29 }
 0x37a   : >> { %v3316_v27 = vpop.f32.mrb[78].mxu1 }
 0x37b   : >> { %3531 = vst.msk [vmem:[%s10023_s8 + $0x28] sm:$0xff] %vm1927_vm5, %v3521_v41  ;;  %v3513_v39 = vadd.f32 %v10018_v49, %v3497_v62  ;;  %v3332_v45 = vadd.f32 %v3316_v27, %v10011_v42  ;;  %v7950_v47 = vpop.f32.mrb[79].mxu1 }
 0x37c   : >> { %v3487_v32 = vpop.f32.mrb[78].mxu0 }
 0x37d   : >> { %v3522_v43 = vmax.f32 %v3513_v39, 0.0  ;;  %v3498_v48 = vadd.f32 %v3482_v40, %v3332_v45  ;;  %v7996_v38 = vpop.f32.mrb[79].mxu0 }
 0x37e   : >> { %v3321_v46 = vpop.f32.mrb[80].mxu1 }
 0x37f   : >> { %3532 = vst.msk [vmem:[%s10023_s8 + $0x30] sm:$0xff] %vm1927_vm5, %v3522_v43  ;;  %v3514_v53 = vadd.f32 %v10018_v49, %v3498_v48  ;;  %v3333_v55 = vadd.f32 %v3321_v46, %v10013_v44  ;;  %v7953_v36 = vpop.f32.mrb[81].mxu1  ;;  %v3547_v44 = vlaneseq (%p2021_p5) }
 0x381   : >> { %v3523_v50 = vmax.f32 %v3514_v53, 0.0  ;;  %v3499_v52 = vadd.f32 %v3487_v32, %v3333_v55  ;;  %2023 = sbr.rel (!%p2021_p5) target bundleno = 505 (0x1f9), region = 167  ;;  %v3548_v13 = vshrl.u32 (%p2021_p5), %v3547_v44, 7 }
 0x383   : >> { %3533 = vst.msk [vmem:[%s10023_s8 + $0x38] sm:$0xff] %vm1927_vm5, %v3523_v50  ;;  %v3515_v42 = vadd.f32 %v10018_v49, %v3499_v52  ;;  %v4662_v49 = vld [vmem:[#allocation6 + $0x48] sm:$0xff] (%p2021_p5)  ;;  %v10061_v26 = vsub.s32 (%p2021_p5), %v3546_v18, %v3548_v13  ;;  %v10064_v24 = vsub.s32 (%p2021_p5), 0, %v3548_v13 }
 0x384   : > { %v8384_v58 = vpack.c.bf16 (%p2021_p5), %v4662_v49, %v4661_v1 }
 0x385   : >> { %v3524_v59 = vmax.f32 %v3515_v42, 0.0 }
 0x386   : > { %8385 = vmatprep.subr.bf16.mxu1 (%p2021_p5), %v8384_v58 }
 0x387   : >> { %3534 = vst.msk [vmem:[%s10023_s8 + $0x40] sm:$0xff] %vm1927_vm5, %v3524_v59  ;;  %8387 = vmatpush3.bf16.msra.mxu1 (%p2021_p5), %v8384_v58 }
 0x388   : > { %8389 = vmatprep.subr.bf16.mxu1 %v8388_v0 }
 0x38b   : > { %8391 = vmatpush3.bf16.msra.mxu1 %v8388_v0 }
 0x38c   : > { %8393 = vmatprep.subr.bf16.mxu1 %v8392_v9 }
 0x38e   : > { %v3535_v5 = vld [vmem:[#allocation4] sm:$0xff]  ;;  %v3536_v11 = vld [vmem:[#allocation4 + $0x8] sm:$0xff]  ;;  %v3537_v10 = vld [vmem:[#allocation4 + $0x12] sm:$0xff] }
 0x38f   : > { %v3538_v15 = vld [vmem:[#allocation4 + $0x1a] sm:$0xff]  ;;  %v3539_v20 = vmax.f32 %v3535_v5, %v3537_v10  ;;  %v4066_v16 = vld [vmem:[#allocation4 + $0x90] sm:$0xff]  ;;  %v4068_v21 = vld [vmem:[#allocation4 + $0xa2] sm:$0xff]  ;;  %8395 = vmatpush3.bf16.msra.mxu1 %v8392_v9 }
 0x390   : > { %v4067_v14 = vld [vmem:[#allocation4 + $0x98] sm:$0xff]  ;;  %v3540_v30 = vmax.f32 %v3536_v11, %v3538_v15  ;;  %v4069_v22 = vld [vmem:[#allocation4 + $0xaa] sm:$0xff]  ;;  %v4070_v35 = vmax.f32 %v4066_v16, %v4068_v21 }
 0x391   : > { %v3543_v25 = vcombine.high %v3539_v20, %v3539_v20  ;;  %v3550_v28 = vrot.slane %v3539_v20, %v10061_v26  ;;  %v4071_v34 = vmax.f32 %v4067_v14, %v4069_v22  ;;  %v3674_v9 = vld [vmem:[#allocation4 + $0x2c] sm:$0xff] }
 0x392   : > { %v3560_v12 = vcombine.high %v3540_v30, %v3540_v30  ;;  %v3567_v19 = vrot.slane %v3540_v30, %v10061_v26  ;;  %v4074_v33 = vcombine.high %v4070_v35, %v4070_v35  ;;  %v4081_v47 = vrot.slane %v4070_v35, %v10061_v26 }
 0x393   : > { %v3557_v40 = vrot.slane %v3543_v25, %v10061_v26  ;;  %v3558_v41 = vcombine.high %v3550_v28, %v3550_v28  ;;  %v6786_v62 = vrot.slane %v3550_v28, 9  ;;  %v4091_v13 = vcombine.high %v4071_v34, %v4071_v34 }
 0x394   : > { %v3574_v27 = vrot.slane %v3560_v12, %v10061_v26  ;;  %v3575_v39 = vcombine.high %v3567_v19, %v3567_v19  ;;  %v6790_v45 = vrot.slane %v3567_v19, 9  ;;  %v4088_v49 = vrot.slane %v4074_v33, %v10061_v26 }
 0x395   : > { %v3559_v32 = vcombine.high %v3557_v40, %v3557_v40  ;;  %v6787_v43 = vrot.slane %v3558_v41, 9  ;;  %v6788_v48 = vrot.slane %v3557_v40, 9  ;;  %v3609_v38 = vmax.f32 %v3550_v28, %v6786_v62 }
 0x396   : > { %v3576_v46 = vcombine.high %v3574_v27, %v3574_v27  ;;  %v6791_v53 = vrot.slane %v3575_v39, 9  ;;  %v6792_v55 = vrot.slane %v3574_v27, 9  ;;  %v3613_v36 = vmax.f32 %v3567_v19, %v6790_v45  ;;  %v3804_v45 = vld [vmem:[#allocation4 + $0x48] sm:$0xff] }
 0x397   : > { %v6789_v50 = vrot.slane %v3559_v32, 9  ;;  %v3610_v52 = vmax.f32 %v3558_v41, %v6787_v43  ;;  %v3611_v42 = vmax.f32 %v3557_v40, %v6788_v48  ;;  %v3628_v59 = vrot.slane %v3609_v38, %v10064_v24  ;;  %v3675_v40 = vld [vmem:[#allocation4 + $0x36] sm:$0xff] }
 0x398   : > { %v6793_v56 = vrot.slane %v3576_v46, 9  ;;  %v3614_v61 = vmax.f32 %v3575_v39, %v6791_v53  ;;  %v3615_v51 = vmax.f32 %v3574_v27, %v6792_v55  ;;  %v3644_v44 = vrot.slane %v3613_v36, %v10064_v24  ;;  %v3676_v39 = vld [vmem:[#allocation4 + $0x3e] sm:$0xff] }
 0x399   : > { %v3612_v54 = vmax.f32 %v3559_v32, %v6789_v50  ;;  %v3632_v60 = vrot.slane %v3610_v52, %v10064_v24  ;;  %v3636_v1 = vrot.slane %v3611_v42, %v10064_v24  ;;  %v4089_v58 = vcombine.high %v4081_v47, %v4081_v47  ;;  %v3807_v53 = vld [vmem:[#allocation4 + $0x62] sm:$0xff] }
 0x39a   : > { %v3616_v63 = vmax.f32 %v3576_v46, %v6793_v56  ;;  %v3648_v6 = vrot.slane %v3614_v61, %v10064_v24  ;;  %v3652_v57 = vrot.slane %v3615_v51, %v10064_v24  ;;  %v4090_v7 = vcombine.high %v4088_v49, %v4088_v49  ;;  %v3805_v46 = vld [vmem:[#allocation4 + $0x50] sm:$0xff] }
 0x39b   : > { %v3640_v8 = vrot.slane %v3612_v54, %v10064_v24  ;;  %v3658_v3 = vsel %vm3657_vm9, %v3632_v60, %v3628_v59  ;;  %v4098_v17 = vrot.slane %v4071_v34, %v10061_v26  ;;  %v6818_v18 = vrot.slane %v4081_v47, 9  ;;  %v3673_v34 = vld [vmem:[#allocation4 + $0x24] sm:$0xff] }
 0x39c   : > { %v3656_v2 = vrot.slane %v3616_v63, %v10064_v24  ;;  %v3660_v4 = vsel %vm3659_vm10, %v3636_v1, %v3658_v3  ;;  %v4105_v5 = vrot.slane %v4091_v13, %v10061_v26  ;;  %v6819_v11 = vrot.slane %v4089_v58, 9 }
 0x39d   : > { %v3662_v0 = vsel %vm3661_vm11, %v3640_v8, %v3660_v4  ;;  %v6820_v10 = vrot.slane %v4088_v49, 9  ;;  %v4106_v15 = vcombine.high %v4098_v17, %v4098_v17  ;;  %v6821_v20 = vrot.slane %v4090_v7, 9 }
 0x39e   : > { %v3664_v23 = vsel %vm3663_vm12, %v3644_v44, %v3662_v0  ;;  %v6822_v16 = vrot.slane %v4098_v17, 9  ;;  %v4107_v29 = vcombine.high %v4105_v5, %v4105_v5  ;;  %v6824_v30 = vrot.slane %v4105_v5, 9 }
 0x39f   : > { %v3666_v14 = vsel %vm3665_vm13, %v3648_v6, %v3664_v23  ;;  %v4140_v21 = vmax.f32 %v4081_v47, %v6818_v18  ;;  %v6823_v31 = vrot.slane %v4106_v15, 9  ;;  %v4141_v25 = vmax.f32 %v4089_v58, %v6819_v11  ;;  %v3806_v47 = vld [vmem:[#allocation4 + $0x5a] sm:$0xff] }
 0x3a0   : > { %v3668_v22 = vsel %vm3667_vm14, %v3652_v57, %v3666_v14  ;;  %v4142_v28 = vmax.f32 %v4088_v49, %v6820_v10  ;;  %v6825_v37 = vrot.slane %v4107_v29, 9  ;;  %v4143_v12 = vmax.f32 %v4090_v7, %v6821_v20 }
 0x3a1   : > { %v3670_v35 = vsel %vm3669_vm15, %v3656_v2, %v3668_v22  ;;  %v4144_v19 = vmax.f32 %v4098_v17, %v6822_v16  ;;  %v4145_v41 = vmax.f32 %v4106_v15, %v6823_v31  ;;  %v4146_v62 = vmax.f32 %v4105_v5, %v6824_v30 }
 0x3a2   : > { %3672 = vst.msk [vmem:[#allocation5 + $0xb] sm:$0xff] %vm1927_vm5, %v3670_v35  ;;  %v4159_v33 = vrot.slane %v4140_v21, %v10064_v24  ;;  %v4163_v27 = vrot.slane %v4141_v25, %v10064_v24  ;;  %v4147_v32 = vmax.f32 %v4107_v29, %v6825_v37  ;;  %v4167_v43 = vrot.slane %v4142_v28, %v10064_v24 }
 0x3a3   : > { %v4171_v48 = vrot.slane %v4143_v12, %v10064_v24  ;;  %v4175_v38 = vrot.slane %v4144_v19, %v10064_v24  ;;  %v4179_v55 = vrot.slane %v4145_v41, %v10064_v24  ;;  %v4183_v36 = vrot.slane %v4146_v62, %v10064_v24 }
 0x3a4   : > { %v4188_v50 = vsel %vm3657_vm9, %v4163_v27, %v4159_v33  ;;  %v3677_v52 = vmax.f32 %v3673_v34, %v3675_v40  ;;  %v4187_v42 = vrot.slane %v4147_v32, %v10064_v24  ;;  %v3678_v56 = vmax.f32 %v3674_v9, %v3676_v39 }
 0x3a5   : > { %v4189_v59 = vsel %vm3659_vm10, %v4167_v43, %v4188_v50  ;;  %v3808_v61 = vmax.f32 %v3804_v45, %v3806_v47  ;;  %v3809_v60 = vmax.f32 %v3805_v46, %v3807_v53 }
 0x3a6   : > { %v4190_v51 = vsel %vm3661_vm11, %v4171_v48, %v4189_v59  ;;  %v3681_v44 = vcombine.high %v3677_v52, %v3677_v52  ;;  %v3688_v54 = vrot.slane %v3677_v52, %v10061_v26  ;;  %v3698_v49 = vcombine.high %v3678_v56, %v3678_v56 }
 0x3a7   : > { %v4191_v1 = vsel %vm3663_vm12, %v4175_v38, %v4190_v51  ;;  %v3705_v63 = vrot.slane %v3678_v56, %v10061_v26  ;;  %v3812_v6 = vcombine.high %v3808_v61, %v3808_v61  ;;  %v3819_v62 = vrot.slane %v3808_v61, %v10061_v26 }
 0x3a8   : > { %v4192_v57 = vsel %vm3665_vm13, %v4179_v55, %v4191_v1  ;;  %v3695_v58 = vrot.slane %v3681_v44, %v10061_v26  ;;  %v3696_v8 = vcombine.high %v3688_v54, %v3688_v54  ;;  %v6794_v3 = vrot.slane %v3688_v54, 9 }
 0x3a9   : > { %v4193_v7 = vsel %vm3667_vm14, %v4183_v36, %v4192_v57  ;;  %v5307_v13 = vld [vmem:[#allocation5 + $0xb] sm:$0xff]  ;;  %v3712_v2 = vrot.slane %v3698_v49, %v10061_v26  ;;  %v3713_v4 = vcombine.high %v3705_v63, %v3705_v63  ;;  %v6798_v17 = vrot.slane %v3705_v63, 9 }
 0x3aa   : > { %v4592_v18 = vld [vmem:[#allocation5 + $0x11] sm:$0x1]  ;;  %v4590_v0 = vld [vmem:[#allocation5 + $0xc] sm:$0x1]  ;;  %v4194_v5 = vsel %vm3669_vm15, %v4187_v42, %v4193_v7  ;;  %8137 = vmatprep.mubr.msk.f32.mxu0 %vm1927_vm5, %v5307_v13  ;;  %v3697_v11 = vcombine.high %v3695_v58, %v3695_v58  ;;  %v6795_v10 = vrot.slane %v3696_v8, 9  ;;  %v6796_v23 = vrot.slane %v3695_v58, 9 }
 0x3ab   : > { %4593 = vst.msk [vmem:[#allocation5 + $0x13] sm:$0x1] %vm1938_vm6, %v4592_v18  ;;  %4591 = vst.msk [vmem:[#allocation5 + $0xa] sm:$0x1] %vm1938_vm6, %v4590_v0  ;;  %v3714_v15 = vcombine.high %v3712_v2, %v3712_v2  ;;  %v6799_v20 = vrot.slane %v3713_v4, 9  ;;  %v6800_v16 = vrot.slane %v3712_v2, 9  ;;  %v3747_v14 = vmax.f32 %v3688_v54, %v6794_v3 }
 0x3ac   : > { %4196 = vst.msk [vmem:[#allocation5 + $0x33] sm:$0xff] %vm1927_vm5, %v4194_v5  ;;  %v6797_v29 = vrot.slane %v3697_v11, 9  ;;  %v3748_v30 = vmax.f32 %v3696_v8, %v6795_v10  ;;  %v3749_v21 = vmax.f32 %v3695_v58, %v6796_v23  ;;  %v3751_v22 = vmax.f32 %v3705_v63, %v6798_v17  ;;  %v4668_v7 = vld [vmem:[#allocation6 + $0x78] sm:$0xff]  ;;  %v3937_v5 = vld [vmem:[#allocation4 + $0x7e] sm:$0xff]  ;;  %v5492_v10 = vld [vmem:[#allocation6 + $0x140] sm:$0xff] }
 0x3ad   : > { %v6801_v31 = vrot.slane %v3714_v15, 9  ;;  %v3752_v25 = vmax.f32 %v3713_v4, %v6799_v20  ;;  %v3753_v28 = vmax.f32 %v3712_v2, %v6800_v16  ;;  %v3766_v35 = vrot.slane %v3747_v14, %v10064_v24  ;;  %v3935_v13 = vld [vmem:[#allocation4 + $0x6c] sm:$0xff]  ;;  %v3936_v2 = vld [vmem:[#allocation4 + $0x74] sm:$0xff] }
 0x3ae   : > { %v3750_v37 = vmax.f32 %v3697_v11, %v6797_v29  ;;  %v3770_v12 = vrot.slane %v3748_v30, %v10064_v24  ;;  %v3774_v19 = vrot.slane %v3749_v21, %v10064_v24  ;;  %v3782_v34 = vrot.slane %v3751_v22, %v10064_v24  ;;  %v3938_v11 = vld [vmem:[#allocation4 + $0x86] sm:$0xff]  ;;  %v5493_v14 = vld [vmem:[#allocation6 + $0x148] sm:$0xff]  ;;  %v4642_v29 = vld [vmem:[#allocation6] sm:$0xff] }
 0x3af   : > { %v3754_v9 = vmax.f32 %v3714_v15, %v6801_v31  ;;  %v3786_v40 = vrot.slane %v3752_v25, %v10064_v24  ;;  %v3790_v41 = vrot.slane %v3753_v28, %v10064_v24  ;;  %v3826_v39 = vrot.slane %v3812_v6, %v10061_v26  ;;  %v4667_v6 = vld [vmem:[#allocation6 + $0x70] sm:$0xff]  ;;  %v4643_v30 = vld [vmem:[#allocation6 + $0x8] sm:$0xff] }
 0x3b0   : > { %v3778_v33 = vrot.slane %v3750_v37, %v10064_v24  ;;  %v3795_v27 = vsel %vm3657_vm9, %v3770_v12, %v3766_v35  ;;  %v3829_v45 = vcombine.high %v3809_v60, %v3809_v60  ;;  %v3827_v43 = vcombine.high %v3819_v62, %v3819_v62  ;;  %v5494_v28 = vld [vmem:[#allocation6 + $0x150] sm:$0xff]  ;;  %v5495_v35 = vld [vmem:[#allocation6 + $0x158] sm:$0xff] }
 0x3b1   : > { %v3794_v47 = vrot.slane %v3754_v9, %v10064_v24  ;;  %v3796_v32 = vsel %vm3659_vm10, %v3774_v19, %v3795_v27  ;;  %v3836_v48 = vrot.slane %v3809_v60, %v10061_v26  ;;  %v3828_v46 = vcombine.high %v3826_v39, %v3826_v39 }
 0x3b2   : > { %v3797_v38 = vsel %vm3661_vm11, %v3778_v33, %v3796_v32  ;;  %v3843_v53 = vrot.slane %v3829_v45, %v10061_v26  ;;  %v6802_v55 = vrot.slane %v3819_v62, 9  ;;  %v6803_v59 = vrot.slane %v3827_v43, 9 }
 0x3b3   : > { %v4606_v36 = vld [vmem:[#allocation5 + $0x34] sm:$0x1]  ;;  %v4608_v50 = vld [vmem:[#allocation5 + $0x39] sm:$0x1]  ;;  %v3798_v52 = vsel %vm3663_vm12, %v3782_v34, %v3797_v38  ;;  %v3844_v42 = vcombine.high %v3836_v48, %v3836_v48  ;;  %v6804_v56 = vrot.slane %v3826_v39, 9  ;;  %v6805_v44 = vrot.slane %v3828_v46, 9 }
 0x3b4   : > { %4607 = vst.msk [vmem:[#allocation5 + $0x32] sm:$0x1] %vm1938_vm6, %v4606_v36  ;;  %4609 = vst.msk [vmem:[#allocation5 + $0x3b] sm:$0x1] %vm1938_vm6, %v4608_v50  ;;  %v3799_v61 = vsel %vm3665_vm13, %v3786_v40, %v3798_v52  ;;  %v3845_v51 = vcombine.high %v3843_v53, %v3843_v53  ;;  %v6806_v54 = vrot.slane %v3836_v48, 9  ;;  %v6808_v49 = vrot.slane %v3843_v53, 9 }
 0x3b5   : > { %v3800_v60 = vsel %vm3667_vm14, %v3790_v41, %v3799_v61  ;;  %v6807_v1 = vrot.slane %v3844_v42, 9  ;;  %v3878_v63 = vmax.f32 %v3819_v62, %v6802_v55  ;;  %v3879_v8 = vmax.f32 %v3827_v43, %v6803_v59 }
 0x3b6   : > { %v3801_v57 = vsel %vm3669_vm15, %v3794_v47, %v3800_v60  ;;  %v6809_v58 = vrot.slane %v3845_v51, 9  ;;  %v3880_v3 = vmax.f32 %v3826_v39, %v6804_v56  ;;  %v3881_v4 = vmax.f32 %v3828_v46, %v6805_v44 }
 0x3b7   : > { %3803 = vst.msk [vmem:[#allocation5 + $0x15] sm:$0xff] %vm1927_vm5, %v3801_v57  ;;  %v3882_v17 = vmax.f32 %v3836_v48, %v6806_v54  ;;  %v3883_v18 = vmax.f32 %v3844_v42, %v6807_v1  ;;  %v3884_v0 = vmax.f32 %v3843_v53, %v6808_v49  ;;  %v3897_v15 = vrot.slane %v3878_v63, %v10064_v24 }
 0x3b8   : > { %v3885_v23 = vmax.f32 %v3845_v51, %v6809_v58  ;;  %v3901_v20 = vrot.slane %v3879_v8, %v10064_v24  ;;  %v3905_v16 = vrot.slane %v3880_v3, %v10064_v24  ;;  %v3909_v21 = vrot.slane %v3881_v4, %v10064_v24  ;;  %v4197_v8 = vld [vmem:[#allocation4 + $0xb4] sm:$0xff]  ;;  %v4198_v3 = vld [vmem:[#allocation4 + $0xbc] sm:$0xff] }
 0x3b9   : > { %v3913_v22 = vrot.slane %v3882_v17, %v10064_v24  ;;  %v3917_v31 = vrot.slane %v3883_v18, %v10064_v24  ;;  %v3921_v25 = vrot.slane %v3884_v0, %v10064_v24  ;;  %v8396_v19 = vpack.c.bf16 %v4668_v7, %v4667_v6  ;;  %v4199_v7 = vld [vmem:[#allocation4 + $0xc6] sm:$0xff]  ;;  %v4200_v18 = vld [vmem:[#allocation4 + $0xce] sm:$0xff]  ;;  %v4328_v0 = vld [vmem:[#allocation4 + $0xd8] sm:$0xff] }
 0x3ba   : > { %v3925_v37 = vrot.slane %v3885_v23, %v10064_v24  ;;  %v3926_v12 = vsel %vm3657_vm9, %v3901_v20, %v3897_v15  ;;  %v3939_v34 = vmax.f32 %v3935_v13, %v3937_v5  ;;  %v3940_v40 = vmax.f32 %v3936_v2, %v3938_v11  ;;  %v4330_v5 = vld [vmem:[#allocation4 + $0xea] sm:$0xff] }
 0x3bb   : > { %v3927_v9 = vsel %vm3659_vm10, %v3905_v16, %v3926_v12  ;;  %v10144_v41 = vpack.c.bf16 %v5493_v14, %v5492_v10  ;;  %v10146_v62 = vpack.c.bf16 %v4643_v30, %v4642_v29  ;;  %8397 = vmatprep.subr.bf16.mxu1 %v8396_v19  ;;  %v10150_v45 = vpack.c.bf16 %v5495_v35, %v5494_v28  ;;  %v4329_v30 = vld [vmem:[#allocation4 + $0xe0] sm:$0xff] }
 0x3bc   : > { %v3928_v33 = vsel %vm3661_vm11, %v3909_v21, %v3927_v9  ;;  %v3943_v27 = vcombine.high %v3939_v34, %v3939_v34  ;;  %v3950_v39 = vrot.slane %v3939_v34, %v10061_v26  ;;  %v3960_v32 = vcombine.high %v3940_v40, %v3940_v40  ;;  %8399 = vmatpush3.bf16.msra.mxu1 %v8396_v19  ;;  %v4331_v21 = vld [vmem:[#allocation4 + $0xf2] sm:$0xff] }
 0x3bd   : > { %v3929_v47 = vsel %vm3663_vm12, %v3913_v22, %v3928_v33  ;;  %v3967_v43 = vrot.slane %v3940_v40, %v10061_v26  ;;  %8465 = vmatprep.subr.bf16.mxu0 %v10144_v41  ;;  %8401 = vmatprep.subr.bf16.mxu1 %v10146_v62  ;;  %v4201_v29 = vmax.f32 %v4197_v8, %v4199_v7 }
 0x3be   : > { %v4594_v48 = vld [vmem:[#allocation5 + $0x16] sm:$0x1]  ;;  %v3930_v38 = vsel %vm3665_vm13, %v3917_v31, %v3929_v47  ;;  %v4596_v46 = vld [vmem:[#allocation5 + $0x1b] sm:$0x1]  ;;  %v3957_v53 = vrot.slane %v3943_v27, %v10061_v26  ;;  %v3958_v55 = vcombine.high %v3950_v39, %v3950_v39  ;;  %v6810_v36 = vrot.slane %v3950_v39, 9 }
 0x3bf   : > { %4595 = vst.msk [vmem:[#allocation5 + $0x14] sm:$0x1] %vm1938_vm6, %v4594_v48  ;;  %v3931_v50 = vsel %vm3667_vm14, %v3921_v25, %v3930_v38  ;;  %4597 = vst.msk [vmem:[#allocation5 + $0x1d] sm:$0x1] %vm1938_vm6, %v4596_v46  ;;  %v3974_v52 = vrot.slane %v3960_v32, %v10061_v26  ;;  %v3975_v42 = vcombine.high %v3967_v43, %v3967_v43  ;;  %v6814_v59 = vrot.slane %v3967_v43, 9 }
 0x3c0   : > { %v3932_v56 = vsel %vm3669_vm15, %v3925_v37, %v3931_v50  ;;  %v3959_v61 = vcombine.high %v3957_v53, %v3957_v53  ;;  %v6811_v51 = vrot.slane %v3958_v55, 9  ;;  %v6812_v44 = vrot.slane %v3957_v53, 9 }
 0x3c1   : > { %3934 = vst.msk [vmem:[#allocation5 + $0x1f] sm:$0xff] %vm1927_vm5, %v3932_v56  ;;  %v3976_v54 = vcombine.high %v3974_v52, %v3974_v52  ;;  %v6815_v60 = vrot.slane %v3975_v42, 9  ;;  %v6816_v1 = vrot.slane %v3974_v52, 9  ;;  %v4009_v49 = vmax.f32 %v3950_v39, %v6810_v36 }
 0x3c2   : > { %v6813_v63 = vrot.slane %v3959_v61, 9  ;;  %v4010_v6 = vmax.f32 %v3958_v55, %v6811_v51  ;;  %v4011_v57 = vmax.f32 %v3957_v53, %v6812_v44  ;;  %v4013_v58 = vmax.f32 %v3967_v43, %v6814_v59 }
 0x3c3   : > { %v6817_v13 = vrot.slane %v3976_v54, 9  ;;  %v4014_v2 = vmax.f32 %v3975_v42, %v6815_v60  ;;  %v4015_v4 = vmax.f32 %v3974_v52, %v6816_v1  ;;  %v4028_v17 = vrot.slane %v4009_v49, %v10064_v24 }
 0x3c4   : > { %v4012_v11 = vmax.f32 %v3959_v61, %v6813_v63  ;;  %v4032_v10 = vrot.slane %v4010_v6, %v10064_v24  ;;  %v4036_v23 = vrot.slane %v4011_v57, %v10064_v24  ;;  %v4044_v15 = vrot.slane %v4013_v58, %v10064_v24 }
 0x3c5   : > { %v4016_v20 = vmax.f32 %v3976_v54, %v6817_v13  ;;  %v4048_v16 = vrot.slane %v4014_v2, %v10064_v24  ;;  %v4052_v14 = vrot.slane %v4015_v4, %v10064_v24  ;;  %v4202_v37 = vmax.f32 %v4198_v3, %v4200_v18 }
 0x3c6   : > { %v5308_v22 = vld [vmem:[#allocation5 + $0x13] sm:$0xff]  ;;  %v4040_v31 = vrot.slane %v4012_v11, %v10064_v24  ;;  %v4057_v25 = vsel %vm3657_vm9, %v4032_v10, %v4028_v17  ;;  %v4623_v35 = vld [vmem:[#allocation5 + $0x1c] sm:$0x3]  ;;  %v10174_v12 = vmax.f32 %v4328_v0, %v4330_v5  ;;  %v4205_v9 = vcombine.high %v4201_v29, %v4201_v29 }
 0x3c7   : > { %v10172_v28 = vld [vmem:[#allocation5 + $0x14] sm:$0xff]  ;;  %8138 = vmatmul.mubr.msk.f32.vlgmr.msra.gmra.mrb[0].mxu0 %vm1927_vm5, %v5308_v22  ;;  %v4056_v19 = vrot.slane %v4016_v20, %v10064_v24  ;;  %v4058_v34 = vsel %vm3659_vm10, %v4036_v23, %v4057_v25  ;;  %4625 = vst.msk [vmem:[#allocation5 + $0x8] sm:$0x3] %vm2008_vm7, %v4623_v35  ;;  %v4212_v40 = vrot.slane %v4201_v29, %v10061_v26 }
 0x3c8   : > { %4624 = vst.msk [vmem:[#allocation5] sm:$0xff] %vm1927_vm5, %v10172_v28  ;;  %v4598_v33 = vld [vmem:[#allocation5 + $0x20] sm:$0x1]  ;;  %v4059_v27 = vsel %vm3661_vm11, %v4040_v31, %v4058_v34  ;;  %v4600_v39 = vld [vmem:[#allocation5 + $0x25] sm:$0x1]  ;;  %8467 = vmatpush3.bf16.msra.mxu0 %v10144_v41  ;;  %v4222_v47 = vcombine.high %v4202_v37, %v4202_v37  ;;  %v4229_v32 = vrot.slane %v4202_v37, %v10061_v26  ;;  %v4652_v17 = vld [vmem:[#allocation5 + $0x11] sm:$0xff] }
 0x3c9   : > { %v10186_v43 = vmax.f32 %v4329_v30, %v4331_v21  ;;  %4599 = vst.msk [vmem:[#allocation5 + $0x1e] sm:$0x1] %vm1938_vm6, %v4598_v33  ;;  %v4060_v48 = vsel %vm3663_vm12, %v4044_v15, %v4059_v27  ;;  %4601 = vst.msk [vmem:[#allocation5 + $0x27] sm:$0x1] %vm1938_vm6, %v4600_v39  ;;  %8469 = vmatprep.subr.bf16.mxu0 %v10150_v45  ;;  %v4219_v38 = vrot.slane %v4205_v9, %v10061_v26  ;;  %v5496_v23 = vld [vmem:[#allocation6 + $0x160] sm:$0xff]  ;;  %v5497_v15 = vld [vmem:[#allocation6 + $0x168] sm:$0xff] }
 0x3ca   : > { %v4220_v46 = vcombine.high %v4212_v40, %v4212_v40  ;;  %v6826_v53 = vrot.slane %v4212_v40, 9  ;;  %v4061_v55 = vsel %vm3665_vm13, %v4048_v16, %v4060_v48  ;;  %v4236_v41 = vrot.slane %v4222_v47, %v10061_v26 }
 0x3cb   : > { %v4237_v36 = vcombine.high %v4229_v32, %v4229_v32  ;;  %v6830_v50 = vrot.slane %v4229_v32, 9  ;;  %v4062_v52 = vsel %vm3667_vm14, %v4052_v14, %v4061_v55  ;;  %v4221_v42 = vcombine.high %v4219_v38, %v4219_v38 }
 0x3cc   : > { %v6827_v59 = vrot.slane %v4220_v46, 9  ;;  %v6828_v56 = vrot.slane %v4219_v38, 9  ;;  %v4063_v61 = vsel %vm3669_vm15, %v4056_v19, %v4062_v52  ;;  %8471 = vmatpush3.bf16.msra.mxu0 %v10150_v45  ;;  %v4238_v51 = vcombine.high %v4236_v41, %v4236_v41 }
 0x3cd   : > { %v6831_v44 = vrot.slane %v4237_v36, 9  ;;  %v6832_v54 = vrot.slane %v4236_v41, 9  ;;  %4065 = vst.msk [vmem:[#allocation5 + $0x29] sm:$0xff] %vm1927_vm5, %v4063_v61  ;;  %v6829_v60 = vrot.slane %v4221_v42, 9  ;;  %v4271_v1 = vmax.f32 %v4212_v40, %v6826_v53  ;;  %v4645_v61 = vld [vmem:[#allocation6 + $0x18] sm:$0xff] }
 0x3ce   : > { %v4272_v49 = vmax.f32 %v4220_v46, %v6827_v59  ;;  %v4273_v63 = vmax.f32 %v4219_v38, %v6828_v56  ;;  %v4651_v57 = vld [vmem:[#allocation5 + $0x9] sm:$0xff]  ;;  %v6833_v58 = vrot.slane %v4238_v51, 9  ;;  %v4275_v8 = vmax.f32 %v4229_v32, %v6830_v50  ;;  %v4644_v56 = vld [vmem:[#allocation6 + $0x10] sm:$0xff] }
 0x3cf   : > { %v4650_v6 = vld [vmem:[#allocation5 + $0x1] sm:$0xff]  ;;  %v4276_v3 = vmax.f32 %v4237_v36, %v6831_v44  ;;  %v4277_v7 = vmax.f32 %v4236_v41, %v6832_v54  ;;  %v4274_v13 = vmax.f32 %v4221_v42, %v6829_v60  ;;  %v4290_v45 = vrot.slane %v4271_v1, %v10064_v24 }
 0x3d0   : > { %8013 = vmatprep.mubr.msk.f32.mxu1 %vm1927_vm5, %v4650_v6  ;;  %v4294_v2 = vrot.slane %v4272_v49, %v10064_v24  ;;  %v4298_v4 = vrot.slane %v4273_v63, %v10064_v24  ;;  %v5309_v18 = vld [vmem:[#allocation5 + $0x1b] sm:$0xff]  ;;  %v4278_v0 = vmax.f32 %v4238_v51, %v6833_v58  ;;  %v4306_v5 = vrot.slane %v4275_v8, %v10064_v24  ;;  %v4460_v49 = vld [vmem:[#allocation4 + $0x104] sm:$0xff]  ;;  %v4461_v63 = vld [vmem:[#allocation4 + $0x10e] sm:$0xff] }
 0x3d1   : > { %8014 = vmatmul.mubr.msk.f32.vlgmr.msra.gmra.mrb[0].mxu1 %vm1927_vm5, %v4651_v57  ;;  %v4310_v11 = vrot.slane %v4276_v3, %v10064_v24  ;;  %v4314_v10 = vrot.slane %v4277_v7, %v10064_v24  ;;  %8140 = vmatprep.mubr.msk.f32.mxu0 %vm1927_vm5, %v5309_v18  ;;  %v4302_v20 = vrot.slane %v4274_v13, %v10064_v24  ;;  %v4653_v29 = vld [vmem:[#allocation5 + $0x19] sm:$0xff]  ;;  %v5499_v13 = vld [vmem:[#allocation6 + $0x178] sm:$0xff] }
 0x3d2   : > { %8403 = vmatpush3.bf16.msra.mxu1 %v10146_v62  ;;  %v4319_v16 = vsel %vm3657_vm9, %v4294_v2, %v4290_v45  ;;  %v4336_v14 = vcombine.high %v10174_v12, %v10174_v12  ;;  %v4318_v30 = vrot.slane %v4278_v0, %v10064_v24  ;;  %8016 = vmatprep.mubr.msk.f32.mxu1 %vm1927_vm5, %v4652_v17  ;;  %v4459_v1 = vld [vmem:[#allocation4 + $0xfc] sm:$0xff] }
 0x3d3   : > { %v4320_v21 = vsel %vm3659_vm10, %v4298_v4, %v4319_v16  ;;  %v4343_v22 = vrot.slane %v10174_v12, %v10061_v26  ;;  %v4353_v62 = vcombine.high %v10186_v43, %v10186_v43  ;;  %v4360_v35 = vrot.slane %v10186_v43, %v10061_v26  ;;  %v4462_v3 = vld [vmem:[#allocation4 + $0x116] sm:$0xff]  ;;  %v5498_v7 = vld [vmem:[#allocation6 + $0x170] sm:$0xff] }
 0x3d4   : > { %v4321_v31 = vsel %vm3661_vm11, %v4302_v20, %v4320_v21  ;;  %v4350_v25 = vrot.slane %v4336_v14, %v10061_v26  ;;  %v8472_v37 = vpack.c.bf16 %v5497_v15, %v5496_v23  ;;  %v4602_v19 = vld [vmem:[#allocation5 + $0x2a] sm:$0x1]  ;;  %v4604_v34 = vld [vmem:[#allocation5 + $0x2f] sm:$0x1]  ;;  %v4463_v23 = vmax.f32 %v4459_v1, %v4461_v63 }
 0x3d5   : > { %v4322_v9 = vsel %vm3663_vm12, %v4306_v5, %v4321_v31  ;;  %v4351_v40 = vcombine.high %v4343_v22, %v4343_v22  ;;  %v4367_v33 = vrot.slane %v4353_v62, %v10061_v26  ;;  %v6834_v27 = vrot.slane %v4343_v22, 9  ;;  %8017 = vmatmul.mubr.msk.f32.gmra.mrb[2].mxu1 %vm1927_vm5, %v4653_v29  ;;  %4603 = vst.msk [vmem:[#allocation5 + $0x28] sm:$0x1] %vm1938_vm6, %v4602_v19  ;;  %v4655_v29 = vld [vmem:[#allocation5 + $0x29] sm:$0xff] }
 0x3d6   : > { %4605 = vst.msk [vmem:[#allocation5 + $0x31] sm:$0x1] %vm1938_vm6, %v4604_v34  ;;  %v4323_v12 = vsel %vm3665_vm13, %v4310_v11, %v4322_v9  ;;  %v4352_v39 = vcombine.high %v4350_v25, %v4350_v25  ;;  %v4368_v47 = vcombine.high %v4360_v35, %v4360_v35  ;;  %v6836_v32 = vrot.slane %v4350_v25, 9  ;;  %8473 = vmatprep.subr.bf16.mxu0 %v8472_v37  ;;  %v4649_v1 = vld [vmem:[#allocation6 + $0x38] sm:$0xff] }
 0x3d7   : > { %v4324_v43 = vsel %vm3667_vm14, %v4314_v10, %v4323_v12  ;;  %v4369_v48 = vcombine.high %v4367_v33, %v4367_v33  ;;  %v6835_v38 = vrot.slane %v4351_v40, 9  ;;  %v6838_v46 = vrot.slane %v4360_v35, 9  ;;  %8475 = vmatpush3.bf16.msra.mxu0 %v8472_v37 }
 0x3d8   : > { %v4325_v53 = vsel %vm3669_vm15, %v4318_v30, %v4324_v43  ;;  %v6837_v55 = vrot.slane %v4352_v39, 9  ;;  %v6839_v41 = vrot.slane %v4368_v47, 9  ;;  %v6840_v36 = vrot.slane %v4367_v33, 9  ;;  %v5312_v30 = vld [vmem:[#allocation5 + $0x33] sm:$0xff] }
 0x3d9   : > { %4327 = vst.msk [vmem:[#allocation5 + $0x3d] sm:$0xff] %vm1927_vm5, %v4325_v53  ;;  %v6841_v50 = vrot.slane %v4369_v48, 9  ;;  %v4402_v52 = vmax.f32 %v4343_v22, %v6834_v27  ;;  %v4403_v42 = vmax.f32 %v4351_v40, %v6835_v38  ;;  %v4404_v59 = vmax.f32 %v4350_v25, %v6836_v32 }
 0x3da   : > { %v4405_v51 = vmax.f32 %v4352_v39, %v6837_v55  ;;  %v4406_v44 = vmax.f32 %v4360_v35, %v6838_v46  ;;  %v4407_v54 = vmax.f32 %v4368_v47, %v6839_v41  ;;  %v4408_v60 = vmax.f32 %v4367_v33, %v6840_v36 }
 0x3db   : > { %v4409_v6 = vmax.f32 %v4369_v48, %v6841_v50  ;;  %v4421_v57 = vrot.slane %v4402_v52, %v10064_v24  ;;  %v4425_v58 = vrot.slane %v4403_v42, %v10064_v24  ;;  %v4429_v8 = vrot.slane %v4404_v59, %v10064_v24 }
 0x3dc   : > { %v4433_v45 = vrot.slane %v4405_v51, %v10064_v24  ;;  %v4437_v2 = vrot.slane %v4406_v44, %v10064_v24  ;;  %v4441_v4 = vrot.slane %v4407_v54, %v10064_v24  ;;  %v4445_v17 = vrot.slane %v4408_v60, %v10064_v24  ;;  %v5310_v18 = vld [vmem:[#allocation5 + $0x23] sm:$0xff] }
 0x3dd   : > { %v5311_v0 = vld [vmem:[#allocation5 + $0x2b] sm:$0xff]  ;;  %v4449_v5 = vrot.slane %v4409_v6, %v10064_v24  ;;  %v4450_v11 = vsel %vm3657_vm9, %v4425_v58, %v4421_v57  ;;  %v8404_v10 = vpack.c.bf16 %v4645_v61, %v4644_v56  ;;  %v4654_v15 = vld [vmem:[#allocation5 + $0x21] sm:$0xff]  ;;  %8141 = vmatmul.mubr.msk.f32.gmra.mrb[2].mxu0 %vm1927_vm5, %v5310_v18  ;;  %v4464_v16 = vmax.f32 %v4460_v49, %v4462_v3  ;;  %v4647_v56 = vld [vmem:[#allocation6 + $0x28] sm:$0xff] }
 0x3de   : > { %v4451_v20 = vsel %vm3659_vm10, %v4429_v8, %v4450_v11  ;;  %8019 = vmatprep.mubr.msk.f32.mxu1 %vm1927_vm5, %v4654_v15  ;;  %v8476_v14 = vpack.c.bf16 %v5499_v13, %v5498_v7  ;;  %8143 = vmatprep.mubr.msk.f32.mxu0 %vm1927_vm5, %v5311_v0  ;;  %v4467_v22 = vcombine.high %v4463_v23, %v4463_v23  ;;  %v4656_v31 = vld [vmem:[#allocation5 + $0x31] sm:$0xff]  ;;  %v4648_v60 = vld [vmem:[#allocation6 + $0x30] sm:$0xff] }
 0x3df   : > { %v4452_v21 = vsel %vm3661_vm11, %v4433_v45, %v4451_v20  ;;  %8405 = vmatprep.subr.bf16.mxu1 %v8404_v10  ;;  %v4474_v62 = vrot.slane %v4463_v23, %v10061_v26  ;;  %v4484_v19 = vcombine.high %v4464_v16, %v4464_v16  ;;  %v4491_v34 = vrot.slane %v4464_v16, %v10061_v26  ;;  %v5666_v57 = vld [vmem:[#allocation6 + $0x180] sm:$0xff]  ;;  %v5667_v58 = vld [vmem:[#allocation6 + $0x188] sm:$0xff] }
 0x3e0   : > { %v4610_v25 = vld [vmem:[#allocation5 + $0x3e] sm:$0x1]  ;;  %v4453_v35 = vsel %vm3663_vm12, %v4437_v2, %v4452_v21  ;;  %v4612_v37 = vld [vmem:[#allocation5 + $0x43] sm:$0x1]  ;;  %8407 = vmatpush3.bf16.msra.mxu1 %v8404_v10  ;;  %8477 = vmatprep.subr.bf16.mxu0 %v8476_v14  ;;  %v4481_v40 = vrot.slane %v4467_v22, %v10061_v26  ;;  %v8412_v18 = vpack.c.bf16 %v4649_v1, %v4648_v60  ;;  %v4970_v0 = vld [vmem:[#allocation6 + $0x80] sm:$0xff] }
 0x3e1   : > { %4611 = vst.msk [vmem:[#allocation5 + $0x3c] sm:$0x1] %vm1938_vm6, %v4610_v25  ;;  %v4454_v9 = vsel %vm3665_vm13, %v4441_v4, %v4453_v35  ;;  %4613 = vst.msk [vmem:[#allocation5 + $0x45] sm:$0x1] %vm1938_vm6, %v4612_v37  ;;  %v4482_v33 = vcombine.high %v4474_v62, %v4474_v62  ;;  %v6842_v27 = vrot.slane %v4474_v62, 9  ;;  %8020 = vmatmul.mubr.msk.f32.gmra.mrb[4].mxu1 %vm1927_vm5, %v4655_v29  ;;  %8479 = vmatpush3.bf16.msra.mxu0 %v8476_v14  ;;  %v4976_v60 = vld [vmem:[#allocation6 + $0xb0] sm:$0xff] }
 0x3e2   : > { %8144 = vmatmul.mubr.msk.f32.gmra.mrb[4].mxu0 %vm1927_vm5, %v5312_v30  ;;  %v4455_v12 = vsel %vm3667_vm14, %v4445_v17, %v4454_v9  ;;  %v4498_v39 = vrot.slane %v4484_v19, %v10061_v26  ;;  %v4499_v47 = vcombine.high %v4491_v34, %v4491_v34  ;;  %v6846_v32 = vrot.slane %v4491_v34, 9  ;;  %8022 = vmatprep.mubr.msk.f32.mxu1 %vm1927_vm5, %v4656_v31  ;;  %v4646_v26 = vld [vmem:[#allocation6 + $0x20] sm:$0xff]  ;;  %v4632_v9 = vld [vmem:[#allocation5] sm:$0xff]  ;;  %v4977_v1 = vld [vmem:[#allocation6 + $0xb8] sm:$0xff] }
 0x3e3   : > { %v4456_v43 = vsel %vm3669_vm15, %v4449_v5, %v4455_v12  ;;  %v4483_v48 = vcombine.high %v4481_v40, %v4481_v40  ;;  %v6843_v38 = vrot.slane %v4482_v33, 9  ;;  %v6844_v46 = vrot.slane %v4481_v40, 9  ;;  %v4971_v5 = vld [vmem:[#allocation6 + $0x88] sm:$0xff]  ;;  %v5668_v12 = vld [vmem:[#allocation6 + $0x190] sm:$0xff] }
 0x3e4   : > { %4458 = vst.msk [vmem:[#allocation5 + $0x47] sm:$0xff] %vm1927_vm5, %v4456_v43  ;;  %v4500_v53 = vcombine.high %v4498_v39, %v4498_v39  ;;  %v6847_v55 = vrot.slane %v4499_v47, 9  ;;  %v6848_v41 = vrot.slane %v4498_v39, 9  ;;  %v4533_v36 = vmax.f32 %v4474_v62, %v6842_v27  ;;  %v4973_v43 = vld [vmem:[#allocation6 + $0x98] sm:$0xff] }
 0x3e5   : > { %v6845_v50 = vrot.slane %v4483_v48, 9  ;;  %v4534_v52 = vmax.f32 %v4482_v33, %v6843_v38  ;;  %v4535_v42 = vmax.f32 %v4481_v40, %v6844_v46  ;;  %v4537_v59 = vmax.f32 %v4491_v34, %v6846_v32  ;;  %v5481_v34 = vld [vmem:[#allocation5 + $0xc] sm:$0xff]  ;;  %v4972_v32 = vld [vmem:[#allocation6 + $0x90] sm:$0xff] }
 0x3e6   : > { %v6849_v61 = vrot.slane %v4500_v53, 9  ;;  %v4538_v51 = vmax.f32 %v4499_v47, %v6847_v55  ;;  %v4539_v44 = vmax.f32 %v4498_v39, %v6848_v41  ;;  %v4552_v54 = vrot.slane %v4533_v36, %v10064_v24  ;;  %v5669_v39 = vld [vmem:[#allocation6 + $0x198] sm:$0xff]  ;;  %v4634_v46 = vld [vmem:[#allocation5 + $0x10] sm:$0xff]  ;;  %v5671_v55 = vld [vmem:[#allocation6 + $0x1a8] sm:$0xff] }
 0x3e7   : > { %v4536_v49 = vmax.f32 %v4483_v48, %v6845_v50  ;;  %v4556_v63 = vrot.slane %v4534_v52, %v10064_v24  ;;  %v4560_v6 = vrot.slane %v4535_v42, %v10064_v24  ;;  %v4568_v7 = vrot.slane %v4537_v59, %v10064_v24  ;;  %v4633_v47 = vld [vmem:[#allocation5 + $0x8] sm:$0xff]  ;;  %v10295_v48 = vld [vmem:[#allocation5 + $0x1c] sm:$0xff]  ;;  %v4974_v50 = vld [vmem:[#allocation6 + $0xa0] sm:$0xff] }
 0x3e8   : > { %v5313_v8 = vld [vmem:[#allocation5 + $0x3b] sm:$0xff]  ;;  %v4540_v3 = vmax.f32 %v4500_v53, %v6849_v61  ;;  %v4572_v13 = vrot.slane %v4538_v51, %v10064_v24  ;;  %v8408_v45 = vpack.c.bf16 %v4647_v56, %v4646_v26  ;;  %v4576_v11 = vrot.slane %v4539_v44, %v10064_v24  ;;  %v5670_v53 = vld [vmem:[#allocation6 + $0x1a0] sm:$0xff]  ;;  %v10302_v42 = vld [vmem:[#allocation5 + $0x24] sm:$0xff] }
 0x3e9   : > { %v4657_v2 = vld [vmem:[#allocation5 + $0x39] sm:$0xff]  ;;  %8146 = vmatprep.mubr.msk.f32.mxu0 %vm1927_vm5, %v5313_v8  ;;  %v4564_v4 = vrot.slane %v4536_v49, %v10064_v24  ;;  %v4581_v17 = vsel %vm3657_vm9, %v4556_v63, %v4552_v54  ;;  %v8480_v23 = vpack.c.bf16 %v5667_v58, %v5666_v57  ;;  %v8416_v30 = vpack.c.bf16 %v4971_v5, %v4970_v0  ;;  %v10304_v59 = vld [vmem:[#allocation5 + $0x2c] sm:$0xff] }
 0x3ea   : > { %8023 = vmatmul.mubr.msk.f32.gmra.mrb[6].mxu1 %vm1927_vm5, %v4657_v2  ;;  %v4582_v10 = vsel %vm3659_vm10, %v4560_v6, %v4581_v17  ;;  %8409 = vmatprep.subr.bf16.mxu1 %v8408_v45  ;;  %v4580_v20 = vrot.slane %v4540_v3, %v10064_v24  ;;  %v8484_v38 = vpack.c.bf16 %v5669_v39, %v5668_v12  ;;  %v4635_v36 = vld [vmem:[#allocation5 + $0x18] sm:$0xff]  ;;  %v4636_v56 = vld [vmem:[#allocation5 + $0x20] sm:$0xff]  ;;  %v5673_v51 = vld [vmem:[#allocation6 + $0x1b8] sm:$0xff] }
 0x3eb   : > { %v4614_v15 = vld [vmem:[#allocation5 + $0x48] sm:$0x1]  ;;  %v4583_v16 = vsel %vm3661_vm11, %v4564_v4, %v4582_v10  ;;  %v4616_v14 = vld [vmem:[#allocation5 + $0x4d] sm:$0x1]  ;;  %8411 = vmatpush3.bf16.msra.mxu1 %v8408_v45  ;;  %8481 = vmatprep.subr.bf16.mxu0 %v8480_v23  ;;  %v8420_v41 = vpack.c.bf16 %v4973_v43, %v4972_v32  ;;  %v4975_v52 = vld [vmem:[#allocation6 + $0xa8] sm:$0xff]  ;;  %v8488_v26 = vpack.c.bf16 %v5671_v55, %v5670_v53 }
 0x3ec   : > { %4615 = vst.msk [vmem:[#allocation5 + $0x46] sm:$0x1] %vm1938_vm6, %v4614_v15  ;;  %v4584_v29 = vsel %vm3663_vm12, %v4568_v7, %v4583_v16  ;;  %4617 = vst.msk [vmem:[#allocation5 + $0x4f] sm:$0x1] %vm1938_vm6, %v4616_v14  ;;  %8413 = vmatprep.subr.bf16.mxu1 %v8412_v18  ;;  %v5672_v61 = vld [vmem:[#allocation6 + $0x1b0] sm:$0xff]  ;;  %v8424_v44 = vpack.c.bf16 %v4975_v52, %v4974_v50  ;;  %v4637_v54 = vld [vmem:[#allocation5 + $0x28] sm:$0xff]  ;;  %v8428_v58 = vpack.c.bf16 %v4977_v1, %v4976_v60 }
 0x3ed   : > { %v4585_v21 = vsel %vm3665_vm13, %v4572_v13, %v4584_v29  ;;  %v10312_v49 = vld [vmem:[#allocation5 + $0x34] sm:$0xff]  ;;  %v10314_v63 = vld [vmem:[#allocation5 + $0x3c] sm:$0xff]  ;;  %v8492_v6 = vpack.c.bf16 %v5673_v51, %v5672_v61  ;;  %v5843_v15 = vld [vmem:[#allocation6 + $0x1d8] sm:$0xff] }
 0x3ee   : > { %v4586_v22 = vsel %vm3667_vm14, %v4576_v11, %v4585_v21  ;;  %v4638_v57 = vld [vmem:[#allocation5 + $0x30] sm:$0xff]  ;;  %v5841_v3 = vld [vmem:[#allocation6 + $0x1c8] sm:$0xff]  ;;  %v4959_v10 = vld [vmem:[#allocation5 + $0x2] sm:$0xff] }
 0x3ef   : > { %v4587_v62 = vsel %vm3669_vm15, %v4580_v20, %v4586_v22  ;;  %8415 = vmatpush3.bf16.msra.mxu1 %v8412_v18  ;;  %v5840_v8 = vld [vmem:[#allocation6 + $0x1c0] sm:$0xff]  ;;  %v4639_v7 = vld [vmem:[#allocation5 + $0x38] sm:$0xff]  ;;  %v5146_v16 = vld [vmem:[#allocation6 + $0xd0] sm:$0xff] }
 0x3f0   : > { %4589 = vst.msk [vmem:[#allocation5 + $0x51] sm:$0xff] %vm1927_vm5, %v4587_v62  ;;  %8417 = vmatprep.subr.bf16.mxu1 %v8416_v30  ;;  %v5144_v13 = vld [vmem:[#allocation6 + $0xc0] sm:$0xff]  ;;  %v5145_v45 = vld [vmem:[#allocation6 + $0xc8] sm:$0xff]  ;;  %v8496_v18 = vpack.c.bf16 %v5841_v3, %v5840_v8  ;;  %v5147_v14 = vld [vmem:[#allocation6 + $0xd8] sm:$0xff] }
 0x3f1   : > { %v8432_v0 = vpack.c.bf16 %v5145_v45, %v5144_v13  ;;  %v10339_v20 = vld [vmem:[#allocation5 + $0xa] sm:$0xff]  ;;  %v5845_v22 = vld [vmem:[#allocation6 + $0x1e8] sm:$0xff]  ;;  %v8436_v62 = vpack.c.bf16 %v5147_v14, %v5146_v16 }
 0x3f2   : > { %v5844_v21 = vld [vmem:[#allocation6 + $0x1e0] sm:$0xff]  ;;  %v6015_v43 = vld [vmem:[#allocation6 + $0x208] sm:$0xff]  ;;  %v6017_v50 = vld [vmem:[#allocation6 + $0x218] sm:$0xff] }
 0x3f3   : > { %v5314_v24 = vld [vmem:[#allocation5 + $0x43] sm:$0xff]  ;;  %v4627_v35 = vld [vmem:[#allocation5 + $0x4e] sm:$0x3]  ;;  %v4965_v39 = vld [vmem:[#allocation5 + $0x32] sm:$0xff] }
 0x3f4   : > { %v10281_v31 = vld [vmem:[#allocation5 + $0x46] sm:$0xff]  ;;  %8147 = vmatmul.mubr.msk.f32.gmra.mrb[6].mxu0 %vm1927_vm5, %v5314_v24  ;;  %4629 = vst.msk [vmem:[#allocation5 + $0x62] sm:$0x3] %vm2008_vm7, %v4627_v35  ;;  %v10349_v24 = vld [vmem:[#allocation5 + $0x1a] sm:$0xff]  ;;  %v6014_v32 = vld [vmem:[#allocation6 + $0x200] sm:$0xff] }
 0x3f5   : > { %v4658_v25 = vld [vmem:[#allocation5 + $0x41] sm:$0xff]  ;;  %4628 = vst.msk [vmem:[#allocation5 + $0x5a] sm:$0xff] %vm1927_vm5, %v10281_v31  ;;  %v5149_v35 = vld [vmem:[#allocation6 + $0xe8] sm:$0xff]  ;;  %v5832_v61 = vld [vmem:[#allocation5 + $0x2d] sm:$0xff] }
 0x3f6   : > { %8025 = vmatprep.mubr.msk.f32.mxu1 %vm1927_vm5, %v4658_v25  ;;  %v10322_v2 = vld [vmem:[#allocation5 + $0x44] sm:$0xff]  ;;  %v5148_v25 = vld [vmem:[#allocation6 + $0xe0] sm:$0xff] }
 0x3f7   : > { %v4618_v37 = vld [vmem:[#allocation5 + $0x52] sm:$0x1]  ;;  %v4620_v19 = vld [vmem:[#allocation5 + $0x57] sm:$0x1]  ;;  %v4640_v4 = vld [vmem:[#allocation5 + $0x40] sm:$0xff] }
 0x3f8   : > { %4619 = vst.msk [vmem:[#allocation5 + $0x50] sm:$0x1] %vm1938_vm6, %v4618_v37  ;;  %4621 = vst.msk [vmem:[#allocation5 + $0x59] sm:$0x1] %vm1938_vm6, %v4620_v19  ;;  %v4641_v5 = vld [vmem:[#allocation5 + $0x48] sm:$0xff]  ;;  %v5846_v19 = vld [vmem:[#allocation6 + $0x1f0] sm:$0xff] }
 0x3f9   : > { %v4963_v37 = vld [vmem:[#allocation5 + $0x22] sm:$0xff]  ;;  %v5833_v51 = vld [vmem:[#allocation5 + $0x35] sm:$0xff] }
 0x3fa   : > { %v5830_v52 = vld [vmem:[#allocation5 + $0x1d] sm:$0xff]  ;;  %v6021_v60 = vld [vmem:[#allocation6 + $0x238] sm:$0xff] }
 0x3fb   : > { %v5834_v1 = vld [vmem:[#allocation5 + $0x3d] sm:$0xff] }
 0x3fc   : > { %v5664_v55 = vld [vmem:[#allocation5 + $0x5c] sm:$0xff] }
 0x3fd   : > { %v5838_v8 = vld [vmem:[#allocation5 + $0x5d] sm:$0xff] }
 0x3fe   : > { %v6003_v3 = vld [vmem:[#allocation5 + $0x16] sm:$0xff]  ;;  %v6004_v13 = vld [vmem:[#allocation5 + $0x1e] sm:$0xff] }
 0x3ff   : > { %v5315_v40 = vld [vmem:[#allocation5 + $0x4b] sm:$0xff]  ;;  %v5316_v33 = vld [vmem:[#allocation5 + $0x53] sm:$0xff] }
 0x400   : > { %v4659_v27 = vld [vmem:[#allocation5 + $0x49] sm:$0xff]  ;;  %8149 = vmatprep.mubr.msk.f32.mxu0 %vm1927_vm5, %v5315_v40  ;;  %v10333_v11 = vld [vmem:[#allocation5 + $0x54] sm:$0xff] }
 0x401   : > { %8026 = vmatmul.mubr.msk.f32.gmra.mrb[8].mxu1 %vm1927_vm5, %v4659_v27  ;;  %8150 = vmatmul.mubr.msk.f32.gmra.mrb[8].mxu0 %vm1927_vm5, %v5316_v33  ;;  %v10324_v17 = vld [vmem:[#allocation5 + $0x4c] sm:$0xff]  ;;  %v5150_v33 = vld [vmem:[#allocation6 + $0xf0] sm:$0xff]  ;;  %v6011_v45 = vld [vmem:[#allocation5 + $0x56] sm:$0xff] }
 0x402   : > { %8044 = vmatprep.mubr.msk.f32.mxu1 %vm1927_vm5, %v4632_v9  ;;  %8168 = vmatprep.mubr.msk.f32.mxu0 %vm1927_vm5, %v5481_v34  ;;  %v5847_v34 = vld [vmem:[#allocation6 + $0x1f8] sm:$0xff]  ;;  %v8440_v9 = vpack.c.bf16 %v5149_v35, %v5148_v25 }
 0x403   : > { %v10359_v40 = vld [vmem:[#allocation5 + $0x2a] sm:$0xff]  ;;  %v8508_v12 = vpack.c.bf16 %v5847_v34, %v5846_v19 }
 0x404   : > { %v5151_v27 = vld [vmem:[#allocation6 + $0xf8] sm:$0xff]  ;;  %v6940_v34 = vld [vmem:[%s10436_s6] ss:$0 sm:$0xff] }
 0x405   : > { %8045 = vmatmul.mubr.msk.f32.vlgmr.msra.gmra.mrb[0].mxu1 %vm1927_vm5, %v4633_v47  ;;  %8169 = vmatmul.mubr.msk.f32.vlgmr.msra.gmra.mrb[0].mxu0 %vm1927_vm5, %v10172_v28  ;;  %v8444_v47 = vpack.c.bf16 %v5151_v27, %v5150_v33  ;;  %v4968_v53 = vld [vmem:[#allocation5 + $0x4a] sm:$0xff] }
 0x406   : > { %8419 = vmatpush3.bf16.msra.mxu1 %v8416_v30  ;;  %8171 = vmatprep.mubr.msk.f32.mxu0 %vm1927_vm5, %v10295_v48  ;;  %v10345_v30 = vld [vmem:[#allocation5 + $0x12] sm:$0xff] }
 0x407   : > { %8483 = vmatpush3.bf16.msra.mxu0 %v8480_v23  ;;  %8047 = vmatprep.mubr.msk.f32.mxu1 %vm1927_vm5, %v4634_v46  ;;  %v5842_v23 = vld [vmem:[#allocation6 + $0x1d0] sm:$0xff]  ;;  %v8512_v46 = vpack.c.bf16 %v6015_v43, %v6014_v32 }
 0x408   : > { %8485 = vmatprep.subr.bf16.mxu0 %v8484_v38  ;;  %8421 = vmatprep.subr.bf16.mxu1 %v8420_v41  ;;  %v8500_v29 = vpack.c.bf16 %v5843_v15, %v5842_v23 }
 0x409   : > { %8048 = vmatmul.mubr.msk.f32.gmra.mrb[2].mxu1 %vm1927_vm5, %v4635_v36  ;;  %8172 = vmatmul.mubr.msk.f32.gmra.mrb[2].mxu0 %vm1927_vm5, %v10302_v42  ;;  %v6016_v36 = vld [vmem:[#allocation6 + $0x210] sm:$0xff] }
 0x40a   : > { %8423 = vmatpush3.bf16.msra.mxu1 %v8420_v41  ;;  %8174 = vmatprep.mubr.msk.f32.mxu0 %vm1927_vm5, %v10304_v59  ;;  %v5829_v41 = vld [vmem:[#allocation5 + $0x15] sm:$0xff] }
 0x40b   : > { %8487 = vmatpush3.bf16.msra.mxu0 %v8484_v38  ;;  %8050 = vmatprep.mubr.msk.f32.mxu1 %vm1927_vm5, %v4636_v56  ;;  %v4967_v38 = vld [vmem:[#allocation5 + $0x42] sm:$0xff]  ;;  %v6019_v56 = vld [vmem:[#allocation6 + $0x228] sm:$0xff] }
 0x40c   : > { %8489 = vmatprep.subr.bf16.mxu0 %v8488_v26  ;;  %8425 = vmatprep.subr.bf16.mxu1 %v8424_v44 }
 0x40d   : > { %8051 = vmatmul.mubr.msk.f32.gmra.mrb[4].mxu1 %vm1927_vm5, %v4637_v54  ;;  %8175 = vmatmul.mubr.msk.f32.gmra.mrb[4].mxu0 %vm1927_vm5, %v10312_v49  ;;  %v6020_v54 = vld [vmem:[#allocation6 + $0x230] sm:$0xff] }
 0x40e   : > { %8427 = vmatpush3.bf16.msra.mxu1 %v8424_v44  ;;  %8177 = vmatprep.mubr.msk.f32.mxu0 %vm1927_vm5, %v10314_v63 }
 0x40f   : > { %8491 = vmatpush3.bf16.msra.mxu0 %v8488_v26  ;;  %8053 = vmatprep.mubr.msk.f32.mxu1 %vm1927_vm5, %v4638_v57  ;;  %v6018_v26 = vld [vmem:[#allocation6 + $0x220] sm:$0xff] }
 0x410   : > { %8493 = vmatprep.subr.bf16.mxu0 %v8492_v6  ;;  %8429 = vmatprep.subr.bf16.mxu1 %v8428_v58  ;;  %v8520_v44 = vpack.c.bf16 %v6019_v56, %v6018_v26  ;;  %v5837_v57 = vld [vmem:[#allocation5 + $0x55] sm:$0xff] }
 0x411   : > { %8054 = vmatmul.mubr.msk.f32.gmra.mrb[6].mxu1 %vm1927_vm5, %v4639_v7  ;;  %8178 = vmatmul.mubr.msk.f32.gmra.mrb[6].mxu0 %vm1927_vm5, %v10322_v2  ;;  %v6010_v7 = vld [vmem:[#allocation5 + $0x4e] sm:$0xff] }
 0x412   : > { %8056 = vmatprep.mubr.msk.f32.mxu1 %vm1927_vm5, %v4640_v4  ;;  %8180 = vmatprep.mubr.msk.f32.mxu0 %vm1927_vm5, %v10324_v17  ;;  %v6012_v4 = vld [vmem:[#allocation5 + $0x5e] sm:$0xff] }
 0x413   : > { %8495 = vmatpush3.bf16.msra.mxu0 %v8492_v6  ;;  %8431 = vmatpush3.bf16.msra.mxu1 %v8428_v58  ;;  %v5836_v6 = vld [vmem:[#allocation5 + $0x4d] sm:$0xff] }
 0x414   : > { %8497 = vmatprep.subr.bf16.mxu0 %v8496_v18  ;;  %8433 = vmatprep.subr.bf16.mxu1 %v8432_v0  ;;  %v5142_v58 = vld [vmem:[#allocation5 + $0x52] sm:$0xff] }
 0x415   : > { %8057 = vmatmul.mubr.msk.f32.gmra.mrb[8].mxu1 %vm1927_vm5, %v4641_v5  ;;  %8181 = vmatmul.mubr.msk.f32.gmra.mrb[8].mxu0 %vm1927_vm5, %v10333_v11 }
 0x416   : > { %8075 = vmatprep.mubr.msk.f32.mxu1 %vm1927_vm5, %v4959_v10  ;;  %8199 = vmatprep.mubr.msk.f32.mxu0 %vm1927_vm5, %v10172_v28  ;;  %v8504_v28 = vpack.c.bf16 %v5845_v22, %v5844_v21 }
 0x419   : > { %8076 = vmatmul.mubr.msk.f32.vlgmr.msra.gmra.mrb[0].mxu1 %vm1927_vm5, %v10339_v20  ;;  %8200 = vmatmul.mubr.msk.f32.vlgmr.msra.gmra.mrb[0].mxu0 %vm1927_vm5, %v10295_v48  ;;  %v4966_v48 = vld [vmem:[#allocation5 + $0x3a] sm:$0xff] }
 0x41a   : > { %8435 = vmatpush3.bf16.msra.mxu1 %v8432_v0  ;;  %8202 = vmatprep.mubr.msk.f32.mxu0 %vm1927_vm5, %v10302_v42  ;;  %v5831_v42 = vld [vmem:[#allocation5 + $0x25] sm:$0xff] }
 0x41b   : > { %8499 = vmatpush3.bf16.msra.mxu0 %v8496_v18  ;;  %8078 = vmatprep.mubr.msk.f32.mxu1 %vm1927_vm5, %v10345_v30  ;;  %v6007_v18 = vld [vmem:[#allocation5 + $0x36] sm:$0xff] }
 0x41c   : > { %8501 = vmatprep.subr.bf16.mxu0 %v8500_v29  ;;  %8437 = vmatprep.subr.bf16.mxu1 %v8436_v62 }
 0x41d   : > { %8079 = vmatmul.mubr.msk.f32.gmra.mrb[2].mxu1 %vm1927_vm5, %v10349_v24  ;;  %8203 = vmatmul.mubr.msk.f32.gmra.mrb[2].mxu0 %vm1927_vm5, %v10304_v59  ;;  %v8516_v59 = vpack.c.bf16 %v6017_v50, %v6016_v36 }
 0x41e   : > { %8439 = vmatpush3.bf16.msra.mxu1 %v8436_v62  ;;  %8205 = vmatprep.mubr.msk.f32.mxu0 %vm1927_vm5, %v10312_v49  ;;  %v5835_v49 = vld [vmem:[#allocation5 + $0x45] sm:$0xff] }
 0x41f   : > { %8503 = vmatpush3.bf16.msra.mxu0 %v8500_v29  ;;  %8081 = vmatprep.mubr.msk.f32.mxu1 %vm1927_vm5, %v4963_v37 }
 0x420   : > { %8505 = vmatprep.subr.bf16.mxu0 %v8504_v28  ;;  %8441 = vmatprep.subr.bf16.mxu1 %v8440_v9 }
 0x421   : > { %8082 = vmatmul.mubr.msk.f32.gmra.mrb[4].mxu1 %vm1927_vm5, %v10359_v40  ;;  %8206 = vmatmul.mubr.msk.f32.gmra.mrb[4].mxu0 %vm1927_vm5, %v10314_v63  ;;  %v8524_v63 = vpack.c.bf16 %v6021_v60, %v6020_v54 }
 0x422   : > { %8443 = vmatpush3.bf16.msra.mxu1 %v8440_v9  ;;  %8208 = vmatprep.mubr.msk.f32.mxu0 %vm1927_vm5, %v10322_v2  ;;  %v6005_v2 = vld [vmem:[#allocation5 + $0x26] sm:$0xff] }
 0x423   : > { %8507 = vmatpush3.bf16.msra.mxu0 %v8504_v28  ;;  %8084 = vmatprep.mubr.msk.f32.mxu1 %vm1927_vm5, %v4965_v39 }
 0x424   : > { %8509 = vmatprep.subr.bf16.mxu0 %v8508_v12  ;;  %8445 = vmatprep.subr.bf16.mxu1 %v8444_v47 }
 0x425   : > { %8085 = vmatmul.mubr.msk.f32.gmra.mrb[6].mxu1 %vm1927_vm5, %v4966_v48  ;;  %8209 = vmatmul.mubr.msk.f32.gmra.mrb[6].mxu0 %vm1927_vm5, %v10324_v17  ;;  %v6006_v17 = vld [vmem:[#allocation5 + $0x2e] sm:$0xff] }
 0x426   : > { %8087 = vmatprep.mubr.msk.f32.mxu1 %vm1927_vm5, %v4967_v38  ;;  %8211 = vmatprep.mubr.msk.f32.mxu0 %vm1927_vm5, %v10333_v11 }
 0x427   : > { %8511 = vmatpush3.bf16.msra.mxu0 %v8508_v12  ;;  %8447 = vmatpush3.bf16.msra.mxu1 %v8444_v47 }
 0x428   : > { %8513 = vmatprep.subr.bf16.mxu0 %v8512_v46  ;;  %8538 = vmatprep.subr.bf16.mxu1 %v8512_v46 }
 0x429   : > { %8088 = vmatmul.mubr.msk.f32.gmra.mrb[8].mxu1 %vm1927_vm5, %v4968_v53  ;;  %8212 = vmatmul.mubr.msk.f32.gmra.mrb[8].mxu0 %vm1927_vm5, %v5664_v55 }
 0x42a   : > { %8106 = vmatprep.mubr.msk.f32.mxu1 %vm1927_vm5, %v10339_v20  ;;  %8230 = vmatprep.mubr.msk.f32.mxu0 %vm1927_vm5, %v5829_v41 }
 0x42d   : > { %8107 = vmatmul.mubr.msk.f32.vlgmr.msra.gmra.mrb[0].mxu1 %vm1927_vm5, %v10345_v30  ;;  %8231 = vmatmul.mubr.msk.f32.vlgmr.msra.gmra.mrb[0].mxu0 %vm1927_vm5, %v5830_v52 }
 0x42e   : > { %8542 = vmatpush3.bf16.msra.mxu1 %v8512_v46  ;;  %8233 = vmatprep.mubr.msk.f32.mxu0 %vm1927_vm5, %v5831_v42 }
 0x42f   : > { %8515 = vmatpush3.bf16.msra.mxu0 %v8512_v46  ;;  %8109 = vmatprep.mubr.msk.f32.mxu1 %vm1927_vm5, %v10349_v24 }
 0x430   : > { %8517 = vmatprep.subr.bf16.mxu0 %v8516_v59  ;;  %8539 = vmatprep.subr.bf16.mxu1 %v8516_v59 }
 0x431   : > { %8110 = vmatmul.mubr.msk.f32.gmra.mrb[2].mxu1 %vm1927_vm5, %v4963_v37  ;;  %8234 = vmatmul.mubr.msk.f32.gmra.mrb[2].mxu0 %vm1927_vm5, %v5832_v61 }
 0x432   : > { %8543 = vmatpush3.bf16.msra.mxu1 %v8516_v59  ;;  %8236 = vmatprep.mubr.msk.f32.mxu0 %vm1927_vm5, %v5833_v51 }
 0x433   : > { %8519 = vmatpush3.bf16.msra.mxu0 %v8516_v59  ;;  %8112 = vmatprep.mubr.msk.f32.mxu1 %vm1927_vm5, %v10359_v40 }
 0x434   : > { %8521 = vmatprep.subr.bf16.mxu0 %v8520_v44  ;;  %8540 = vmatprep.subr.bf16.mxu1 %v8520_v44 }
 0x435   : > { %8113 = vmatmul.mubr.msk.f32.gmra.mrb[4].mxu1 %vm1927_vm5, %v4965_v39  ;;  %8237 = vmatmul.mubr.msk.f32.gmra.mrb[4].mxu0 %vm1927_vm5, %v5834_v1 }
 0x436   : > { %8544 = vmatpush3.bf16.msra.mxu1 %v8520_v44  ;;  %8239 = vmatprep.mubr.msk.f32.mxu0 %vm1927_vm5, %v5835_v49 }
 0x437   : > { %8523 = vmatpush3.bf16.msra.mxu0 %v8520_v44  ;;  %8115 = vmatprep.mubr.msk.f32.mxu1 %vm1927_vm5, %v4966_v48 }
 0x438   : > { %8525 = vmatprep.subr.bf16.mxu0 %v8524_v63  ;;  %8541 = vmatprep.subr.bf16.mxu1 %v8524_v63 }
 0x439   : > { %8116 = vmatmul.mubr.msk.f32.gmra.mrb[6].mxu1 %vm1927_vm5, %v4967_v38  ;;  %8240 = vmatmul.mubr.msk.f32.gmra.mrb[6].mxu0 %vm1927_vm5, %v5836_v6 }
 0x43a   : > { %8118 = vmatprep.mubr.msk.f32.mxu1 %vm1927_vm5, %v4968_v53  ;;  %8242 = vmatprep.mubr.msk.f32.mxu0 %vm1927_vm5, %v5837_v57 }
 0x43b   : > { %8527 = vmatpush3.bf16.msra.mxu0 %v8524_v63  ;;  %8545 = vmatpush3.bf16.msra.mxu1 %v8524_v63 }
 0x43d   : > { %8119 = vmatmul.mubr.msk.f32.gmra.mrb[8].mxu1 %vm1927_vm5, %v5142_v58  ;;  %8243 = vmatmul.mubr.msk.f32.gmra.mrb[8].mxu0 %vm1927_vm5, %v5838_v8 }
 0x43e   : > { %8270 = vmatprep.mubr.msk.f32.mxu1 %vm1927_vm5, %v10281_v31  ;;  %8261 = vmatprep.mubr.msk.f32.mxu0 %vm1927_vm5, %v6003_v3  ;;  %v6008_v31 = vld [vmem:[#allocation5 + $0x3e] sm:$0xff] }
 0x441   : > { %8271 = vmatmul.mubr.msk.f32.vlgmr.msra.gmra.mrb[10].mxu1 %vm1927_vm5, %v6010_v7  ;;  %8262 = vmatmul.mubr.msk.f32.vlgmr.msra.gmra.mrb[0].mxu0 %vm1927_vm5, %v6004_v13 }
 0x442   : > { %8273 = vmatprep.mubr.msk.f32.mxu1 %vm1927_vm5, %v6011_v45  ;;  %8264 = vmatprep.mubr.msk.f32.mxu0 %vm1927_vm5, %v6005_v2 }
 0x445   : > { %8274 = vmatmul.mubr.msk.f32.gmra.mrb[12].mxu1 %vm1927_vm5, %v6012_v4  ;;  %8265 = vmatmul.mubr.msk.f32.gmra.mrb[2].mxu0 %vm1927_vm5, %v6006_v17 }
 0x446   : > { %8267 = vmatprep.mubr.msk.f32.mxu0 %vm1927_vm5, %v6007_v18 }
 0x449   : > { %8268 = vmatmul.mubr.msk.f32.gmra.mrb[4].mxu0 %vm1927_vm5, %v6008_v31 }
 0x500   : > { %v8108_v0 = vpop.f32.mrb[0].mxu1 }
 0x501   : > { %v5248_v5 = vpop.f32.mrb[1].mxu1 }
 0x504   : > { %v8111_v11 = vpop.f32.mrb[2].mxu1 }
 0x505   : > { %v5258_v10 = vpop.f32.mrb[3].mxu1 }
 0x508   : > { %v8114_v23 = vpop.f32.mrb[4].mxu1 }
 0x509   : > { %v5268_v15 = vpop.f32.mrb[5].mxu1 }
 0x50c   : > { %v8117_v20 = vpop.f32.mrb[6].mxu1  ;;  %v8241_v16 = vpop.f32.mrb[6].mxu0 }
 0x50d   : > { %v5278_v14 = vpop.f32.mrb[7].mxu1  ;;  %v5974_v29 = vpop.f32.mrb[7].mxu0  ;;  %v8552_v30 = vadd.f32 %v8241_v16, %v8117_v20 }
 0x50e   : > { %v8554_v21 = vadd.f32 %v5974_v29, %v5278_v14 }
 0x510   : > { %v8120_v22 = vpop.f32.mrb[8].mxu1  ;;  %v8244_v62 = vpop.f32.mrb[8].mxu0 }
 0x511   : > { %v5288_v24 = vpop.f32.mrb[9].mxu1  ;;  %v5984_v25 = vpop.f32.mrb[9].mxu0  ;;  %v8556_v35 = vadd.f32 %v8244_v62, %v8120_v22 }
 0x512   : > { %v8558_v28 = vadd.f32 %v5984_v25, %v5288_v24 }
 0x514   : > { %v8272_v37 = vpop.f32.mrb[10].mxu1  ;;  %v8263_v19 = vpop.f32.mrb[0].mxu0 }
 0x515   : > { %v8553_v9 = vadd.f32 %v8552_v30, %v8272_v37  ;;  %v6148_v40 = vpop.f32.mrb[11].mxu1  ;;  %v8546_v33 = vadd.f32 %v8263_v19, %v8108_v0  ;;  %v6118_v27 = vpop.f32.mrb[1].mxu0 }
 0x516   : > { %v8555_v12 = vadd.f32 %v8554_v21, %v6148_v40  ;;  %v8547_v39 = vadd.f32 %v6118_v27, %v5248_v5 }
 0x517   : > { %v6191_v47 = vadd.f32 %v8553_v9, %v6940_v34  ;;  %v6185_v32 = vadd.f32 %v8546_v33, %v6940_v34 }
 0x518   : > { %v6190_v43 = vadd.f32 %v8555_v12, %v6940_v34  ;;  %v8275_v48 = vpop.f32.mrb[12].mxu1  ;;  %v6184_v38 = vadd.f32 %v8547_v39, %v6940_v34  ;;  %v8266_v46 = vpop.f32.mrb[2].mxu0 }
 0x519   : > { %v6201_v53 = vmax.f32 %v6191_v47, 0.0  ;;  %v8557_v55 = vadd.f32 %v8556_v35, %v8275_v48  ;;  %v6158_v41 = vpop.f32.mrb[13].mxu1  ;;  %v6195_v36 = vmax.f32 %v6185_v32, 0.0  ;;  %v8548_v50 = vadd.f32 %v8266_v46, %v8111_v11  ;;  %v6128_v52 = vpop.f32.mrb[3].mxu0 }
 0x51a   : > { %v6200_v42 = vmax.f32 %v6190_v43, 0.0  ;;  %v8559_v59 = vadd.f32 %v8558_v28, %v6158_v41  ;;  %v6194_v26 = vmax.f32 %v6184_v38, 0.0  ;;  %v8549_v56 = vadd.f32 %v6128_v52, %v5258_v10 }
 0x51b   : > { %6211 = vst [vmem:[%s8838_s28 + $0x38] sm:$0xff] %v6201_v53  ;;  %v6193_v61 = vadd.f32 %v8557_v55, %v6940_v34  ;;  %6205 = vst [vmem:[%s8838_s28 + $0x8] sm:$0xff] %v6195_v36  ;;  %v6187_v51 = vadd.f32 %v8548_v50, %v6940_v34 }
 0x51c   : > { %6210 = vst [vmem:[%s8838_s28 + $0x30] sm:$0xff] %v6200_v42  ;;  %v6192_v44 = vadd.f32 %v8559_v59, %v6940_v34  ;;  %6204 = vst [vmem:[%s8838_s28] sm:$0xff] %v6194_v26  ;;  %v6186_v54 = vadd.f32 %v8549_v56, %v6940_v34  ;;  %v8269_v60 = vpop.f32.mrb[4].mxu0 }
 0x51d   : > { %v6203_v1 = vmax.f32 %v6193_v61, 0.0  ;;  %v6197_v49 = vmax.f32 %v6187_v51, 0.0  ;;  %v8550_v63 = vadd.f32 %v8269_v60, %v8114_v23  ;;  %v6138_v6 = vpop.f32.mrb[5].mxu0 }
 0x51e   : > { %v6202_v57 = vmax.f32 %v6192_v44, 0.0  ;;  %v6196_v58 = vmax.f32 %v6186_v54, 0.0  ;;  %v8551_v8 = vadd.f32 %v6138_v6, %v5268_v15 }
 0x51f   : > { %6213 = vst [vmem:[%s8838_s28 + $0x48] sm:$0xff] %v6203_v1  ;;  %6207 = vst [vmem:[%s8838_s28 + $0x18] sm:$0xff] %v6197_v49  ;;  %v6189_v3 = vadd.f32 %v8550_v63, %v6940_v34 }
 0x520   : > { %6212 = vst [vmem:[%s8838_s28 + $0x40] sm:$0xff] %v6202_v57  ;;  %6206 = vst [vmem:[%s8838_s28 + $0x10] sm:$0xff] %v6196_v58  ;;  %v6188_v7 = vadd.f32 %v8551_v8, %v6940_v34 }
 0x521   : > { %v6199_v13 = vmax.f32 %v6189_v3, 0.0 }
 0x522   : > { %v6198_v45 = vmax.f32 %v6188_v7, 0.0 }
 0x523   : > { %6209 = vst [vmem:[%s8838_s28 + $0x28] sm:$0xff] %v6199_v13 }
 0x524   : > { %6208 = vst [vmem:[%s8838_s28 + $0x20] sm:$0xff] %v6198_v45 }
 0x525 PF: > { %s18_s24 = sadd.s32 1, %s8717_s24  }
 0x526   : > { %p15_p9 = scmp.ge.s32.totalorder %s18_s24, 4  }
 0x528   :  { %17 = sbr.rel (!%p15_p9) target bundleno = 1 (0x1), region = 178 }
 0x52f   :  { %6235 = vsyncpa [#allocation7], 1 }
 0x530   :  { %6237 = vsyncpa [#allocation7 + $0x1], 1 }

</bundles_post_ra>
